<compile_context>
chip_gen: v5e
topology: v5e:2x2
jax: 0.10.0
libtpu: 0.0.40
codegen_flags: <defaults>
</compile_context>

<pallas_src>
import functools

import numpy as np
import jax
import jax.numpy as jnp
from jax.experimental import pallas as pl
from jax.experimental.pallas import tpu as pltpu


# ----------------------------------------------------------------------------
# Pallas kernel: one batch tile (TB elements) per grid step, whole forward.
# Input slab is channels-first (k, TB*N) with points lane-dense.
# ----------------------------------------------------------------------------
def tnet_kernel(x_ref,
                w1, b1, w2, b2, w3, b3,      # point-wise "conv" stages (BN fused)
                w4, b4, w5, b5, w6, b6,      # FC head (BN fused; b6 includes identity)
                o_ref, g_ref,                # output tile, (TB, 1024) pooled scratch
                *, n_points, chunk_b):
    TB = o_ref.shape[0]
    N = n_points
    CB = chunk_b                     # batch elements per inner chunk
    CP = CB * N                      # points per inner chunk
    n_chunks = x_ref.shape[1] // CP  # == TB // CB

    def chunk_body(c, carry):
        col0 = c * CP
        if CP % 128 == 0:
            col0 = pl.multiple_of(col0, 128)
        xc = x_ref[:, pl.ds(col0, CP)]                          # (k, CP), lane-dense

        # stage 1: k -> 64  (single dot over all CP points; no per-element unroll)
        h = jnp.dot(w1[...], xc, preferred_element_type=jnp.float32) + b1[...]
        h = jnp.maximum(h, 0.0)                                  # (64, CP)
        # stage 2: 64 -> 128
        h = jnp.dot(w2[...], h, preferred_element_type=jnp.float32) + b2[...]
        h = jnp.maximum(h, 0.0)                                  # (128, CP)

        # stage 3: 128 -> 1024, transposed-LHS contraction (no explicit transpose)
        w3v = w3[...]
        h3 = jax.lax.dot_general(
            h.astype(w3v.dtype), w3v,
            dimension_numbers=(((0,), (0,)), ((), ())),
            preferred_element_type=jnp.float32) + b3[...]
        h3 = jnp.maximum(h3, 0.0)                                # (CP, 1024)

        # fused global max-pool over points for the CB batch elements in this chunk
        pooled = jnp.max(h3.reshape(CB, N, h3.shape[-1]), axis=1)   # (CB, 1024)
        g_ref[pl.ds(c * CB, CB), :] = pooled
        return carry

    jax.lax.fori_loop(0, n_chunks, chunk_body, 0)

    # ---- FC head on the whole (TB, 1024) pooled batch tile ----
    w4v, w5v = w4[...], w5[...]
    g = g_ref[...]
    g = jnp.maximum(jnp.dot(g.astype(w4v.dtype), w4v,
                            preferred_element_type=jnp.float32) + b4[...], 0.0)
    g = jnp.maximum(jnp.dot(g.astype(w5v.dtype), w5v,
                            preferred_element_type=jnp.float32) + b5[...], 0.0)
    # final linear (f32): identity folded into b6, zero-padded to lane-dense width
    o_ref[...] = jnp.dot(g, w6[...], preferred_element_type=jnp.float32) + b6[...]


# ----------------------------------------------------------------------------
# Parameter init (deterministic, synthetic) + eval-mode BN fusion
# ----------------------------------------------------------------------------
def _linear_like(key, out_c, in_c):
    kw, kb = jax.random.split(key)
    bound = 1.0 / np.sqrt(in_c)
    w = jax.random.uniform(kw, (out_c, in_c), jnp.float32, -bound, bound)
    b = jax.random.uniform(kb, (out_c,), jnp.float32, -bound, bound)
    return w, b


def _bn_like(key, c):
    k1, k2, k3, k4 = jax.random.split(key, 4)
    gamma = jax.random.uniform(k1, (c,), jnp.float32, 0.5, 1.5)
    beta = jax.random.uniform(k2, (c,), jnp.float32, -0.5, 0.5)
    mean = jax.random.uniform(k3, (c,), jnp.float32, -0.5, 0.5)
    var = jax.random.uniform(k4, (c,), jnp.float32, 0.5, 1.5)
    return gamma, beta, mean, var


def init_tnet_params(key, k):
    ks = jax.random.split(key, 11)
    params = {}
    params["conv1"] = _linear_like(ks[0], 64, k)
    params["bn1"] = _bn_like(ks[1], 64)
    params["conv2"] = _linear_like(ks[2], 128, 64)
    params["bn2"] = _bn_like(ks[3], 128)
    params["conv3"] = _linear_like(ks[4], 1024, 128)
    params["bn3"] = _bn_like(ks[5], 1024)
    params["lin1"] = _linear_like(ks[6], 512, 1024)
    params["bnl1"] = _bn_like(ks[7], 512)
    params["lin2"] = _linear_like(ks[8], 256, 512)
    params["bnl2"] = _bn_like(ks[9], 256)
    params["lin3"] = _linear_like(ks[10], k * k, 256)
    return params


def _fuse_cf(w, b, bn, eps=1e-5):
    """Channels-first: BN(W @ x + b) -> W_eff @ x + b_eff (eval-mode BN)."""
    gamma, beta, mean, var = bn
    s = gamma / jnp.sqrt(var + eps)
    return w * s[:, None], ((b - mean) * s + beta).reshape(-1, 1)


def _fuse_cl(w, b, bn, eps=1e-5):
    """Channels-last: BN(x @ W.T + b) -> x @ W_eff + b_eff (eval-mode BN)."""
    gamma, beta, mean, var = bn
    s = gamma / jnp.sqrt(var + eps)
    return w.T * s[None, :], ((b - mean) * s + beta).reshape(1, -1)


def fuse_params(params, k, out_pad, matmul_dtype=jnp.bfloat16):
    w1, b1 = _fuse_cf(*params["conv1"], params["bn1"])     # (64,k), (64,1)
    w2, b2 = _fuse_cf(*params["conv2"], params["bn2"])     # (128,64), (128,1)
    w3, b3 = _fuse_cl(*params["conv3"], params["bn3"])     # (128,1024), (1,1024)
    w4, b4 = _fuse_cl(*params["lin1"], params["bnl1"])     # (1024,512), (1,512)
    w5, b5 = _fuse_cl(*params["lin2"], params["bnl2"])     # (512,256), (1,256)
    w6_raw, b6_raw = params["lin3"]                        # (k*k,256), (k*k,)
    kk = k * k
    # pad final weight/bias to lane-dense width; fold flattened identity into bias
    w6 = jnp.zeros((w6_raw.shape[1], out_pad), jnp.float32).at[:, :kk].set(w6_raw.T)
    b6 = jnp.zeros((1, out_pad), jnp.float32).at[0, :kk].set(
        b6_raw + jnp.eye(k, dtype=jnp.float32).reshape(-1))
    # big matmul weights in the MXU-native dtype (accumulation stays f32 in-kernel);
    # biases are added post-accumulation in f32; final lin3 stays f32.
    w3 = w3.astype(matmul_dtype)
    w4 = w4.astype(matmul_dtype)
    w5 = w5.astype(matmul_dtype)
    return (w1, b1, w2, b2, w3, b3, w4, b4, w5, b5, w6, b6)


# ----------------------------------------------------------------------------
# Tile-size selection
# ----------------------------------------------------------------------------
def _pick_batch_tile(B, requested=None):
    if requested is not None:
        assert B % requested == 0, "batch must be divisible by the batch tile"
        return requested
    if B <= 8:
        return B                                   # single tile == full batch dim
    # sublane-aligned (multiple-of-8) divisors of B, capped for VMEM
    cands = [t for t in range(8, min(B, 64) + 1, 8) if B % t == 0]
    if not cands:
        return B
    multi = [t for t in cands if B // t >= 2]      # keep >=2 grid steps (v7x 2 TCs)
    return max(multi) if multi else max(cands)


def _pick_point_chunk(TB):
    # batch elements per stage-1..3 chunk; bounds the (CB*N, 1024) f32 slab (~4 MiB)
    for cb in range(min(TB, 8), 0, -1):
        if TB % cb == 0:
            return cb
    return 1


# ----------------------------------------------------------------------------
# Wrapper: pallas_call with grid over batch tiles
# ----------------------------------------------------------------------------
def tnet_forward(x_ncw, fused, k, *, batch_tile=None):
    B, kc, N = x_ncw.shape
    assert kc == k
    out_pad = fused[-1].shape[1]
    feat = fused[4].shape[1]                       # 1024 conv3 channels
    TB = _pick_batch_tile(B, batch_tile)
    CB = _pick_point_chunk(TB)
    assert B % TB == 0 and TB % CB == 0
    assert (TB * N) % 128 == 0 or TB == B, "batch tile must give a lane-aligned point slab"

    # Layout plumbing only: channels-first, lane-dense (k, B*N) slab so stages 1-2
    # run as single matmuls over all points of a chunk (no in-kernel relayout).
    x2d = jnp.transpose(x_ncw.astype(jnp.float32), (1, 0, 2)).reshape(k, B * N)

    def const_spec(a):
        zeros = (0,) * a.ndim
        return pl.BlockSpec(a.shape, lambda i, z=zeros: z)

    kernel = functools.partial(tnet_kernel, n_points=N, chunk_b=CB)

    out = pl.pallas_call(
        kernel,
        out_shape=jax.ShapeDtypeStruct((B, out_pad), jnp.float32),
        grid_spec=pltpu.PrefetchScalarGridSpec(
            num_scalar_prefetch=0,
            grid=(B // TB,),
            in_specs=[pl.BlockSpec((k, TB * N), lambda i: (0, i))]
                     + [const_spec(a) for a in fused],
            out_specs=pl.BlockSpec((TB, out_pad), lambda i: (i, 0)),
            scratch_shapes=[pltpu.VMEM((TB, feat), jnp.float32)],
        ),
        compiler_params=pltpu.CompilerParams(
            dimension_semantics=("parallel",),
            # ~15 MiB peak footprint at the default tile sizes; raise on v5e/v6e
            # (128 MiB physical) if batch_tile is pushed much higher.
            vmem_limit_bytes=32 * 1024 * 1024,
        ),
    )(x2d, *fused)
    return out[:, :k * k].reshape(B, k, k)


# ----------------------------------------------------------------------------
# Pure-JAX reference from the *raw* params (validates BN fusion + kernel)
# ----------------------------------------------------------------------------
def tnet_reference(x_ncw, params, k):
    def bn(x, p, eps=1e-5):
        gamma, beta, mean, var = p
        return (x - mean) / jnp.sqrt(var + eps) * gamma + beta

    x = jnp.transpose(x_ncw, (0, 2, 1)).astype(jnp.float32)     # (B, N, k)
    w, b = params["conv1"]; h = jax.nn.relu(bn(x @ w.T + b, params["bn1"]))
    w, b = params["conv2"]; h = jax.nn.relu(bn(h @ w.T + b, params["bn2"]))
    w, b = params["conv3"]; h = jax.nn.relu(bn(h @ w.T + b, params["bn3"]))
    g = jnp.max(h, axis=1)                                       # (B, 1024)
    w, b = params["lin1"]; g = jax.nn.relu(bn(g @ w.T + b, params["bnl1"]))
    w, b = params["lin2"]; g = jax.nn.relu(bn(g @ w.T + b, params["bnl2"]))
    w, b = params["lin3"]; g = g @ w.T + b + jnp.eye(k, dtype=jnp.float32).reshape(1, -1)
    return g.reshape(-1, k, k)


if __name__ == "__main__":
    K = 4            # TNet(k=4)
    B = 2            # batch
    N = 128          # number of points
    OUT_PAD = max(128, ((K * K + 127) // 128) * 128)   # lane-dense output width

    key = jax.random.PRNGKey(0)
    k_param, k_x = jax.random.split(key)

    params = init_tnet_params(k_param, K)

    # PyTorch-convention input: (B, C=k, N)  -- NCW
    x = jax.random.normal(k_x, (B, K, N), dtype=jnp.float32)
    ref = jax.block_until_ready(tnet_reference(x, params, K))

    # 1) f32-weight path: tight check of BN fusion + kernel structure.
    fused_f32 = fuse_params(params, K, OUT_PAD, matmul_dtype=jnp.float32)
    out_f32 = jax.block_until_ready(tnet_forward(x, fused_f32, K))
    np.testing.assert_allclose(np.asarray(out_f32), np.asarray(ref), rtol=1e-3, atol=1e-3)

    # 2) default bf16 matmul path (MXU-native on v5e/v6e/v7x, f32 accumulation).
    fused = fuse_params(params, K, OUT_PAD)
    out = jax.block_until_ready(tnet_forward(x, fused, K))
    assert out.shape == (B, K, K)
    np.testing.assert_allclose(np.asarray(out), np.asarray(ref), rtol=5e-2, atol=5e-2)

    print("KERNEL_OK")
</pallas_src>

<mosaic_0001>
module attributes {stable_mosaic.version = 11 : i64} {
  func.func @tnet_kernel(%arg0: i32, %arg1: memref<4x256xf32, #tpu.memory_space<vmem>>, %arg2: memref<64x4xf32, #tpu.memory_space<vmem>>, %arg3: memref<64x1xf32, #tpu.memory_space<vmem>>, %arg4: memref<128x64xf32, #tpu.memory_space<vmem>>, %arg5: memref<128x1xf32, #tpu.memory_space<vmem>>, %arg6: memref<128x1024xf32, #tpu.memory_space<vmem>>, %arg7: memref<1x1024xf32, #tpu.memory_space<vmem>>, %arg8: memref<1024x512xf32, #tpu.memory_space<vmem>>, %arg9: memref<1x512xf32, #tpu.memory_space<vmem>>, %arg10: memref<512x256xf32, #tpu.memory_space<vmem>>, %arg11: memref<1x256xf32, #tpu.memory_space<vmem>>, %arg12: memref<256x128xf32, #tpu.memory_space<vmem>>, %arg13: memref<1x128xf32, #tpu.memory_space<vmem>>, %arg14: memref<2x128xf32, #tpu.memory_space<vmem>>, %arg15: memref<2x1024xf32, #tpu.memory_space<vmem>>) attributes {dimension_semantics = [#tpu.dimension_semantics<parallel>], iteration_bounds = array<i64: 1>, scalar_prefetch = 0 : i64, scratch_operands = 1 : i64, tpu.core_type = #tpu.core_type<tc>, window_params = [{transform_indices = @transform_0, window_bounds = array<i64: 4, 256>}, {pipeline_mode = #tpu.pipeline_mode<synchronous>, transform_indices = @transform_1, window_bounds = array<i64: 64, 4>}, {pipeline_mode = #tpu.pipeline_mode<synchronous>, transform_indices = @transform_2, window_bounds = array<i64: 64, 1>}, {pipeline_mode = #tpu.pipeline_mode<synchronous>, transform_indices = @transform_3, window_bounds = array<i64: 128, 64>}, {pipeline_mode = #tpu.pipeline_mode<synchronous>, transform_indices = @transform_4, window_bounds = array<i64: 128, 1>}, {pipeline_mode = #tpu.pipeline_mode<synchronous>, transform_indices = @transform_5, window_bounds = array<i64: 128, 1024>}, {pipeline_mode = #tpu.pipeline_mode<synchronous>, transform_indices = @transform_6, window_bounds = array<i64: 1, 1024>}, {pipeline_mode = #tpu.pipeline_mode<synchronous>, transform_indices = @transform_7, window_bounds = array<i64: 1024, 512>}, {pipeline_mode = #tpu.pipeline_mode<synchronous>, transform_indices = @transform_8, window_bounds = array<i64: 1, 512>}, {pipeline_mode = #tpu.pipeline_mode<synchronous>, transform_indices = @transform_9, window_bounds = array<i64: 512, 256>}, {pipeline_mode = #tpu.pipeline_mode<synchronous>, transform_indices = @transform_10, window_bounds = array<i64: 1, 256>}, {pipeline_mode = #tpu.pipeline_mode<synchronous>, transform_indices = @transform_11, window_bounds = array<i64: 256, 128>}, {pipeline_mode = #tpu.pipeline_mode<synchronous>, transform_indices = @transform_12, window_bounds = array<i64: 1, 128>}, {transform_indices = @transform_13, window_bounds = array<i64: 2, 128>}]} {
    %c0_i32 = arith.constant 0 : i32
    %c256_i32 = arith.constant 256 : i32
    %0 = arith.muli %c0_i32, %c256_i32 : i32
    %1 = tpu.assume_multiple %0, 128 : i32
    %c0 = arith.constant 0 : index
    %2 = arith.index_cast %1 : i32 to index
    %3 = vector.load %arg1[%c0, %2] : memref<4x256xf32, #tpu.memory_space<vmem>>, vector<4x256xf32>
    %c0_0 = arith.constant 0 : index
    %c0_1 = arith.constant 0 : index
    %4 = vector.load %arg2[%c0_0, %c0_1] : memref<64x4xf32, #tpu.memory_space<vmem>>, vector<64x4xf32>
    %cst = arith.constant dense<0.000000e+00> : vector<64x256xf32>
    %5 = tpu.matmul %4, %3, %cst {dimension_numbers = #tpu.dot_dimension_numbers<[1], [0], [0], [1], [0, 0, 1, 1], [], []>} : vector<64x4xf32>, vector<4x256xf32>, vector<64x256xf32> -> vector<64x256xf32>
    %c0_2 = arith.constant 0 : index
    %c0_3 = arith.constant 0 : index
    %6 = vector.load %arg3[%c0_2, %c0_3] : memref<64x1xf32, #tpu.memory_space<vmem>>, vector<64x1xf32>
    %7 = vector.broadcast %6 : vector<64x1xf32> to vector<64x256xf32>
    %8 = arith.addf %5, %7 : vector<64x256xf32>
    %cst_4 = arith.constant 0.000000e+00 : f32
    %9 = vector.broadcast %cst_4 : f32 to vector<64x256xf32>
    %10 = arith.maximumf %8, %9 : vector<64x256xf32>
    %c0_5 = arith.constant 0 : index
    %c0_6 = arith.constant 0 : index
    %11 = vector.load %arg4[%c0_5, %c0_6] : memref<128x64xf32, #tpu.memory_space<vmem>>, vector<128x64xf32>
    %cst_7 = arith.constant dense<0.000000e+00> : vector<128x256xf32>
    %12 = tpu.matmul %11, %10, %cst_7 {dimension_numbers = #tpu.dot_dimension_numbers<[1], [0], [0], [1], [0, 0, 1, 1], [], []>} : vector<128x64xf32>, vector<64x256xf32>, vector<128x256xf32> -> vector<128x256xf32>
    %c0_8 = arith.constant 0 : index
    %c0_9 = arith.constant 0 : index
    %13 = vector.load %arg5[%c0_8, %c0_9] : memref<128x1xf32, #tpu.memory_space<vmem>>, vector<128x1xf32>
    %14 = vector.broadcast %13 : vector<128x1xf32> to vector<128x256xf32>
    %15 = arith.addf %12, %14 : vector<128x256xf32>
    %cst_10 = arith.constant 0.000000e+00 : f32
    %16 = vector.broadcast %cst_10 : f32 to vector<128x256xf32>
    %17 = arith.maximumf %15, %16 : vector<128x256xf32>
    %c0_11 = arith.constant 0 : index
    %c0_12 = arith.constant 0 : index
    %18 = vector.load %arg6[%c0_11, %c0_12] : memref<128x1024xf32, #tpu.memory_space<vmem>>, vector<128x1024xf32>
    %cst_13 = arith.constant dense<0.000000e+00> : vector<256x1024xf32>
    %19 = tpu.matmul %17, %18, %cst_13 {dimension_numbers = #tpu.dot_dimension_numbers<[0], [0], [1], [1], [0, 1, 1, 1], [], []>} : vector<128x256xf32>, vector<128x1024xf32>, vector<256x1024xf32> -> vector<256x1024xf32>
    %c0_14 = arith.constant 0 : index
    %c0_15 = arith.constant 0 : index
    %20 = vector.load %arg7[%c0_14, %c0_15] : memref<1x1024xf32, #tpu.memory_space<vmem>>, vector<1x1024xf32>
    %21 = vector.broadcast %20 : vector<1x1024xf32> to vector<256x1024xf32>
    %22 = arith.addf %19, %21 : vector<256x1024xf32>
    %cst_16 = arith.constant 0.000000e+00 : f32
    %23 = vector.broadcast %cst_16 : f32 to vector<256x1024xf32>
    %24 = arith.maximumf %22, %23 : vector<256x1024xf32>
    %25 = vector.shape_cast %24 : vector<256x1024xf32> to vector<2x128x1024xf32>
    %cst_17 = arith.constant dense<0xFF800000> : vector<2x1024xf32>
    %26 = vector.multi_reduction <maximumf>, %25, %cst_17 [1] : vector<2x128x1024xf32> to vector<2x1024xf32>
    %c2_i32 = arith.constant 2 : i32
    %27 = arith.muli %c0_i32, %c2_i32 : i32
    %28 = arith.index_cast %27 : i32 to index
    %c0_18 = arith.constant 0 : index
    %29 = vector.load %arg15[%28, %c0_18] : memref<2x1024xf32, #tpu.memory_space<vmem>>, vector<2x1024xf32>
    tpu.vector_store %arg15[%28, %c0_18], %26 {strides = array<i32>} : memref<2x1024xf32, #tpu.memory_space<vmem>>, vector<2x1024xf32>,
    %c1_i32 = arith.constant 1 : i32
    %c0_19 = arith.constant 0 : index
    %c0_20 = arith.constant 0 : index
    %30 = vector.load %arg8[%c0_19, %c0_20] : memref<1024x512xf32, #tpu.memory_space<vmem>>, vector<1024x512xf32>
    %c0_21 = arith.constant 0 : index
    %c0_22 = arith.constant 0 : index
    %31 = vector.load %arg10[%c0_21, %c0_22] : memref<512x256xf32, #tpu.memory_space<vmem>>, vector<512x256xf32>
    %c0_23 = arith.constant 0 : index
    %c0_24 = arith.constant 0 : index
    %32 = vector.load %arg15[%c0_23, %c0_24] : memref<2x1024xf32, #tpu.memory_space<vmem>>, vector<2x1024xf32>
    %cst_25 = arith.constant dense<0.000000e+00> : vector<2x512xf32>
    %33 = tpu.matmul %32, %30, %cst_25 {dimension_numbers = #tpu.dot_dimension_numbers<[1], [0], [0], [1], [0, 0, 1, 1], [], []>} : vector<2x1024xf32>, vector<1024x512xf32>, vector<2x512xf32> -> vector<2x512xf32>
    %c0_26 = arith.constant 0 : index
    %c0_27 = arith.constant 0 : index
    %34 = vector.load %arg9[%c0_26, %c0_27] : memref<1x512xf32, #tpu.memory_space<vmem>>, vector<1x512xf32>
    %35 = vector.broadcast %34 : vector<1x512xf32> to vector<2x512xf32>
    %36 = arith.addf %33, %35 : vector<2x512xf32>
    %cst_28 = arith.constant 0.000000e+00 : f32
    %37 = vector.broadcast %cst_28 : f32 to vector<2x512xf32>
    %38 = arith.maximumf %36, %37 : vector<2x512xf32>
    %cst_29 = arith.constant dense<0.000000e+00> : vector<2x256xf32>
    %39 = tpu.matmul %38, %31, %cst_29 {dimension_numbers = #tpu.dot_dimension_numbers<[1], [0], [0], [1], [0, 0, 1, 1], [], []>} : vector<2x512xf32>, vector<512x256xf32>, vector<2x256xf32> -> vector<2x256xf32>
    %c0_30 = arith.constant 0 : index
    %c0_31 = arith.constant 0 : index
    %40 = vector.load %arg11[%c0_30, %c0_31] : memref<1x256xf32, #tpu.memory_space<vmem>>, vector<1x256xf32>
    %41 = vector.broadcast %40 : vector<1x256xf32> to vector<2x256xf32>
    %42 = arith.addf %39, %41 : vector<2x256xf32>
    %cst_32 = arith.constant 0.000000e+00 : f32
    %43 = vector.broadcast %cst_32 : f32 to vector<2x256xf32>
    %44 = arith.maximumf %42, %43 : vector<2x256xf32>
    %c0_33 = arith.constant 0 : index
    %c0_34 = arith.constant 0 : index
    %45 = vector.load %arg12[%c0_33, %c0_34] : memref<256x128xf32, #tpu.memory_space<vmem>>, vector<256x128xf32>
    %cst_35 = arith.constant dense<0.000000e+00> : vector<2x128xf32>
    %46 = tpu.matmul %44, %45, %cst_35 {dimension_numbers = #tpu.dot_dimension_numbers<[1], [0], [0], [1], [0, 0, 1, 1], [], []>} : vector<2x256xf32>, vector<256x128xf32>, vector<2x128xf32> -> vector<2x128xf32>
    %c0_36 = arith.constant 0 : index
    %c0_37 = arith.constant 0 : index
    %47 = vector.load %arg13[%c0_36, %c0_37] : memref<1x128xf32, #tpu.memory_space<vmem>>, vector<1x128xf32>
    %48 = vector.broadcast %47 : vector<1x128xf32> to vector<2x128xf32>
    %49 = arith.addf %46, %48 : vector<2x128xf32>
    %c0_38 = arith.constant 0 : index
    %c0_39 = arith.constant 0 : index
    %50 = vector.load %arg14[%c0_38, %c0_39] : memref<2x128xf32, #tpu.memory_space<vmem>>, vector<2x128xf32>
    tpu.vector_store %arg14[%c0_38, %c0_39], %49 {strides = array<i32>} : memref<2x128xf32, #tpu.memory_space<vmem>>, vector<2x128xf32>,
    return
  }
  func.func @transform_0(%arg0: i32) -> (i32, i32) {
    %c0_i32 = arith.constant 0 : i32
    %c0_i32_0 = arith.constant 0 : i32
    return %c0_i32, %arg0 : i32, i32
  }
  func.func @transform_1(%arg0: i32) -> (i32, i32) {
    %c0_i32 = arith.constant 0 : i32
    %c0_i32_0 = arith.constant 0 : i32
    %c0_i32_1 = arith.constant 0 : i32
    return %c0_i32, %c0_i32_0 : i32, i32
  }
  func.func @transform_2(%arg0: i32) -> (i32, i32) {
    %c0_i32 = arith.constant 0 : i32
    %c0_i32_0 = arith.constant 0 : i32
    %c0_i32_1 = arith.constant 0 : i32
    return %c0_i32, %c0_i32_0 : i32, i32
  }
  func.func @transform_3(%arg0: i32) -> (i32, i32) {
    %c0_i32 = arith.constant 0 : i32
    %c0_i32_0 = arith.constant 0 : i32
    %c0_i32_1 = arith.constant 0 : i32
    return %c0_i32, %c0_i32_0 : i32, i32
  }
  func.func @transform_4(%arg0: i32) -> (i32, i32) {
    %c0_i32 = arith.constant 0 : i32
    %c0_i32_0 = arith.constant 0 : i32
    %c0_i32_1 = arith.constant 0 : i32
    return %c0_i32, %c0_i32_0 : i32, i32
  }
  func.func @transform_5(%arg0: i32) -> (i32, i32) {
    %c0_i32 = arith.constant 0 : i32
    %c0_i32_0 = arith.constant 0 : i32
    %c0_i32_1 = arith.constant 0 : i32
    return %c0_i32, %c0_i32_0 : i32, i32
  }
  func.func @transform_6(%arg0: i32) -> (i32, i32) {
    %c0_i32 = arith.constant 0 : i32
    %c0_i32_0 = arith.constant 0 : i32
    %c0_i32_1 = arith.constant 0 : i32
    return %c0_i32, %c0_i32_0 : i32, i32
  }
  func.func @transform_7(%arg0: i32) -> (i32, i32) {
    %c0_i32 = arith.constant 0 : i32
    %c0_i32_0 = arith.constant 0 : i32
    %c0_i32_1 = arith.constant 0 : i32
    return %c0_i32, %c0_i32_0 : i32, i32
  }
  func.func @transform_8(%arg0: i32) -> (i32, i32) {
    %c0_i32 = arith.constant 0 : i32
    %c0_i32_0 = arith.constant 0 : i32
    %c0_i32_1 = arith.constant 0 : i32
    return %c0_i32, %c0_i32_0 : i32, i32
  }
  func.func @transform_9(%arg0: i32) -> (i32, i32) {
    %c0_i32 = arith.constant 0 : i32
    %c0_i32_0 = arith.constant 0 : i32
    %c0_i32_1 = arith.constant 0 : i32
    return %c0_i32, %c0_i32_0 : i32, i32
  }
  func.func @transform_10(%arg0: i32) -> (i32, i32) {
    %c0_i32 = arith.constant 0 : i32
    %c0_i32_0 = arith.constant 0 : i32
    %c0_i32_1 = arith.constant 0 : i32
    return %c0_i32, %c0_i32_0 : i32, i32
  }
  func.func @transform_11(%arg0: i32) -> (i32, i32) {
    %c0_i32 = arith.constant 0 : i32
    %c0_i32_0 = arith.constant 0 : i32
    %c0_i32_1 = arith.constant 0 : i32
    return %c0_i32, %c0_i32_0 : i32, i32
  }
  func.func @transform_12(%arg0: i32) -> (i32, i32) {
    %c0_i32 = arith.constant 0 : i32
    %c0_i32_0 = arith.constant 0 : i32
    %c0_i32_1 = arith.constant 0 : i32
    return %c0_i32, %c0_i32_0 : i32, i32
  }
  func.func @transform_13(%arg0: i32) -> (i32, i32) {
    %c0_i32 = arith.constant 0 : i32
    %c0_i32_0 = arith.constant 0 : i32
    return %arg0, %c0_i32 : i32, i32
  }
}

</mosaic_0001>

<bundles_post_ra>
// kernel: tpu_custom_call.1
= control target key start
LH: loop header
LB: loop body
LE: loop exit
PB: predicated region body
PF: predicated region fallthrough
CT: control target
= control target key end

     0   :  { %18 = vsyncpa [#allocation4], 0  ;;  %s6087_s0 = inlined_call_operand.hbm [shape: f32[4,256], index: 0, kind: input, shape index: {}]   ;;  %s6088_s1 = inlined_call_operand.vmem [shape: f32[64,4], index: 1, kind: input, shape index: {}]   ;;  %s6089_s2 = inlined_call_operand.vmem [shape: f32[64,1], index: 2, kind: input, shape index: {}]   ;;  %s6090_s3 = inlined_call_operand.vmem [shape: f32[128,64], index: 3, kind: input, shape index: {}]   ;;  %s6091_s4 = inlined_call_operand.vmem [shape: f32[128,1], index: 4, kind: input, shape index: {}]   ;;  %s6092_s5 = inlined_call_operand.hbm [shape: f32[128,1024], index: 5, kind: input, shape index: {}]   ;;  %s6093_s6 = inlined_call_operand.hbm [shape: f32[1,1024], index: 6, kind: input, shape index: {}]   ;;  %s6094_s7 = inlined_call_operand.hbm [shape: f32[1024,512], index: 7, kind: input, shape index: {}]   ;;  %s6095_s8 = inlined_call_operand.hbm [shape: f32[1,512], index: 8, kind: input, shape index: {}]   ;;  %s6096_s9 = inlined_call_operand.hbm [shape: f32[512,256], index: 9, kind: input, shape index: {}]   ;;  %s6097_s10 = inlined_call_operand.hbm [shape: f32[1,256], index: 10, kind: input, shape index: {}]   ;;  %s6098_s11 = inlined_call_operand.hbm [shape: f32[256,128], index: 11, kind: input, shape index: {}]   ;;  %s6099_s12 = inlined_call_operand.hbm [shape: f32[1,128], index: 12, kind: input, shape index: {}]   ;;  %s6100_s13 = inlined_call_operand.hbm [shape: f32[2,128], index: 13, kind: output, shape index: {}]  }
   0x1   :  { %19 = vsyncpa [#allocation7], 0 }
   0x2   :  { %20 = vsyncpa [#allocation10], 0 }
   0x3   :  { %21 = vsyncpa [#allocation13], 0 }
   0x4   :  { %22 = vsyncpa [#allocation16], 0  ;;  %s47_s27 = sshll.u32 %s6092_s5, 4  ;;  %s48_s27 = int_to_ptr.hbm [resolvable:$true] %s47_s27 }
   0x5   :  { %23 = vsyncpa [#allocation5], 0  ;;  %s4603_s28 = smov [#allocation6]   ;;  %s71_s15 = sshll.u32 %s6094_s7, 4  ;;  %s72_s15 = int_to_ptr.hbm [resolvable:$true] %s71_s15 }
   0x6   :  { %s49_s29 = sshll.u32 %s4603_s28, 4  ;;  %s4604_s16 = smov 1024   ;;  %s50_s29 = int_to_ptr.vmem [resolvable:$true] %s49_s29 }
   0x7   :  { %s4605_s17 = smov 64   ;;  %s4606_s18 = smov [#allocation9]  }
   0x8   :  { %55 = dma.hbm_to_vmem [thread:$0]  %s48_s27, 16384, %s50_s29, [#allocation7], %s4604_s16, %s4604_s16, %s4605_s17  }
   0x9   :  { %s73_s19 = sshll.u32 %s4606_s18, 4  ;;  %s4607_s20 = smov 512   ;;  %s74_s19 = int_to_ptr.vmem [resolvable:$true] %s73_s19 }
   0xa   :  { %s4608_s21 = smov 32   ;;  %s95_s23 = sshll.u32 %s6096_s9, 4  ;;  %s96_s23 = int_to_ptr.hbm [resolvable:$true] %s95_s23 }
   0xb   :  { %79 = dma.hbm_to_vmem [thread:$0]  %s72_s15, 65536, %s74_s19, [#allocation10], %s4607_s20, %s4607_s20, %s4608_s21  }
   0xc   :  { %s4609_s24 = smov [#allocation12]   ;;  %s119_s28 = sshll.u32 %s6098_s11, 4  ;;  %s120_s28 = int_to_ptr.hbm [resolvable:$true] %s119_s28 }
   0xd   :  { %s97_s25 = sshll.u32 %s4609_s24, 4  ;;  %s4610_s27 = smov 256   ;;  %s98_s25 = int_to_ptr.vmem [resolvable:$true] %s97_s25 }
   0xe   :  { %s4611_s29 = smov 16   ;;  %s4612_s30 = smov [#allocation15]  }
   0xf   :  { %103 = dma.hbm_to_vmem [thread:$0]  %s96_s23, 16384, %s98_s25, [#allocation13], %s4610_s27, %s4610_s27, %s4611_s29  }
  0x10   :  { %s121_s14 = sshll.u32 %s4612_s30, 4  ;;  %s4613_s15 = smov 128   ;;  %s122_s14 = int_to_ptr.vmem [resolvable:$true] %s121_s14 }
  0x11   :  { %s4614_s16 = smov 8   ;;  %s29_s18 = sshll.u32 %s6087_s0, 4  ;;  %s30_s18 = int_to_ptr.hbm [resolvable:$true] %s29_s18 }
  0x12   :  { %127 = dma.hbm_to_vmem [thread:$0]  %s120_s28, 4096, %s122_s14, [#allocation16], %s4613_s15, %s4613_s15, %s4614_s16  }
  0x13   :  { %s4615_s19 = smov [#allocation3]   ;;  %s61_s5 = sshll.u32 %s6093_s6, 4  ;;  %s62_s5 = int_to_ptr.hbm [resolvable:$true] %s61_s5 }
  0x14   :  { %s31_s20 = sshll.u32 %s4615_s19, 4  ;;  %s4616_s22 = smov [#allocation8]   ;;  %s32_s20 = int_to_ptr.vmem [resolvable:$true] %s31_s20 }
  0x15   :  { %34 = dma.hbm_to_vmem [thread:$0]  %s30_s18, 128, %s32_s20, [#allocation4]  }
  0x16   :  { %s63_s23 = sshll.u32 %s4616_s22, 4  ;;  %s85_s26 = sshll.u32 %s6095_s8, 4  ;;  %s64_s23 = int_to_ptr.vmem [resolvable:$true] %s63_s23  ;;  %s86_s26 = int_to_ptr.hbm [resolvable:$true] %s85_s26 }
  0x17   :  { %66 = dma.hbm_to_vmem [thread:$0]  %s62_s5, 128, %s64_s23, [#allocation7]  }
  0x18   :  { %s109_s28 = sshll.u32 %s6097_s10, 4  ;;  %s4617_s27 = smov [#allocation11]   ;;  %s110_s28 = int_to_ptr.hbm [resolvable:$true] %s109_s28 }
  0x19   :  { %s87_s29 = sshll.u32 %s4617_s27, 4  ;;  %s4618_s6 = smov [#allocation14]   ;;  %s88_s29 = int_to_ptr.vmem [resolvable:$true] %s87_s29 }
  0x1a   :  { %90 = dma.hbm_to_vmem [thread:$0]  %s86_s26, 64, %s88_s29, [#allocation10]  }
  0x1b   :  { %s111_s30 = sshll.u32 %s4618_s6, 4  ;;  %s133_s16 = sshll.u32 %s6099_s12, 4  ;;  %s112_s30 = int_to_ptr.vmem [resolvable:$true] %s111_s30  ;;  %s134_s16 = int_to_ptr.hbm [resolvable:$true] %s133_s16 }
  0x1c   :  { %114 = dma.hbm_to_vmem [thread:$0]  %s110_s28, 32, %s112_s30, [#allocation13]  }
  0x1d   :  { %s4619_s8 = smov [#allocation17]  }
  0x1e   :  { %s135_s17 = sshll.u32 %s4619_s8, 4  ;;  %s136_s17 = int_to_ptr.vmem [resolvable:$true] %s135_s17 }
  0x1f   :  { %138 = dma.hbm_to_vmem [thread:$0]  %s134_s16, 16, %s136_s17, [#allocation16]  }
  0x20   :  { %4591 = dma.done.wait [#allocation4], 128  }
  0x21   :  { %4592 = vsyncadd [#allocation4], 4294967168 }
  0x22   :  { %4593 = dma.done.wait [#allocation7], 16512  }
  0x23   :  { %4594 = vsyncadd [#allocation7], 4294950784 }
  0x24   :  { %4595 = dma.done.wait [#allocation10], 65600  }
  0x25   :  { %4596 = vsyncadd [#allocation10], 4294901696 }
  0x26   :  { %4597 = dma.done.wait [#allocation13], 16416  }
  0x27   :  { %4598 = vsyncadd [#allocation13], 4294950880 }
  0x28   :  { %4599 = dma.done.wait [#allocation16], 4112  }
  0x29   :  { %4600 = vsyncadd [#allocation16], 4294963184  ;;  %v4620_v0 = vmov 0   ;;  %v189_v1 = vld [vmem:[%s6089_s2 + $0x28] sm:$0xff]  ;;  %v191_v3 = vld [vmem:[%s6089_s2 + $0x38] sm:$0xff]  ;;  %vm261_vm0 = vcmask 1043456  }
  0x2a   :  { %4335 = vset.pattern.permute.xlu1 %v4620_v0  ;;  %4334 = vset.pattern.permute.xlu0 %v4620_v0  ;;  %v175_v2 = vld [vmem:[#allocation3] sm:$0xff]  ;;  %v176_v4 = vld [vmem:[%s6088_s1] sm:$0xff]  ;;  %vm236_vm1 = vcmask 31744   ;;  %v190_v6 = vld [vmem:[%s6089_s2 + $0x30] sm:$0xff]  ;;  %vm476_vm2 = vcmask 523264   ;;  %vm2423_vm3 = vcmask 1045508  }
  0x2b   :  { %4336 = vset.pattern.permute.xlu2 %v4620_v0  ;;  %219 = vperm.xlu1 %4335, %v189_v1   ;;  %233 = vst [vmem:[#allocation1] ss:$2 sm:$0xff] %v175_v2  ;;  %v188_v5 = vld [vmem:[%s6089_s2 + $0x20] sm:$0xff]  ;;  %v187_v9 = vld [vmem:[%s6089_s2 + $0x18] sm:$0xff]  ;;  %v177_v10 = vld [vmem:[%s6088_s1 + $0x8] sm:$0xff]  ;;  %vm2421_vm4 = vcmask 1041408  }
  0x2c   :  { %229 = vperm.xlu0 %4334, %v191_v3   ;;  %209 = vperm.xlu2 %4336, %v187_v9   ;;  %v184_v11 = vld [vmem:[%s6089_s2] sm:$0xff]  ;;  %v185_v12 = vld [vmem:[%s6089_s2 + $0x8] sm:$0xff]  ;;  %v186_v13 = vld [vmem:[%s6089_s2 + $0x10] sm:$0xff]  ;;  %vm2440_vm5 = vcmask 1041409   ;;  %vm2442_vm6 = vcmask 1043459   ;;  %vm2444_vm7 = vcmask 1045509  }
  0x2d   :  { %v178_v14 = vld [vmem:[%s6088_s1 + $0x10] sm:$0xff]  ;;  %v393_v16 = vld [vmem:[%s6091_s4 + $0x68] sm:$0xff]  ;;  %v395_v17 = vld [vmem:[%s6091_s4 + $0x78] sm:$0xff]  ;;  %vm2446_vm8 = vcmask 1047559   ;;  %s4028_s0 = sshll.u32 %s6100_s13, 4  ;;  %s4029_s0 = int_to_ptr.hbm [resolvable:$true] %s4028_s0 }
  0x2e   :  { %v394_v15 = vld [vmem:[%s6091_s4 + $0x70] sm:$0xff]  ;;  %v179_v18 = vld [vmem:[%s6088_s1 + $0x18] sm:$0xff]  ;;  %v392_v21 = vld [vmem:[%s6091_s4 + $0x60] sm:$0xff] }
  0x2f   :  { %v391_v19 = vld [vmem:[%s6091_s4 + $0x58] sm:$0xff]  ;;  %v390_v20 = vld [vmem:[%s6091_s4 + $0x50] sm:$0xff]  ;;  %v180_v22 = vld [vmem:[%s6088_s1 + $0x20] sm:$0xff] }
  0x30   :  { %v388_v23 = vld [vmem:[%s6091_s4 + $0x40] sm:$0xff]  ;;  %v387_v24 = vld [vmem:[%s6091_s4 + $0x38] sm:$0xff]  ;;  %v389_v25 = vld [vmem:[%s6091_s4 + $0x48] sm:$0xff] }
  0x31   :  { %v181_v26 = vld [vmem:[%s6088_s1 + $0x28] sm:$0xff]  ;;  %v384_v28 = vld [vmem:[%s6091_s4 + $0x20] sm:$0xff]  ;;  %v386_v29 = vld [vmem:[%s6091_s4 + $0x30] sm:$0xff] }
  0x32   :  { %v234_v7 = vld.sshfl [vmem:[#allocation1] sm:$0xff pattern:$0x75316420]  ;;  %v235_v8 = vld.sshfl [vmem:[#allocation1 + $0x8] sm:$0xff pattern:$0x75316420] }
  0x33   :  { %4042 = vmatpush.msk.msra.mxu0 %vm261_vm0, %v234_v7  ;;  %4051 = vmatpush.msk.msra.mxu1 %vm261_vm0, %v235_v8  ;;  %v385_v27 = vld [vmem:[%s6091_s4 + $0x28] sm:$0xff]  ;;  %v182_v30 = vld [vmem:[%s6088_s1 + $0x30] sm:$0xff]  ;;  %v383_v33 = vld [vmem:[%s6091_s4 + $0x18] sm:$0xff] }
  0x34   :  { %4043 = vmatmul.msk.f32.vlgmr.msra.gmra.mxu0 %vm236_vm1, %v176_v4  ;;  %4052 = vmatmul.msk.f32.vlgmr.msra.gmra.mxu1 %vm236_vm1, %v176_v4  ;;  %v382_v31 = vld [vmem:[%s6091_s4 + $0x10] sm:$0xff]  ;;  %v381_v32 = vld [vmem:[%s6091_s4 + $0x8] sm:$0xff]  ;;  %v183_v34 = vld [vmem:[%s6088_s1 + $0x38] sm:$0xff] }
  0x35   :  { %214 = vperm.xlu1 %4335, %v188_v5   ;;  %224 = vperm.xlu0 %4334, %v190_v6   ;;  %v380_v35 = vld [vmem:[%s6091_s4] sm:$0xff] }
  0x36   :  { %204 = vperm.xlu2 %4336, %v186_v13  }
  0x3c   :  { %4044 = vmatmul.msk.f32.gmra.mxu0 %vm236_vm1, %v177_v10  ;;  %4053 = vmatmul.msk.f32.gmra.mxu1 %vm236_vm1, %v177_v10 }
  0x3d   :  { %194 = vperm.xlu1 %4335, %v184_v11   ;;  %199 = vperm.xlu0 %4334, %v185_v12  }
  0x3e   :  { %473 = vperm.xlu2 %4336, %v395_v17  }
  0x44   :  { %4045 = vmatmul.msk.f32.gmra.mxu0 %vm236_vm1, %v178_v14  ;;  %4054 = vmatmul.msk.f32.gmra.mxu1 %vm236_vm1, %v178_v14 }
  0x45   :  { %468 = vperm.xlu0 %4334, %v394_v15   ;;  %463 = vperm.xlu1 %4335, %v393_v16  }
  0x46   :  { %458 = vperm.xlu2 %4336, %v392_v21  }
  0x4c   :  { %4046 = vmatmul.msk.f32.gmra.mxu0 %vm236_vm1, %v179_v18  ;;  %4055 = vmatmul.msk.f32.gmra.mxu1 %vm236_vm1, %v179_v18 }
  0x4d   :  { %453 = vperm.xlu0 %4334, %v391_v19   ;;  %448 = vperm.xlu1 %4335, %v390_v20  }
  0x4e   :  { %443 = vperm.xlu2 %4336, %v389_v25  }
  0x54   :  { %4047 = vmatmul.msk.f32.gmra.mxu0 %vm236_vm1, %v180_v22  ;;  %4056 = vmatmul.msk.f32.gmra.mxu1 %vm236_vm1, %v180_v22 }
  0x55   :  { %438 = vperm.xlu0 %4334, %v388_v23   ;;  %433 = vperm.xlu1 %4335, %v387_v24  }
  0x56   :  { %428 = vperm.xlu2 %4336, %v386_v29   ;;  %v365_v29 = vld [vmem:[%s6090_s3 + $0x8] sm:$0xff] }
  0x5c   :  { %4048 = vmatmul.msk.f32.gmra.mxu0 %vm236_vm1, %v181_v26  ;;  %4057 = vmatmul.msk.f32.gmra.mxu1 %vm236_vm1, %v181_v26 }
  0x5d   :  { %423 = vperm.xlu0 %4334, %v385_v27   ;;  %418 = vperm.xlu1 %4335, %v384_v28   ;;  %v364_v28 = vld [vmem:[%s6090_s3] sm:$0xff] }
  0x5e   :  { %413 = vperm.xlu2 %4336, %v383_v33   ;;  %v369_v33 = vld [vmem:[%s6090_s3 + $0x28] sm:$0xff] }
  0x64   :  { %4049 = vmatmul.msk.f32.gmra.mxu0 %vm236_vm1, %v182_v30  ;;  %4058 = vmatmul.msk.f32.gmra.mxu1 %vm236_vm1, %v182_v30  ;;  %v366_v30 = vld [vmem:[%s6090_s3 + $0x10] sm:$0xff] }
  0x65   :  { %408 = vperm.xlu0 %4334, %v382_v31   ;;  %403 = vperm.xlu1 %4335, %v381_v32   ;;  %v367_v31 = vld [vmem:[%s6090_s3 + $0x18] sm:$0xff]  ;;  %v368_v32 = vld [vmem:[%s6090_s3 + $0x20] sm:$0xff] }
  0x66   :  { %398 = vperm.xlu2 %4336, %v380_v35   ;;  %v371_v35 = vld [vmem:[%s6090_s3 + $0x38] sm:$0xff] }
  0x6c   :  { %4050 = vmatmul.msk.f32.gmra.mxu0 %vm236_vm1, %v183_v34  ;;  %4059 = vmatmul.msk.f32.gmra.mxu1 %vm236_vm1, %v183_v34  ;;  %v370_v34 = vld [vmem:[%s6090_s3 + $0x30] sm:$0xff] }
  0x86   :  { %v210_v53 = vpop.permute.xlu2 %209 }
  0x90   :  { %v205_v10 = vpop.permute.xlu2 %204 }
  0x9d   :  { %v220_v49 = vpop.permute.xlu1 %219 }
  0x9e   :  { %v230_v48 = vpop.permute.xlu0 %229 }
  0xa7   :  { %v225_v52 = vpop.permute.xlu0 %224  ;;  %v215_v54 = vpop.permute.xlu1 %214 }
  0xaf   :  { %v200_v9 = vpop.permute.xlu0 %199  ;;  %v195_v15 = vpop.permute.xlu1 %194 }
  0xb1   :  { %v283_v36 = vpop.f32.mrf.mxu0  ;;  %v324_v37 = vpop.f32.mrf.mxu1 }
  0xb2   :  { %v284_v20 = vadd.f32 %v283_v36, %v195_v15  ;;  %v325_v21 = vadd.f32 %v324_v37, %v195_v15  ;;  %v372_v36 = vld [vmem:[%s6090_s3 + $0x40] sm:$0xff]  ;;  %v373_v37 = vld [vmem:[%s6090_s3 + $0x48] sm:$0xff] }
  0xb4   :  { %v348_v26 = vmax.f32 %v284_v20, 0.0  ;;  %v349_v27 = vmax.f32 %v325_v21, 0.0 }
  0xb9   :  { %v286_v38 = vpop.f32.mrf.mxu0  ;;  %v327_v39 = vpop.f32.mrf.mxu1 }
  0xba   :  { %v287_v16 = vadd.f32 %v286_v38, %v200_v9  ;;  %v328_v17 = vadd.f32 %v327_v39, %v200_v9  ;;  %v374_v38 = vld [vmem:[%s6090_s3 + $0x50] sm:$0xff]  ;;  %v4890_v39 = vpop.permute.xlu2 %473 }
  0xbc   :  { %v350_v24 = vmax.f32 %v287_v16, 0.0  ;;  %v351_v25 = vmax.f32 %v328_v17, 0.0 }
  0xc1   :  { %v289_v40 = vpop.f32.mrf.mxu0  ;;  %v330_v41 = vpop.f32.mrf.mxu1 }
  0xc2   :  { %v290_v11 = vadd.f32 %v289_v40, %v205_v10  ;;  %v331_v12 = vadd.f32 %v330_v41, %v205_v10  ;;  %v375_v40 = vld [vmem:[%s6090_s3 + $0x58] sm:$0xff]  ;;  %v4899_v41 = vpop.permute.xlu2 %458 }
  0xc4   :  { %v352_v22 = vmax.f32 %v290_v11, 0.0  ;;  %v353_v23 = vmax.f32 %v331_v12, 0.0  ;;  %v810_v12 = vld [vmem:[#allocation6 + $0x3d8] sm:$0xff] }
  0xc9   :  { %v292_v42 = vpop.f32.mrf.mxu0  ;;  %v333_v43 = vpop.f32.mrf.mxu1 }
  0xca   :  { %v293_v5 = vadd.f32 %v292_v42, %v210_v53  ;;  %v334_v6 = vadd.f32 %v333_v43, %v210_v53  ;;  %v376_v42 = vld [vmem:[%s6090_s3 + $0x60] sm:$0xff]  ;;  %v4906_v43 = vpop.permute.xlu1 %463 }
  0xcc   :  { %v354_v18 = vmax.f32 %v293_v5, 0.0  ;;  %v355_v19 = vmax.f32 %v334_v6, 0.0 }
  0xd1   :  { %v295_v44 = vpop.f32.mrf.mxu0  ;;  %v336_v45 = vpop.f32.mrf.mxu1 }
  0xd2   :  { %v296_v1 = vadd.f32 %v295_v44, %v215_v54  ;;  %v337_v2 = vadd.f32 %v336_v45, %v215_v54  ;;  %v4908_v44 = vpop.permute.xlu2 %443  ;;  %v377_v45 = vld [vmem:[%s6090_s3 + $0x68] sm:$0xff] }
  0xd4   :  { %v356_v13 = vmax.f32 %v296_v1, 0.0  ;;  %v357_v14 = vmax.f32 %v337_v2, 0.0 }
  0xd9   :  { %v298_v46 = vpop.f32.mrf.mxu0  ;;  %v339_v47 = vpop.f32.mrf.mxu1 }
  0xda   :  { %v299_v61 = vadd.f32 %v298_v46, %v220_v49  ;;  %v340_v62 = vadd.f32 %v339_v47, %v220_v49  ;;  %v4915_v46 = vpop.permute.xlu0 %468  ;;  %v4917_v47 = vpop.permute.xlu1 %448 }
  0xdb   :  { %v4922_v49 = vpop.permute.xlu2 %428 }
  0xdc   :  { %v358_v7 = vmax.f32 %v299_v61, 0.0  ;;  %v359_v8 = vmax.f32 %v340_v62, 0.0 }
  0xe1   :  { %v301_v50 = vpop.f32.mrf.mxu0  ;;  %v342_v51 = vpop.f32.mrf.mxu1 }
  0xe2   :  { %v302_v57 = vadd.f32 %v301_v50, %v225_v52  ;;  %v343_v58 = vadd.f32 %v342_v51, %v225_v52  ;;  %v4926_v50 = vpop.permute.xlu0 %453  ;;  %v379_v51 = vld [vmem:[%s6090_s3 + $0x78] sm:$0xff]  ;;  %v4931_v52 = vpop.permute.xlu1 %433 }
  0xe3   :  { %v4933_v53 = vpop.permute.xlu2 %413 }
  0xe4   :  { %v360_v3 = vmax.f32 %v302_v57, 0.0  ;;  %v361_v4 = vmax.f32 %v343_v58, 0.0 }
  0xe9   :  { %v304_v55 = vpop.f32.mrf.mxu0  ;;  %v345_v56 = vpop.f32.mrf.mxu1 }
  0xea   :  { %v305_v59 = vadd.f32 %v304_v55, %v230_v48  ;;  %v346_v60 = vadd.f32 %v345_v56, %v230_v48  ;;  %v378_v48 = vld [vmem:[%s6090_s3 + $0x70] sm:$0xff]  ;;  %v4937_v54 = vpop.permute.xlu0 %438  ;;  %v4939_v55 = vpop.permute.xlu1 %418  ;;  %s4621_s3 = smov [#allocation18]  }
  0xeb   :  { %v4941_v56 = vpop.permute.xlu2 %398  ;;  %s4026_s24 = sshll.u32 %s4621_s3, 4  ;;  %s4027_s24 = int_to_ptr.vmem [resolvable:$true] %s4026_s24 }
  0xec   :  { %v362_v63 = vmax.f32 %v305_v59, 0.0  ;;  %v363_v0 = vmax.f32 %v346_v60, 0.0 }
  0xee   :  { %533 = vmatpush.msra.mxu2 %v362_v63  ;;  %598 = vmatpush.msra.mxu3 %v363_v0 }
  0xf0   :  { %534 = vmatpush.msra.mxu2 %v360_v3  ;;  %599 = vmatpush.msra.mxu3 %v361_v4 }
  0xf2   :  { %535 = vmatpush.msra.mxu2 %v358_v7  ;;  %600 = vmatpush.msra.mxu3 %v359_v8  ;;  %v4946_v61 = vpop.permute.xlu0 %423  ;;  %v4948_v62 = vpop.permute.xlu1 %403 }
  0xf4   :  { %536 = vmatpush.msra.mxu2 %v356_v13  ;;  %601 = vmatpush.msra.mxu3 %v357_v14  ;;  %v809_v13 = vld [vmem:[#allocation6 + $0x3d0] sm:$0xff] }
  0xf6   :  { %537 = vmatpush.msra.mxu2 %v354_v18  ;;  %602 = vmatpush.msra.mxu3 %v355_v19  ;;  %v802_v18 = vld [vmem:[#allocation6 + $0x398] sm:$0xff]  ;;  %v801_v19 = vld [vmem:[#allocation6 + $0x390] sm:$0xff] }
  0xf8   :  { %538 = vmatpush.msra.mxu2 %v352_v22  ;;  %603 = vmatpush.msra.mxu3 %v353_v23 }
  0xfa   :  { %539 = vmatpush.msra.mxu2 %v350_v24  ;;  %604 = vmatpush.msra.mxu3 %v351_v25  ;;  %v4953_v3 = vpop.permute.xlu0 %408  ;;  %v794_v24 = vld [vmem:[#allocation6 + $0x358] sm:$0xff]  ;;  %v793_v25 = vld [vmem:[#allocation6 + $0x350] sm:$0xff] }
  0xfc   :  { %540 = vmatpush.msra.mxu2 %v348_v26  ;;  %605 = vmatpush.msra.mxu3 %v349_v27 }
  0xfd   :  { %4060 = vmatmul.msk.f32.vlgmr.msra.gmra.mxu2 %vm476_vm2, %v364_v28  ;;  %4076 = vmatmul.msk.f32.vlgmr.msra.gmra.mxu3 %vm476_vm2, %v364_v28 }
  0xfe   :  { %1236 = vmatpush.msra.mxu3 %v810_v12  ;;  %1123 = vmatpush.msra.mxu2 %v809_v13 }
 0x100   :  { %1237 = vmatpush.msra.mxu3 %v802_v18  ;;  %1124 = vmatpush.msra.mxu2 %v801_v19  ;;  %v745_v18 = vld [vmem:[#allocation6 + $0x1d0] sm:$0xff] }
 0x102   :  { %1238 = vmatpush.msra.mxu3 %v794_v24  ;;  %1125 = vmatpush.msra.mxu2 %v793_v25  ;;  %v808_v24 = vld [vmem:[#allocation6 + $0x3c8] sm:$0xff]  ;;  %v807_v25 = vld [vmem:[#allocation6 + $0x3c0] sm:$0xff] }
 0x103   :  { %1010 = vmatpush.msra.mxu1 %v808_v24  ;;  %897 = vmatpush.msra.mxu0 %v807_v25 }
 0x105   :  { %4061 = vmatmul.msk.f32.gmra.mxu2 %vm476_vm2, %v365_v29  ;;  %4077 = vmatmul.msk.f32.gmra.mxu3 %vm476_vm2, %v365_v29 }
 0x10d   :  { %4062 = vmatmul.msk.f32.gmra.mxu2 %vm476_vm2, %v366_v30  ;;  %4078 = vmatmul.msk.f32.gmra.mxu3 %vm476_vm2, %v366_v30  ;;  %v786_v30 = vld [vmem:[#allocation6 + $0x318] sm:$0xff] }
 0x10e   :  { %1239 = vmatpush.msra.mxu3 %v786_v30 }
 0x115   :  { %4063 = vmatmul.msk.f32.gmra.mxu2 %vm476_vm2, %v367_v31  ;;  %4079 = vmatmul.msk.f32.gmra.mxu3 %vm476_vm2, %v367_v31  ;;  %v785_v31 = vld [vmem:[#allocation6 + $0x310] sm:$0xff] }
 0x116   :  { %1126 = vmatpush.msra.mxu2 %v785_v31 }
 0x11d   :  { %4064 = vmatmul.msk.f32.gmra.mxu2 %vm476_vm2, %v368_v32  ;;  %4080 = vmatmul.msk.f32.gmra.mxu3 %vm476_vm2, %v368_v32 }
 0x125   :  { %4065 = vmatmul.msk.f32.gmra.mxu2 %vm476_vm2, %v369_v33  ;;  %4081 = vmatmul.msk.f32.gmra.mxu3 %vm476_vm2, %v369_v33 }
 0x12d   :  { %4066 = vmatmul.msk.f32.gmra.mxu2 %vm476_vm2, %v370_v34  ;;  %4082 = vmatmul.msk.f32.gmra.mxu3 %vm476_vm2, %v370_v34 }
 0x135   :  { %4067 = vmatmul.msk.f32.gmra.mxu2 %vm476_vm2, %v371_v35  ;;  %4083 = vmatmul.msk.f32.gmra.mxu3 %vm476_vm2, %v371_v35 }
 0x13d   :  { %4068 = vmatmul.msk.f32.gmra.mxu2 %vm476_vm2, %v372_v36  ;;  %4084 = vmatmul.msk.f32.gmra.mxu3 %vm476_vm2, %v372_v36  ;;  %v778_v36 = vld [vmem:[#allocation6 + $0x2d8] sm:$0xff] }
 0x13e   :  { %1240 = vmatpush.msra.mxu3 %v778_v36  ;;  %v792_v36 = vld [vmem:[#allocation6 + $0x348] sm:$0xff] }
 0x145   :  { %4069 = vmatmul.msk.f32.gmra.mxu2 %vm476_vm2, %v373_v37  ;;  %4085 = vmatmul.msk.f32.gmra.mxu3 %vm476_vm2, %v373_v37  ;;  %v777_v37 = vld [vmem:[#allocation6 + $0x2d0] sm:$0xff] }
 0x146   :  { %1127 = vmatpush.msra.mxu2 %v777_v37  ;;  %v791_v37 = vld [vmem:[#allocation6 + $0x340] sm:$0xff] }
 0x14d   :  { %4070 = vmatmul.msk.f32.gmra.mxu2 %vm476_vm2, %v374_v38  ;;  %4086 = vmatmul.msk.f32.gmra.mxu3 %vm476_vm2, %v374_v38 }
 0x155   :  { %4071 = vmatmul.msk.f32.gmra.mxu2 %vm476_vm2, %v375_v40  ;;  %4087 = vmatmul.msk.f32.gmra.mxu3 %vm476_vm2, %v375_v40 }
 0x15d   :  { %4072 = vmatmul.msk.f32.gmra.mxu2 %vm476_vm2, %v376_v42  ;;  %4088 = vmatmul.msk.f32.gmra.mxu3 %vm476_vm2, %v376_v42 }
 0x165   :  { %4073 = vmatmul.msk.f32.gmra.mxu2 %vm476_vm2, %v377_v45  ;;  %4089 = vmatmul.msk.f32.gmra.mxu3 %vm476_vm2, %v377_v45 }
 0x16d   :  { %4074 = vmatmul.msk.f32.gmra.mxu2 %vm476_vm2, %v378_v48  ;;  %4090 = vmatmul.msk.f32.gmra.mxu3 %vm476_vm2, %v378_v48  ;;  %v770_v48 = vld [vmem:[#allocation6 + $0x298] sm:$0xff] }
 0x16e   :  { %1241 = vmatpush.msra.mxu3 %v770_v48 }
 0x175   :  { %4075 = vmatmul.msk.f32.gmra.mxu2 %vm476_vm2, %v379_v51  ;;  %4091 = vmatmul.msk.f32.gmra.mxu3 %vm476_vm2, %v379_v51  ;;  %v769_v51 = vld [vmem:[#allocation6 + $0x290] sm:$0xff] }
 0x176   :  { %1128 = vmatpush.msra.mxu2 %v769_v51 }
 0x180   :  { %v4943_v57 = vpop.f32.mrf.mxu2  ;;  %v607_v58 = vpop.f32.mrf.mxu3 }
 0x181   :  { %v608_v59 = vadd.f32 %v607_v58, %v4941_v56 }
 0x183   :  { %v656_v60 = vmax.f32 %v608_v59, 0.0 }
 0x185   :  { %865 = vxpose.xlu0.b32.start [1/16] %v656_v60, 128 }
 0x188   :  { %v4950_v63 = vpop.f32.mrf.mxu2  ;;  %v610_v0 = vpop.f32.mrf.mxu3 }
 0x189   :  { %v611_v1 = vadd.f32 %v610_v0, %v4948_v62 }
 0x18b   :  { %v658_v2 = vmax.f32 %v611_v1, 0.0  ;;  %v762_v1 = vld [vmem:[#allocation6 + $0x258] sm:$0xff] }
 0x18c   :  { %1242 = vmatpush.msra.mxu3 %v762_v1  ;;  %v776_v1 = vld [vmem:[#allocation6 + $0x2c8] sm:$0xff] }
 0x18d   :  { %866 = vxpose.xlu0.b32.cont [2/16] %v658_v2, 128  ;;  %v761_v2 = vld [vmem:[#allocation6 + $0x250] sm:$0xff] }
 0x18e   :  { %1129 = vmatpush.msra.mxu2 %v761_v2  ;;  %v775_v2 = vld [vmem:[#allocation6 + $0x2c0] sm:$0xff] }
 0x190   :  { %v4955_v4 = vpop.f32.mrf.mxu2  ;;  %v613_v5 = vpop.f32.mrf.mxu3 }
 0x191   :  { %v614_v6 = vadd.f32 %v613_v5, %v4953_v3 }
 0x193   :  { %v660_v7 = vmax.f32 %v614_v6, 0.0 }
 0x195   :  { %867 = vxpose.xlu0.b32.cont [3/16] %v660_v7, 128 }
 0x198   :  { %v4958_v8 = vpop.f32.mrf.mxu2  ;;  %v616_v9 = vpop.f32.mrf.mxu3 }
 0x199   :  { %v617_v10 = vadd.f32 %v616_v9, %v4933_v53 }
 0x19b   :  { %v662_v11 = vmax.f32 %v617_v10, 0.0  ;;  %v754_v10 = vld [vmem:[#allocation6 + $0x218] sm:$0xff] }
 0x19c   :  { %1243 = vmatpush.msra.mxu3 %v754_v10 }
 0x19d   :  { %868 = vxpose.xlu0.b32.cont [4/16] %v662_v11, 128  ;;  %v753_v11 = vld [vmem:[#allocation6 + $0x210] sm:$0xff] }
 0x19e   :  { %1130 = vmatpush.msra.mxu2 %v753_v11 }
 0x1a0   :  { %v4961_v14 = vpop.f32.mrf.mxu2  ;;  %v619_v15 = vpop.f32.mrf.mxu3  ;;  %1131 = vmatpush.msra.mxu2 %v745_v18 }
 0x1a1   :  { %v620_v16 = vadd.f32 %v619_v15, %v4939_v55 }
 0x1a3   :  { %v664_v17 = vmax.f32 %v620_v16, 0.0 }
 0x1a5   :  { %869 = vxpose.xlu0.b32.cont [5/16] %v664_v17, 128  ;;  %v746_v17 = vld [vmem:[#allocation6 + $0x1d8] sm:$0xff] }
 0x1a6   :  { %1244 = vmatpush.msra.mxu3 %v746_v17  ;;  %v767_v17 = vld [vmem:[#allocation6 + $0x280] sm:$0xff] }
 0x1a8   :  { %v4964_v20 = vpop.f32.mrf.mxu2  ;;  %v622_v21 = vpop.f32.mrf.mxu3 }
 0x1a9   :  { %v623_v22 = vadd.f32 %v622_v21, %v4946_v61 }
 0x1ab   :  { %v666_v23 = vmax.f32 %v623_v22, 0.0 }
 0x1ad   :  { %870 = vxpose.xlu0.b32.cont [6/16] %v666_v23, 128 }
 0x1b0   :  { %v4967_v26 = vpop.f32.mrf.mxu2  ;;  %v625_v27 = vpop.f32.mrf.mxu3 }
 0x1b1   :  { %v626_v28 = vadd.f32 %v625_v27, %v4922_v49  ;;  %v737_v27 = vld [vmem:[#allocation6 + $0x190] sm:$0xff] }
 0x1b2   :  { %1132 = vmatpush.msra.mxu2 %v737_v27 }
 0x1b3   :  { %v668_v29 = vmax.f32 %v626_v28, 0.0  ;;  %v738_v28 = vld [vmem:[#allocation6 + $0x198] sm:$0xff] }
 0x1b4   :  { %1245 = vmatpush.msra.mxu3 %v738_v28  ;;  %v751_v28 = vld [vmem:[#allocation6 + $0x200] sm:$0xff] }
 0x1b5   :  { %871 = vxpose.xlu0.b32.cont [7/16] %v668_v29, 128  ;;  %v800_v29 = vld [vmem:[#allocation6 + $0x388] sm:$0xff] }
 0x1b6   :  { %1011 = vmatpush.msra.mxu1 %v800_v29  ;;  %v705_v29 = vld [vmem:[#allocation6 + $0x90] sm:$0xff] }
 0x1b8   :  { %v4970_v32 = vpop.f32.mrf.mxu2  ;;  %v628_v33 = vpop.f32.mrf.mxu3  ;;  %1012 = vmatpush.msra.mxu1 %v792_v36  ;;  %v736_v36 = vld [vmem:[#allocation6 + $0x188] sm:$0xff] }
 0x1b9   :  { %v629_v34 = vadd.f32 %v628_v33, %v4931_v52 }
 0x1bb   :  { %v670_v35 = vmax.f32 %v629_v34, 0.0  ;;  %v799_v34 = vld [vmem:[#allocation6 + $0x380] sm:$0xff] }
 0x1bc   :  { %898 = vmatpush.msra.mxu0 %v799_v34  ;;  %v697_v34 = vld [vmem:[#allocation6 + $0x50] sm:$0xff] }
 0x1bd   :  { %872 = vxpose.xlu0.b32.cont [8/16] %v670_v35, 128 }
 0x1be   :  { %899 = vmatpush.msra.mxu0 %v791_v37  ;;  %v735_v37 = vld [vmem:[#allocation6 + $0x180] sm:$0xff] }
 0x1c0   :  { %v4973_v38 = vpop.f32.mrf.mxu2  ;;  %v631_v40 = vpop.f32.mrf.mxu3 }
 0x1c1   :  { %v632_v42 = vadd.f32 %v631_v40, %v4937_v54  ;;  %v729_v40 = vld [vmem:[#allocation6 + $0x150] sm:$0xff] }
 0x1c2   :  { %1133 = vmatpush.msra.mxu2 %v729_v40  ;;  %v689_v40 = vld [vmem:[#allocation6 + $0x10] sm:$0xff] }
 0x1c3   :  { %v672_v45 = vmax.f32 %v632_v42, 0.0  ;;  %v730_v42 = vld [vmem:[#allocation6 + $0x158] sm:$0xff] }
 0x1c4   :  { %1246 = vmatpush.msra.mxu3 %v730_v42  ;;  %v690_v42 = vld [vmem:[#allocation6 + $0x18] sm:$0xff] }
 0x1c5   :  { %873 = vxpose.xlu0.b32.cont [9/16] %v672_v45, 128  ;;  %v784_v45 = vld [vmem:[#allocation6 + $0x308] sm:$0xff] }
 0x1c6   :  { %1013 = vmatpush.msra.mxu1 %v784_v45  ;;  %v728_v45 = vld [vmem:[#allocation6 + $0x148] sm:$0xff] }
 0x1c8   :  { %v4976_v58 = vpop.f32.mrf.mxu2  ;;  %v634_v59 = vpop.f32.mrf.mxu3  ;;  %1014 = vmatpush.msra.mxu1 %v776_v1  ;;  %v704_v1 = vld [vmem:[#allocation6 + $0x88] sm:$0xff] }
 0x1c9   :  { %v635_v60 = vadd.f32 %v634_v59, %v4908_v44 }
 0x1cb   :  { %v674_v0 = vmax.f32 %v635_v60, 0.0  ;;  %v783_v60 = vld [vmem:[#allocation6 + $0x300] sm:$0xff] }
 0x1cc   :  { %900 = vmatpush.msra.mxu0 %v783_v60  ;;  %v712_v60 = vld [vmem:[#allocation6 + $0xc8] sm:$0xff] }
 0x1cd   :  { %874 = vxpose.xlu0.b32.cont [10/16] %v674_v0, 128 }
 0x1ce   :  { %901 = vmatpush.msra.mxu0 %v775_v2  ;;  %v703_v2 = vld [vmem:[#allocation6 + $0x80] sm:$0xff] }
 0x1d0   :  { %v4979_v5 = vpop.f32.mrf.mxu2  ;;  %v637_v6 = vpop.f32.mrf.mxu3  ;;  %902 = vmatpush.msra.mxu0 %v767_v17  ;;  %v805_v17 = vld [vmem:[#allocation6 + $0x3b0] sm:$0xff] }
 0x1d1   :  { %v638_v7 = vadd.f32 %v637_v6, %v4917_v47  ;;  %v721_v6 = vld [vmem:[#allocation6 + $0x110] sm:$0xff] }
 0x1d2   :  { %1134 = vmatpush.msra.mxu2 %v721_v6  ;;  %v695_v6 = vld [vmem:[#allocation6 + $0x40] sm:$0xff] }
 0x1d3   :  { %v676_v9 = vmax.f32 %v638_v7, 0.0  ;;  %v722_v7 = vld [vmem:[#allocation6 + $0x118] sm:$0xff] }
 0x1d4   :  { %1247 = vmatpush.msra.mxu3 %v722_v7  ;;  %v696_v7 = vld [vmem:[#allocation6 + $0x48] sm:$0xff] }
 0x1d5   :  { %875 = vxpose.xlu0.b32.cont [11/16] %v676_v9, 128  ;;  %v768_v9 = vld [vmem:[#allocation6 + $0x288] sm:$0xff] }
 0x1d6   :  { %1015 = vmatpush.msra.mxu1 %v768_v9  ;;  %v687_v9 = vld [vmem:[#allocation6] sm:$0xff] }
 0x1d8   :  { %v4982_v12 = vpop.f32.mrf.mxu2  ;;  %v640_v13 = vpop.f32.mrf.mxu3 }
 0x1d9   :  { %v641_v15 = vadd.f32 %v640_v13, %v4926_v50 }
 0x1db   :  { %v678_v16 = vmax.f32 %v641_v15, 0.0 }
 0x1dd   :  { %876 = vxpose.xlu0.b32.cont [12/16] %v678_v16, 128 }
 0x1e0   :  { %v578_v19 = vpop.f32.mrf.mxu2  ;;  %v643_v21 = vpop.f32.mrf.mxu3 }
 0x1e1   :  { %v644_v22 = vadd.f32 %v643_v21, %v4899_v41  ;;  %v579_v24 = vadd.f32 %v578_v19, %v4899_v41  ;;  %v570_v41 = vadd.f32 %v4976_v58, %v4908_v44  ;;  %v561_v44 = vadd.f32 %v4967_v26, %v4922_v49 }
 0x1e2   :  { %v552_v49 = vadd.f32 %v4958_v8, %v4933_v53  ;;  %v543_v53 = vadd.f32 %v4943_v57, %v4941_v56  ;;  %v759_v56 = vld [vmem:[#allocation6 + $0x240] sm:$0xff]  ;;  %v713_v57 = vld [vmem:[#allocation6 + $0xd0] sm:$0xff] }
 0x1e3   :  { %v680_v23 = vmax.f32 %v644_v22, 0.0 }
 0x1e5   :  { %877 = vxpose.xlu0.b32.cont [13/16] %v680_v23, 128  ;;  %v760_v23 = vld [vmem:[#allocation6 + $0x248] sm:$0xff] }
 0x1e6   :  { %1016 = vmatpush.msra.mxu1 %v760_v23  ;;  %v797_v23 = vld [vmem:[#allocation6 + $0x370] sm:$0xff] }
 0x1e8   :  { %v581_v30 = vpop.f32.mrf.mxu2  ;;  %v646_v31 = vpop.f32.mrf.mxu3 }
 0x1e9   :  { %v647_v33 = vadd.f32 %v646_v31, %v4906_v43  ;;  %v582_v18 = vadd.f32 %v581_v30, %v4906_v43  ;;  %v679_v43 = vmax.f32 %v579_v24, 0.0  ;;  %v706_v30 = vld [vmem:[#allocation6 + $0x98] sm:$0xff]  ;;  %v744_v31 = vld [vmem:[#allocation6 + $0x1c8] sm:$0xff] }
 0x1ea   :  { %v798_v24 = vld [vmem:[#allocation6 + $0x378] sm:$0xff] }
 0x1eb   :  { %v682_v35 = vmax.f32 %v647_v33, 0.0  ;;  %v681_v27 = vmax.f32 %v582_v18, 0.0  ;;  %v743_v33 = vld [vmem:[#allocation6 + $0x1c0] sm:$0xff]  ;;  %v806_v18 = vld [vmem:[#allocation6 + $0x3b8] sm:$0xff] }
 0x1ed   :  { %878 = vxpose.xlu0.b32.cont [14/16] %v682_v35, 128  ;;  %v698_v35 = vld [vmem:[#allocation6 + $0x58] sm:$0xff] }
 0x1f0   :  { %v584_v48 = vpop.f32.mrf.mxu2  ;;  %v649_v51 = vpop.f32.mrf.mxu3 }
 0x1f1   :  { %v650_v59 = vadd.f32 %v649_v51, %v4915_v46  ;;  %v585_v13 = vadd.f32 %v584_v48, %v4915_v46  ;;  %v576_v46 = vadd.f32 %v4982_v12, %v4926_v50  ;;  %v567_v50 = vadd.f32 %v4973_v38, %v4937_v54  ;;  %v727_v48 = vld [vmem:[#allocation6 + $0x140] sm:$0xff]  ;;  %v720_v51 = vld [vmem:[#allocation6 + $0x108] sm:$0xff] }
 0x1f2   :  { %v558_v54 = vadd.f32 %v4964_v20, %v4946_v61  ;;  %v549_v61 = vadd.f32 %v4955_v4, %v4953_v3  ;;  %v655_v4 = vmax.f32 %v543_v53, 0.0  ;;  %v749_v53 = vld [vmem:[#allocation6 + $0x1f0] sm:$0xff] }
 0x1f3   :  { %v684_v0 = vmax.f32 %v650_v59, 0.0  ;;  %v683_v25 = vmax.f32 %v585_v13, 0.0  ;;  %v677_v19 = vmax.f32 %v576_v46, 0.0  ;;  %v671_v58 = vmax.f32 %v567_v50, 0.0  ;;  %v719_v59 = vld [vmem:[#allocation6 + $0x100] sm:$0xff]  ;;  %v814_v13 = vld [vmem:[#allocation6 + $0x3f8] sm:$0xff] }
 0x1f4   :  { %v665_v26 = vmax.f32 %v558_v54, 0.0  ;;  %v659_v8 = vmax.f32 %v549_v61, 0.0  ;;  %v795_v46 = vld [vmem:[#allocation6 + $0x360] sm:$0xff]  ;;  %v782_v50 = vld [vmem:[#allocation6 + $0x2f8] sm:$0xff] }
 0x1f5   :  { %879 = vxpose.xlu0.b32.cont [15/16] %v684_v0, 128  ;;  %v711_v0 = vld [vmem:[#allocation6 + $0xc0] sm:$0xff]  ;;  %v758_v61 = vld [vmem:[#allocation6 + $0x238] sm:$0xff] }
 0x1f6   :  { %v771_v54 = vld [vmem:[#allocation6 + $0x2a0] sm:$0xff] }
 0x1f8   :  { %v587_v10 = vpop.f32.mrf.mxu2  ;;  %v652_v11 = vpop.f32.mrf.mxu3 }
 0x1f9   :  { %v588_v15 = vadd.f32 %v587_v10, %v4890_v39  ;;  %v653_v16 = vadd.f32 %v652_v11, %v4890_v39  ;;  %v573_v39 = vadd.f32 %v4979_v5, %v4917_v47  ;;  %v564_v47 = vadd.f32 %v4970_v32, %v4931_v52  ;;  %v688_v10 = vld [vmem:[#allocation6 + $0x8] sm:$0xff]  ;;  %v813_v11 = vld [vmem:[#allocation6 + $0x3f0] sm:$0xff] }
 0x1fa   :  { %v673_v5 = vmax.f32 %v570_v41, 0.0  ;;  %v555_v52 = vadd.f32 %v4961_v14, %v4939_v55  ;;  %v667_v32 = vmax.f32 %v561_v44, 0.0  ;;  %v546_v55 = vadd.f32 %v4950_v63, %v4948_v62  ;;  %v714_v62 = vld [vmem:[#allocation6 + $0xd8] sm:$0xff]  ;;  %v752_v63 = vld [vmem:[#allocation6 + $0x208] sm:$0xff]  ;;  %v787_v41 = vld [vmem:[#allocation6 + $0x320] sm:$0xff] }
 0x1fb   :  { %v685_v21 = vmax.f32 %v588_v15, 0.0  ;;  %v686_v22 = vmax.f32 %v653_v16, 0.0  ;;  %v675_v12 = vmax.f32 %v573_v39, 0.0  ;;  %v669_v38 = vmax.f32 %v564_v47, 0.0  ;;  %v812_v15 = vld [vmem:[#allocation6 + $0x3e8] sm:$0xff]  ;;  %v811_v16 = vld [vmem:[#allocation6 + $0x3e0] sm:$0xff] }
 0x1fc   :  { %v663_v20 = vmax.f32 %v555_v52, 0.0  ;;  %v661_v14 = vmax.f32 %v552_v49, 0.0  ;;  %v657_v3 = vmax.f32 %v546_v55, 0.0  ;;  %v790_v39 = vld [vmem:[#allocation6 + $0x338] sm:$0xff]  ;;  %v779_v47 = vld [vmem:[#allocation6 + $0x2e0] sm:$0xff] }
 0x1fd   :  { %880 = vxpose.xlu0.b32.end [16/16] %v686_v22, 128  ;;  %4101 = vmatpush.lsf.msrb.mxu0 %v685_v21  ;;  %v803_v22 = vld [vmem:[#allocation6 + $0x3a0] sm:$0xff]  ;;  %v774_v44 = vld [vmem:[#allocation6 + $0x2b8] sm:$0xff] }
 0x1fe   :  { %4156 = vmatpush.lsf.msrb.mxu1 %v685_v21  ;;  %4211 = vmatpush.lsf.msrb.mxu2 %v685_v21  ;;  %v766_v52 = vld [vmem:[#allocation6 + $0x278] sm:$0xff]  ;;  %v763_v49 = vld [vmem:[#allocation6 + $0x260] sm:$0xff] }
 0x1ff   :  { %4266 = vmatpush.lsf.msrb.mxu3 %v685_v21  ;;  %4102 = vmatpush.lsf.msrb.mxu0 %v683_v25  ;;  %v804_v21 = vld [vmem:[#allocation6 + $0x3a8] sm:$0xff]  ;;  %v755_v55 = vld [vmem:[#allocation6 + $0x220] sm:$0xff] }
 0x200   :  { %4157 = vmatpush.lsf.msrb.mxu1 %v683_v25  ;;  %4212 = vmatpush.lsf.msrb.mxu2 %v683_v25 }
 0x201   :  { %4267 = vmatpush.lsf.msrb.mxu3 %v683_v25  ;;  %4103 = vmatpush.lsf.msrb.mxu0 %v681_v27  ;;  %v796_v25 = vld [vmem:[#allocation6 + $0x368] sm:$0xff] }
 0x202   :  { %4158 = vmatpush.lsf.msrb.mxu1 %v681_v27  ;;  %4213 = vmatpush.lsf.msrb.mxu2 %v681_v27 }
 0x203   :  { %4268 = vmatpush.lsf.msrb.mxu3 %v681_v27  ;;  %4104 = vmatpush.lsf.msrb.mxu0 %v679_v43  ;;  %v789_v27 = vld [vmem:[#allocation6 + $0x330] sm:$0xff] }
 0x204   :  { %4159 = vmatpush.lsf.msrb.mxu1 %v679_v43  ;;  %4214 = vmatpush.lsf.msrb.mxu2 %v679_v43 }
 0x205   :  { %4269 = vmatpush.lsf.msrb.mxu3 %v679_v43  ;;  %4105 = vmatpush.lsf.msrb.mxu0 %v677_v19  ;;  %v788_v43 = vld [vmem:[#allocation6 + $0x328] sm:$0xff] }
 0x206   :  { %4160 = vmatpush.lsf.msrb.mxu1 %v677_v19  ;;  %4215 = vmatpush.lsf.msrb.mxu2 %v677_v19 }
 0x207   :  { %4270 = vmatpush.lsf.msrb.mxu3 %v677_v19  ;;  %4106 = vmatpush.lsf.msrb.mxu0 %v675_v12  ;;  %v781_v19 = vld [vmem:[#allocation6 + $0x2f0] sm:$0xff] }
 0x208   :  { %4161 = vmatpush.lsf.msrb.mxu1 %v675_v12  ;;  %4216 = vmatpush.lsf.msrb.mxu2 %v675_v12 }
 0x209   :  { %4271 = vmatpush.lsf.msrb.mxu3 %v675_v12  ;;  %4107 = vmatpush.lsf.msrb.mxu0 %v673_v5  ;;  %v780_v12 = vld [vmem:[#allocation6 + $0x2e8] sm:$0xff] }
 0x20a   :  { %4162 = vmatpush.lsf.msrb.mxu1 %v673_v5  ;;  %4217 = vmatpush.lsf.msrb.mxu2 %v673_v5 }
 0x20b   :  { %4272 = vmatpush.lsf.msrb.mxu3 %v673_v5  ;;  %4108 = vmatpush.lsf.msrb.mxu0 %v671_v58  ;;  %v773_v5 = vld [vmem:[#allocation6 + $0x2b0] sm:$0xff] }
 0x20c   :  { %4163 = vmatpush.lsf.msrb.mxu1 %v671_v58  ;;  %4218 = vmatpush.lsf.msrb.mxu2 %v671_v58 }
 0x20d   :  { %4273 = vmatpush.lsf.msrb.mxu3 %v671_v58  ;;  %4109 = vmatpush.lsf.msrb.mxu0 %v669_v38  ;;  %v772_v58 = vld [vmem:[#allocation6 + $0x2a8] sm:$0xff] }
 0x20e   :  { %4164 = vmatpush.lsf.msrb.mxu1 %v669_v38  ;;  %4219 = vmatpush.lsf.msrb.mxu2 %v669_v38 }
 0x20f   :  { %4274 = vmatpush.lsf.msrb.mxu3 %v669_v38  ;;  %4110 = vmatpush.lsf.msrb.mxu0 %v667_v32  ;;  %v765_v38 = vld [vmem:[#allocation6 + $0x270] sm:$0xff] }
 0x210   :  { %4165 = vmatpush.lsf.msrb.mxu1 %v667_v32  ;;  %4220 = vmatpush.lsf.msrb.mxu2 %v667_v32 }
 0x211   :  { %4275 = vmatpush.lsf.msrb.mxu3 %v667_v32  ;;  %4111 = vmatpush.lsf.msrb.mxu0 %v665_v26  ;;  %v764_v32 = vld [vmem:[#allocation6 + $0x268] sm:$0xff] }
 0x212   :  { %4166 = vmatpush.lsf.msrb.mxu1 %v665_v26  ;;  %4221 = vmatpush.lsf.msrb.mxu2 %v665_v26 }
 0x213   :  { %4276 = vmatpush.lsf.msrb.mxu3 %v665_v26  ;;  %4112 = vmatpush.lsf.msrb.mxu0 %v663_v20  ;;  %v757_v26 = vld [vmem:[#allocation6 + $0x230] sm:$0xff] }
 0x214   :  { %4167 = vmatpush.lsf.msrb.mxu1 %v663_v20  ;;  %4222 = vmatpush.lsf.msrb.mxu2 %v663_v20 }
 0x215   :  { %4277 = vmatpush.lsf.msrb.mxu3 %v663_v20  ;;  %4113 = vmatpush.lsf.msrb.mxu0 %v661_v14  ;;  %v756_v20 = vld [vmem:[#allocation6 + $0x228] sm:$0xff] }
 0x216   :  { %4168 = vmatpush.lsf.msrb.mxu1 %v661_v14  ;;  %4223 = vmatpush.lsf.msrb.mxu2 %v661_v14 }
 0x217   :  { %4278 = vmatpush.lsf.msrb.mxu3 %v661_v14  ;;  %4114 = vmatpush.lsf.msrb.mxu0 %v659_v8 }
 0x218   :  { %4169 = vmatpush.lsf.msrb.mxu1 %v659_v8  ;;  %4224 = vmatpush.lsf.msrb.mxu2 %v659_v8 }
 0x219   :  { %4279 = vmatpush.lsf.msrb.mxu3 %v659_v8  ;;  %4115 = vmatpush.lsf.msrb.mxu0 %v657_v3  ;;  %v750_v8 = vld [vmem:[#allocation6 + $0x1f8] sm:$0xff] }
 0x21a   :  { %4170 = vmatpush.lsf.msrb.mxu1 %v657_v3  ;;  %4225 = vmatpush.lsf.msrb.mxu2 %v657_v3 }
 0x21b   :  { %4280 = vmatpush.lsf.msrb.mxu3 %v657_v3  ;;  %4116 = vmatpush.lsf.msrb.mxu0 %v655_v4 }
 0x21c   :  { %4171 = vmatpush.lsf.msrb.mxu1 %v655_v4  ;;  %4226 = vmatpush.lsf.msrb.mxu2 %v655_v4 }
 0x21d   :  { %4281 = vmatpush.lsf.msrb.mxu3 %v655_v4  ;;  %4117 = vllmr.16.mxu0  ;;  %v748_v4 = vld [vmem:[#allocation6 + $0x1e8] sm:$0xff] }
 0x21e   :  { %4172 = vllmr.16.mxu1  ;;  %4227 = vllmr.16.mxu2 }
 0x21f   :  { %4282 = vllmr.16.mxu3  ;;  %903 = vmatpush.msra.mxu0 %v759_v56  ;;  %v747_v56 = vld [vmem:[#allocation6 + $0x1e0] sm:$0xff] }
 0x220   :  { %1135 = vmatpush.msra.mxu2 %v713_v57  ;;  %1248 = vmatpush.msra.mxu3 %v714_v62  ;;  %v741_v62 = vld [vmem:[#allocation6 + $0x1b0] sm:$0xff] }
 0x221   :  { %1017 = vmatpush.msra.mxu1 %v752_v63  ;;  %904 = vmatpush.msra.mxu0 %v751_v28  ;;  %v742_v63 = vld [vmem:[#allocation6 + $0x1b8] sm:$0xff]  ;;  %v740_v28 = vld [vmem:[#allocation6 + $0x1a8] sm:$0xff] }
 0x222   :  { %1136 = vmatpush.msra.mxu2 %v705_v29  ;;  %1249 = vmatpush.msra.mxu3 %v706_v30  ;;  %v739_v29 = vld [vmem:[#allocation6 + $0x1a0] sm:$0xff] }
 0x223   :  { %1018 = vmatpush.msra.mxu1 %v744_v31  ;;  %905 = vmatpush.msra.mxu0 %v743_v33 }
 0x224   :  { %1137 = vmatpush.msra.mxu2 %v697_v34  ;;  %1250 = vmatpush.msra.mxu3 %v698_v35  ;;  %v733_v34 = vld [vmem:[#allocation6 + $0x170] sm:$0xff]  ;;  %v734_v35 = vld [vmem:[#allocation6 + $0x178] sm:$0xff] }
 0x225   :  { %1019 = vmatpush.msra.mxu1 %v736_v36  ;;  %906 = vmatpush.msra.mxu0 %v735_v37  ;;  %v5033_v36 = vld [vmem:[#allocation8] sm:$0xff] }
 0x226   :  { %1138 = vmatpush.msra.mxu2 %v689_v40  ;;  %1251 = vmatpush.msra.mxu3 %v690_v42 }
 0x227   :  { %1020 = vmatpush.msra.mxu1 %v728_v45  ;;  %907 = vmatpush.msra.mxu0 %v727_v48 }
 0x229   :  { %1021 = vmatpush.msra.mxu1 %v720_v51  ;;  %908 = vmatpush.msra.mxu0 %v719_v59  ;;  %v5017_v14 = vpop.trf.xlu0  ;;  %v5042_v51 = vperm.slane %v5033_v36, 2  ;;  %v5045_v59 = vperm.slane %v5033_v36, 3 }
 0x22a   :  { %6133 = vst [vmem:[#allocation25_spill] sm:$0xff] %v5017_v14 }
 0x22b   :  { %1022 = vmatpush.msra.mxu1 %v712_v60  ;;  %909 = vmatpush.msra.mxu0 %v711_v0  ;;  %v732_v0 = vld [vmem:[#allocation6 + $0x168] sm:$0xff] }
 0x22d   :  { %1023 = vmatpush.msra.mxu1 %v704_v1  ;;  %910 = vmatpush.msra.mxu0 %v703_v2  ;;  %v731_v1 = vld [vmem:[#allocation6 + $0x160] sm:$0xff] }
 0x22f   :  { %911 = vmatpush.msra.mxu0 %v695_v6  ;;  %1024 = vmatpush.msra.mxu1 %v696_v7 }
 0x231   :  { %912 = vmatpush.msra.mxu0 %v687_v9  ;;  %1025 = vmatpush.msra.mxu1 %v688_v10  ;;  %v5019_v3 = vpop.trf.xlu0 }
 0x232   :  { %6134 = vst [vmem:[#allocation26_spill] sm:$0xff] %v5019_v3 }
 0x239   :  { %v5021_v57 = vpop.trf.xlu0 }
 0x23a   :  { %6135 = vst [vmem:[#allocation27_spill] sm:$0xff] %v5021_v57 }
 0x23e   :  { %4118 = vmatmul.lmr.bf16.vlgmr.msra.gmra.16.mxu0 }
 0x23f   :  { %4173 = vmatmul.lmr.bf16.vlgmr.msra.gmra.16.mxu1  ;;  %4228 = vmatmul.lmr.bf16.vlgmr.msra.gmra.16.mxu2 }
 0x240   :  { %4283 = vmatmul.lmr.bf16.vlgmr.msra.gmra.16.mxu3  ;;  %1575 = vmatpush.msra.mxu2 %v813_v11 }
 0x241   :  { %1688 = vmatpush.msra.mxu3 %v814_v13  ;;  %1462 = vmatpush.msra.mxu1 %v812_v15  ;;  %v5023_v30 = vpop.trf.xlu0 }
 0x242   :  { %1349 = vmatpush.msra.mxu0 %v811_v16  ;;  %1576 = vmatpush.msra.mxu2 %v805_v17  ;;  %6136 = vst [vmem:[#allocation28_spill] sm:$0xff] %v5023_v30 }
 0x243   :  { %1689 = vmatpush.msra.mxu3 %v806_v18  ;;  %1463 = vmatpush.msra.mxu1 %v804_v21 }
 0x244   :  { %1350 = vmatpush.msra.mxu0 %v803_v22  ;;  %1577 = vmatpush.msra.mxu2 %v797_v23 }
 0x245   :  { %1690 = vmatpush.msra.mxu3 %v798_v24  ;;  %1464 = vmatpush.msra.mxu1 %v796_v25  ;;  %v725_v24 = vld [vmem:[#allocation6 + $0x130] sm:$0xff]  ;;  %v726_v25 = vld [vmem:[#allocation6 + $0x138] sm:$0xff] }
 0x246   :  { %4119 = vmatmul.lmr.bf16.gmra.16.mxu0  ;;  %1578 = vmatpush.msra.mxu2 %v789_v27 }
 0x247   :  { %4174 = vmatmul.lmr.bf16.gmra.16.mxu1  ;;  %4229 = vmatmul.lmr.bf16.gmra.16.mxu2 }
 0x248   :  { %4284 = vmatmul.lmr.bf16.gmra.16.mxu3  ;;  %1351 = vmatpush.msra.mxu0 %v795_v46 }
 0x249   :  { %1691 = vmatpush.msra.mxu3 %v790_v39  ;;  %1465 = vmatpush.msra.mxu1 %v788_v43  ;;  %v5039_v48 = vpop.trf.xlu0 }
 0x24a   :  { %1352 = vmatpush.msra.mxu0 %v787_v41  ;;  %1579 = vmatpush.msra.mxu2 %v781_v19  ;;  %6137 = vst [vmem:[#allocation29_spill] sm:$0xff] %v5039_v48 }
 0x24b   :  { %1692 = vmatpush.msra.mxu3 %v782_v50  ;;  %1466 = vmatpush.msra.mxu1 %v780_v12 }
 0x24c   :  { %1353 = vmatpush.msra.mxu0 %v779_v47  ;;  %1580 = vmatpush.msra.mxu2 %v773_v5 }
 0x24d   :  { %1693 = vmatpush.msra.mxu3 %v774_v44  ;;  %1467 = vmatpush.msra.mxu1 %v772_v58  ;;  %v724_v58 = vld [vmem:[#allocation6 + $0x128] sm:$0xff] }
 0x24e   :  { %4120 = vmatmul.lmr.bf16.gmra.16.mxu0  ;;  %1581 = vmatpush.msra.mxu2 %v765_v38 }
 0x24f   :  { %4175 = vmatmul.lmr.bf16.gmra.16.mxu1  ;;  %4230 = vmatmul.lmr.bf16.gmra.16.mxu2 }
 0x250   :  { %4285 = vmatmul.lmr.bf16.gmra.16.mxu3  ;;  %1354 = vmatpush.msra.mxu0 %v771_v54  ;;  %v723_v54 = vld [vmem:[#allocation6 + $0x120] sm:$0xff] }
 0x251   :  { %1694 = vmatpush.msra.mxu3 %v766_v52  ;;  %1468 = vmatpush.msra.mxu1 %v764_v32  ;;  %v5060_v21 = vpop.trf.xlu0 }
 0x252   :  { %1355 = vmatpush.msra.mxu0 %v763_v49  ;;  %1582 = vmatpush.msra.mxu2 %v757_v26  ;;  %6138 = vst [vmem:[#allocation30_spill] sm:$0xff] %v5060_v21 }
 0x253   :  { %1695 = vmatpush.msra.mxu3 %v758_v61  ;;  %1469 = vmatpush.msra.mxu1 %v756_v20 }
 0x254   :  { %1356 = vmatpush.msra.mxu0 %v755_v55  ;;  %1583 = vmatpush.msra.mxu2 %v749_v53 }
 0x255   :  { %1696 = vmatpush.msra.mxu3 %v750_v8  ;;  %1470 = vmatpush.msra.mxu1 %v748_v4  ;;  %v717_v4 = vld [vmem:[#allocation6 + $0xf0] sm:$0xff] }
 0x256   :  { %4121 = vmatmul.lmr.bf16.gmra.16.mxu0  ;;  %1584 = vmatpush.msra.mxu2 %v741_v62 }
 0x257   :  { %4176 = vmatmul.lmr.bf16.gmra.16.mxu1  ;;  %4231 = vmatmul.lmr.bf16.gmra.16.mxu2 }
 0x258   :  { %4286 = vmatmul.lmr.bf16.gmra.16.mxu3  ;;  %1357 = vmatpush.msra.mxu0 %v747_v56  ;;  %v718_v56 = vld [vmem:[#allocation6 + $0xf8] sm:$0xff] }
 0x259   :  { %1697 = vmatpush.msra.mxu3 %v742_v63  ;;  %1471 = vmatpush.msra.mxu1 %v740_v28  ;;  %v5075_v44 = vpop.trf.xlu0 }
 0x25a   :  { %1358 = vmatpush.msra.mxu0 %v739_v29  ;;  %1585 = vmatpush.msra.mxu2 %v733_v34  ;;  %6139 = vst [vmem:[#allocation31_spill] sm:$0xff] %v5075_v44 }
 0x25b   :  { %1698 = vmatpush.msra.mxu3 %v734_v35  ;;  %1472 = vmatpush.msra.mxu1 %v732_v0 }
 0x25c   :  { %1359 = vmatpush.msra.mxu0 %v731_v1  ;;  %1586 = vmatpush.msra.mxu2 %v725_v24 }
 0x25d   :  { %1699 = vmatpush.msra.mxu3 %v726_v25  ;;  %1473 = vmatpush.msra.mxu1 %v724_v58 }
 0x25e   :  { %4122 = vmatmul.lmr.bf16.gmra.16.mxu0  ;;  %1587 = vmatpush.msra.mxu2 %v717_v4 }
 0x25f   :  { %4177 = vmatmul.lmr.bf16.gmra.16.mxu1  ;;  %4232 = vmatmul.lmr.bf16.gmra.16.mxu2 }
 0x260   :  { %4287 = vmatmul.lmr.bf16.gmra.16.mxu3  ;;  %1360 = vmatpush.msra.mxu0 %v723_v54 }
 0x261   :  { %v5087_v63 = vpop.trf.xlu0  ;;  %1700 = vmatpush.msra.mxu3 %v718_v56 }
 0x262   :  { %6140 = vst [vmem:[#allocation32_spill] sm:$0xff] %v5087_v63 }
 0x266   :  { %4123 = vmatmul.lmr.bf16.gmra.16.mxu0 }
 0x267   :  { %4178 = vmatmul.lmr.bf16.gmra.16.mxu1  ;;  %4233 = vmatmul.lmr.bf16.gmra.16.mxu2 }
 0x268   :  { %4288 = vmatmul.lmr.bf16.gmra.16.mxu3 }
 0x26e   :  { %4124 = vmatmul.lmr.bf16.gmra.16.mxu0 }
 0x26f   :  { %4179 = vmatmul.lmr.bf16.gmra.16.mxu1  ;;  %4234 = vmatmul.lmr.bf16.gmra.16.mxu2 }
 0x270   :  { %4289 = vmatmul.lmr.bf16.gmra.16.mxu3 }
 0x276   :  { %4125 = vmatmul.lmr.bf16.gmra.16.mxu0 }
 0x277   :  { %4180 = vmatmul.lmr.bf16.gmra.16.mxu1  ;;  %4235 = vmatmul.lmr.bf16.gmra.16.mxu2 }
 0x278   :  { %4290 = vmatmul.lmr.bf16.gmra.16.mxu3 }
 0x27e   :  { %4126 = vmatmul.lmr.bf16.gmra.16.mxu0 }
 0x27f   :  { %4181 = vmatmul.lmr.bf16.gmra.16.mxu1  ;;  %4236 = vmatmul.lmr.bf16.gmra.16.mxu2 }
 0x280   :  { %4291 = vmatmul.lmr.bf16.gmra.16.mxu3 }
 0x286   :  { %4127 = vmatmul.lmr.bf16.gmra.16.mxu0 }
 0x287   :  { %4182 = vmatmul.lmr.bf16.gmra.16.mxu1  ;;  %4237 = vmatmul.lmr.bf16.gmra.16.mxu2 }
 0x288   :  { %4292 = vmatmul.lmr.bf16.gmra.16.mxu3 }
 0x28e   :  { %4128 = vmatmul.lmr.bf16.gmra.16.mxu0 }
 0x28f   :  { %4183 = vmatmul.lmr.bf16.gmra.16.mxu1  ;;  %4238 = vmatmul.lmr.bf16.gmra.16.mxu2 }
 0x290   :  { %4293 = vmatmul.lmr.bf16.gmra.16.mxu3 }
 0x296   :  { %4129 = vmatmul.lmr.bf16.gmra.16.mxu0 }
 0x297   :  { %4184 = vmatmul.lmr.bf16.gmra.16.mxu1  ;;  %4239 = vmatmul.lmr.bf16.gmra.16.mxu2 }
 0x298   :  { %4294 = vmatmul.lmr.bf16.gmra.16.mxu3 }
 0x29e   :  { %4130 = vmatmul.lmr.bf16.gmra.16.mxu0 }
 0x29f   :  { %4185 = vmatmul.lmr.bf16.gmra.16.mxu1  ;;  %4240 = vmatmul.lmr.bf16.gmra.16.mxu2 }
 0x2a0   :  { %4295 = vmatmul.lmr.bf16.gmra.16.mxu3 }
 0x2a6   :  { %4131 = vmatmul.lmr.bf16.gmra.16.mxu0 }
 0x2a7   :  { %4186 = vmatmul.lmr.bf16.gmra.16.mxu1  ;;  %4241 = vmatmul.lmr.bf16.gmra.16.mxu2 }
 0x2a8   :  { %4296 = vmatmul.lmr.bf16.gmra.16.mxu3 }
 0x2ae   :  { %4132 = vmatmul.lmr.bf16.gmra.16.mxu0 }
 0x2af   :  { %4187 = vmatmul.lmr.bf16.gmra.16.mxu1  ;;  %4242 = vmatmul.lmr.bf16.gmra.16.mxu2 }
 0x2b0   :  { %4297 = vmatmul.lmr.bf16.gmra.16.mxu3 }
 0x2b6   :  { %4133 = vmatmul.lmr.bf16.gmra.16.mxu0 }
 0x2b7   :  { %4188 = vmatmul.lmr.bf16.gmra.16.mxu1  ;;  %4243 = vmatmul.lmr.bf16.gmra.16.mxu2 }
 0x2b8   :  { %4298 = vmatmul.lmr.bf16.gmra.16.mxu3 }
 0x2bb   :  { %v5025_v31 = vpop.f32.mrf.mxu0 }
 0x2bc   :  { %v5027_v33 = vpop.f32.mrf.mxu1 }
 0x2be   :  { %961 = vmatmul.f32.gmra.mxu0 %v5017_v14 }
 0x2bf   :  { %1074 = vmatmul.f32.gmra.mxu1 %v5017_v14  ;;  %1187 = vmatmul.f32.gmra.mxu2 %v5017_v14 }
 0x2c0   :  { %1300 = vmatmul.f32.gmra.mxu3 %v5017_v14 }
 0x2c2   :  { %v1140_v37 = vpop.f32.mrf.mxu2 }
 0x2c3   :  { %v1253_v40 = vpop.f32.mrf.mxu3  ;;  %v5035_v42 = vpop.f32.mrf.mxu0  ;;  %v1141_v60 = vadd.f32 %v1140_v37, %v5042_v51 }
 0x2c4   :  { %v5037_v45 = vpop.f32.mrf.mxu1  ;;  %v1254_v2 = vadd.f32 %v1253_v40, %v5045_v59 }
 0x2c5   :  { %v1803_v15 = vmax.f32 %v1141_v60, 0.0 }
 0x2c6   :  { %964 = vmatmul.f32.gmra.mxu0 %v5019_v3  ;;  %v1804_v17 = vmax.f32 %v1254_v2, 0.0  ;;  %v716_v2 = vld [vmem:[#allocation6 + $0xe8] sm:$0xff] }
 0x2c7   :  { %1077 = vmatmul.f32.gmra.mxu1 %v5019_v3  ;;  %1190 = vmatmul.f32.gmra.mxu2 %v5019_v3 }
 0x2c8   :  { %1303 = vmatmul.f32.gmra.mxu3 %v5019_v3  ;;  %1474 = vmatpush.msra.mxu1 %v716_v2 }
 0x2ca   :  { %v1143_v6 = vpop.f32.mrf.mxu2 }
 0x2cb   :  { %v1144_v7 = vadd.f32 %v1143_v6, %v5042_v51  ;;  %v1256_v9 = vpop.f32.mrf.mxu3  ;;  %v5054_v10 = vpop.f32.mrf.mxu0  ;;  %v715_v6 = vld [vmem:[#allocation6 + $0xe0] sm:$0xff] }
 0x2cc   :  { %v1257_v11 = vadd.f32 %v1256_v9, %v5045_v59  ;;  %v5057_v13 = vpop.f32.mrf.mxu1  ;;  %1361 = vmatpush.msra.mxu0 %v715_v6 }
 0x2cd   :  { %v1811_v16 = vmax.f32 %v1144_v7, 0.0 }
 0x2ce   :  { %v1812_v18 = vmax.f32 %v1257_v11, 0.0  ;;  %967 = vmatmul.f32.gmra.mxu0 %v5021_v57 }
 0x2cf   :  { %v2099_v22 = vmax.f32 %v1803_v15, %v1811_v16  ;;  %1080 = vmatmul.f32.gmra.mxu1 %v5021_v57  ;;  %1193 = vmatmul.f32.gmra.mxu2 %v5021_v57 }
 0x2d0   :  { %v2120_v23 = vmax.f32 %v1804_v17, %v1812_v18  ;;  %1306 = vmatmul.f32.gmra.mxu3 %v5021_v57  ;;  %v5105_v18 = vpop.trf.xlu0 }
 0x2d1   :  { %6141 = vst [vmem:[#allocation33_spill] sm:$0xff] %v5105_v18 }
 0x2d2   :  { %v1146_v46 = vpop.f32.mrf.mxu2 }
 0x2d3   :  { %v1147_v27 = vadd.f32 %v1146_v46, %v5042_v51  ;;  %v1259_v39 = vpop.f32.mrf.mxu3  ;;  %v5066_v43 = vpop.f32.mrf.mxu0  ;;  %v709_v46 = vld [vmem:[#allocation6 + $0xb0] sm:$0xff] }
 0x2d4   :  { %v1260_v41 = vadd.f32 %v1259_v39, %v5045_v59  ;;  %v5069_v19 = vpop.f32.mrf.mxu1  ;;  %1588 = vmatpush.msra.mxu2 %v709_v46  ;;  %v700_v46 = vld [vmem:[#allocation6 + $0x68] sm:$0xff] }
 0x2d5   :  { %v1819_v50 = vmax.f32 %v1147_v27, 0.0  ;;  %v710_v27 = vld [vmem:[#allocation6 + $0xb8] sm:$0xff] }
 0x2d6   :  { %v1820_v12 = vmax.f32 %v1260_v41, 0.0  ;;  %970 = vmatmul.f32.gmra.mxu0 %v5023_v30  ;;  %1701 = vmatpush.msra.mxu3 %v710_v27  ;;  %v699_v27 = vld [vmem:[#allocation6 + $0x60] sm:$0xff] }
 0x2d7   :  { %v2100_v47 = vmax.f32 %v2099_v22, %v1819_v50  ;;  %1083 = vmatmul.f32.gmra.mxu1 %v5023_v30  ;;  %1196 = vmatmul.f32.gmra.mxu2 %v5023_v30 }
 0x2d8   :  { %v2121_v5 = vmax.f32 %v2120_v23, %v1820_v12  ;;  %1309 = vmatmul.f32.gmra.mxu3 %v5023_v30 }
 0x2da   :  { %v1149_v38 = vpop.f32.mrf.mxu2 }
 0x2db   :  { %v1150_v52 = vadd.f32 %v1149_v38, %v5042_v51  ;;  %v1262_v32 = vpop.f32.mrf.mxu3  ;;  %v5078_v49 = vpop.f32.mrf.mxu0 }
 0x2dc   :  { %v1263_v26 = vadd.f32 %v1262_v32, %v5045_v59  ;;  %v5081_v61 = vpop.f32.mrf.mxu1  ;;  %v5118_v38 = vpop.trf.xlu0 }
 0x2dd   :  { %v1827_v20 = vmax.f32 %v1150_v52, 0.0  ;;  %6142 = vst [vmem:[#allocation34_spill] sm:$0xff] %v5118_v38 }
 0x2de   :  { %v1828_v55 = vmax.f32 %v1263_v26, 0.0  ;;  %973 = vmatmul.f32.gmra.mxu0 %v5039_v48  ;;  %v708_v26 = vld [vmem:[#allocation6 + $0xa8] sm:$0xff] }
 0x2df   :  { %v2101_v53 = vmax.f32 %v2100_v47, %v1827_v20  ;;  %1086 = vmatmul.f32.gmra.mxu1 %v5039_v48  ;;  %1199 = vmatmul.f32.gmra.mxu2 %v5039_v48  ;;  %v707_v20 = vld [vmem:[#allocation6 + $0xa0] sm:$0xff] }
 0x2e0   :  { %v2122_v8 = vmax.f32 %v2121_v5, %v1828_v55  ;;  %1312 = vmatmul.f32.gmra.mxu3 %v5039_v48  ;;  %1475 = vmatpush.msra.mxu1 %v708_v26 }
 0x2e1   :  { %1362 = vmatpush.msra.mxu0 %v707_v20 }
 0x2e2   :  { %v1152_v62 = vpop.f32.mrf.mxu2  ;;  %1476 = vmatpush.msra.mxu1 %v700_v46 }
 0x2e3   :  { %v1153_v28 = vadd.f32 %v1152_v62, %v5042_v51  ;;  %v1265_v29 = vpop.f32.mrf.mxu3  ;;  %v5090_v34 = vpop.f32.mrf.mxu0  ;;  %1363 = vmatpush.msra.mxu0 %v699_v27 }
 0x2e4   :  { %v1266_v35 = vadd.f32 %v1265_v29, %v5045_v59  ;;  %v5093_v37 = vpop.f32.mrf.mxu1 }
 0x2e5   :  { %v1835_v40 = vmax.f32 %v1153_v28, 0.0 }
 0x2e6   :  { %v1836_v60 = vmax.f32 %v1266_v35, 0.0  ;;  %976 = vmatmul.f32.gmra.mxu0 %v5060_v21 }
 0x2e7   :  { %v2102_v0 = vmax.f32 %v2101_v53, %v1835_v40  ;;  %1089 = vmatmul.f32.gmra.mxu1 %v5060_v21  ;;  %1202 = vmatmul.f32.gmra.mxu2 %v5060_v21 }
 0x2e8   :  { %v2123_v1 = vmax.f32 %v2122_v8, %v1836_v60  ;;  %1315 = vmatmul.f32.gmra.mxu3 %v5060_v21  ;;  %v5133_v60 = vpop.trf.xlu0 }
 0x2e9   :  { %6143 = vst [vmem:[#allocation35_spill] sm:$0xff] %v5133_v60 }
 0x2ea   :  { %v1155_v7 = vpop.f32.mrf.mxu2 }
 0x2eb   :  { %v1156_v9 = vadd.f32 %v1155_v7, %v5042_v51  ;;  %v1268_v11 = vpop.f32.mrf.mxu3  ;;  %v5100_v15 = vpop.f32.mrf.mxu0 }
 0x2ec   :  { %v1269_v16 = vadd.f32 %v1268_v11, %v5045_v59  ;;  %v5103_v17 = vpop.f32.mrf.mxu1 }
 0x2ed   :  { %v1843_v22 = vmax.f32 %v1156_v9, 0.0 }
 0x2ee   :  { %v1844_v23 = vmax.f32 %v1269_v16, 0.0  ;;  %979 = vmatmul.f32.gmra.mxu0 %v5075_v44 }
 0x2ef   :  { %v2103_v24 = vmax.f32 %v2102_v0, %v1843_v22  ;;  %1092 = vmatmul.f32.gmra.mxu1 %v5075_v44  ;;  %1205 = vmatmul.f32.gmra.mxu2 %v5075_v44  ;;  %v701_v0 = vld [vmem:[#allocation6 + $0x70] sm:$0xff] }
 0x2f0   :  { %v2124_v25 = vmax.f32 %v2123_v1, %v1844_v23  ;;  %1318 = vmatmul.f32.gmra.mxu3 %v5075_v44  ;;  %v702_v1 = vld [vmem:[#allocation6 + $0x78] sm:$0xff]  ;;  %1589 = vmatpush.msra.mxu2 %v701_v0 }
 0x2f1   :  { %1702 = vmatpush.msra.mxu3 %v702_v1 }
 0x2f2   :  { %v1158_v39 = vpop.f32.mrf.mxu2 }
 0x2f3   :  { %v1159_v41 = vadd.f32 %v1158_v39, %v5042_v51  ;;  %v1271_v50 = vpop.f32.mrf.mxu3  ;;  %v5112_v12 = vpop.f32.mrf.mxu0 }
 0x2f4   :  { %v1272_v47 = vadd.f32 %v1271_v50, %v5045_v59  ;;  %v5115_v5 = vpop.f32.mrf.mxu1 }
 0x2f5   :  { %v1851_v58 = vmax.f32 %v1159_v41, 0.0  ;;  %v5145_v41 = vpop.trf.xlu0 }
 0x2f6   :  { %v1852_v54 = vmax.f32 %v1272_v47, 0.0  ;;  %982 = vmatmul.f32.gmra.mxu0 %v5087_v63  ;;  %6144 = vst [vmem:[#allocation36_spill] sm:$0xff] %v5145_v41 }
 0x2f7   :  { %v2104_v52 = vmax.f32 %v2103_v24, %v1851_v58  ;;  %1095 = vmatmul.f32.gmra.mxu1 %v5087_v63  ;;  %1208 = vmatmul.f32.gmra.mxu2 %v5087_v63 }
 0x2f8   :  { %v2125_v32 = vmax.f32 %v2124_v25, %v1852_v54  ;;  %1321 = vmatmul.f32.gmra.mxu3 %v5087_v63 }
 0x2fa   :  { %v1161_v55 = vpop.f32.mrf.mxu2 }
 0x2fb   :  { %v1162_v53 = vadd.f32 %v1161_v55, %v5042_v51  ;;  %v1274_v8 = vpop.f32.mrf.mxu3  ;;  %v5124_v4 = vpop.f32.mrf.mxu0 }
 0x2fc   :  { %v1275_v56 = vadd.f32 %v1274_v8, %v5045_v59  ;;  %v5127_v62 = vpop.f32.mrf.mxu1  ;;  %v694_v8 = vld [vmem:[#allocation6 + $0x38] sm:$0xff] }
 0x2fd   :  { %v1859_v28 = vmax.f32 %v1162_v53, 0.0  ;;  %v693_v53 = vld [vmem:[#allocation6 + $0x30] sm:$0xff]  ;;  %1703 = vmatpush.msra.mxu3 %v694_v8  ;;  %v5163_v1 = vpop.trf.xlu0 }
 0x2fe   :  { %v1860_v29 = vmax.f32 %v1275_v56, 0.0  ;;  %985 = vmatmul.f32.gmra.mxu0 %v5105_v18  ;;  %1590 = vmatpush.msra.mxu2 %v693_v53  ;;  %6145 = vst [vmem:[#allocation37_spill] sm:$0xff] %v5163_v1 }
 0x2ff   :  { %v2105_v35 = vmax.f32 %v2104_v52, %v1859_v28  ;;  %1098 = vmatmul.f32.gmra.mxu1 %v5105_v18  ;;  %1211 = vmatmul.f32.gmra.mxu2 %v5105_v18 }
 0x300   :  { %v2126_v40 = vmax.f32 %v2125_v32, %v1860_v29  ;;  %1324 = vmatmul.f32.gmra.mxu3 %v5105_v18 }
 0x302   :  { %v1164_v2 = vpop.f32.mrf.mxu2 }
 0x303   :  { %v1165_v6 = vadd.f32 %v1164_v2, %v5042_v51  ;;  %v1277_v7 = vpop.f32.mrf.mxu3  ;;  %v5136_v9 = vpop.f32.mrf.mxu0 }
 0x304   :  { %v1278_v11 = vadd.f32 %v1277_v7, %v5045_v59  ;;  %v5139_v16 = vpop.f32.mrf.mxu1 }
 0x305   :  { %v1867_v22 = vmax.f32 %v1165_v6, 0.0 }
 0x306   :  { %v1868_v23 = vmax.f32 %v1278_v11, 0.0  ;;  %988 = vmatmul.f32.gmra.mxu0 %v5118_v38 }
 0x307   :  { %v2106_v24 = vmax.f32 %v2105_v35, %v1867_v22  ;;  %1101 = vmatmul.f32.gmra.mxu1 %v5118_v38  ;;  %1214 = vmatmul.f32.gmra.mxu2 %v5118_v38 }
 0x308   :  { %v2127_v25 = vmax.f32 %v2126_v40, %v1868_v23  ;;  %1327 = vmatmul.f32.gmra.mxu3 %v5118_v38 }
 0x30a   :  { %v1167_v39 = vpop.f32.mrf.mxu2 }
 0x30b   :  { %v1168_v50 = vadd.f32 %v1167_v39, %v5042_v51  ;;  %v1280_v47 = vpop.f32.mrf.mxu3  ;;  %v5148_v58 = vpop.f32.mrf.mxu0 }
 0x30c   :  { %v1281_v54 = vadd.f32 %v1280_v47, %v5045_v59  ;;  %v5151_v52 = vpop.f32.mrf.mxu1  ;;  %v5176_v47 = vpop.trf.xlu0 }
 0x30d   :  { %v1875_v32 = vmax.f32 %v1168_v50, 0.0  ;;  %6146 = vst [vmem:[#allocation38_spill] sm:$0xff] %v5176_v47 }
 0x30e   :  { %v1876_v26 = vmax.f32 %v1281_v54, 0.0  ;;  %991 = vmatmul.f32.gmra.mxu0 %v5133_v60  ;;  %v692_v54 = vld [vmem:[#allocation6 + $0x28] sm:$0xff] }
 0x30f   :  { %v2107_v20 = vmax.f32 %v2106_v24, %v1875_v32  ;;  %1104 = vmatmul.f32.gmra.mxu1 %v5133_v60  ;;  %1217 = vmatmul.f32.gmra.mxu2 %v5133_v60  ;;  %v691_v32 = vld [vmem:[#allocation6 + $0x20] sm:$0xff] }
 0x310   :  { %v2128_v55 = vmax.f32 %v2127_v25, %v1876_v26  ;;  %1330 = vmatmul.f32.gmra.mxu3 %v5133_v60  ;;  %1477 = vmatpush.msra.mxu1 %v692_v54 }
 0x311   :  { %1364 = vmatpush.msra.mxu0 %v691_v32 }
 0x312   :  { %v1170_v56 = vpop.f32.mrf.mxu2 }
 0x313   :  { %v1171_v28 = vadd.f32 %v1170_v56, %v5042_v51  ;;  %v1283_v29 = vpop.f32.mrf.mxu3  ;;  %v5158_v35 = vpop.f32.mrf.mxu0 }
 0x314   :  { %v1284_v40 = vadd.f32 %v1283_v29, %v5045_v59  ;;  %v5161_v0 = vpop.f32.mrf.mxu1 }
 0x315   :  { %v1883_v2 = vmax.f32 %v1171_v28, 0.0 }
 0x316   :  { %v1884_v6 = vmax.f32 %v1284_v40, 0.0  ;;  %994 = vmatmul.f32.gmra.mxu0 %v5145_v41 }
 0x317   :  { %v2108_v7 = vmax.f32 %v2107_v20, %v1883_v2  ;;  %1107 = vmatmul.f32.gmra.mxu1 %v5145_v41  ;;  %1220 = vmatmul.f32.gmra.mxu2 %v5145_v41 }
 0x318   :  { %v2129_v11 = vmax.f32 %v2128_v55, %v1884_v6  ;;  %1333 = vmatmul.f32.gmra.mxu3 %v5145_v41 }
 0x31a   :  { %v1173_v22 = vpop.f32.mrf.mxu2 }
 0x31b   :  { %v1174_v23 = vadd.f32 %v1173_v22, %v5042_v51  ;;  %v1286_v24 = vpop.f32.mrf.mxu3  ;;  %v5170_v25 = vpop.f32.mrf.mxu0 }
 0x31c   :  { %v1287_v46 = vadd.f32 %v1286_v24, %v5045_v59  ;;  %v5173_v27 = vpop.f32.mrf.mxu1 }
 0x31d   :  { %v1891_v39 = vmax.f32 %v1174_v23, 0.0 }
 0x31e   :  { %v1892_v50 = vmax.f32 %v1287_v46, 0.0  ;;  %997 = vmatmul.f32.gmra.mxu0 %v5163_v1 }
 0x31f   :  { %v2109_v26 = vmax.f32 %v2108_v7, %v1891_v39  ;;  %1110 = vmatmul.f32.gmra.mxu1 %v5163_v1  ;;  %1223 = vmatmul.f32.gmra.mxu2 %v5163_v1 }
 0x320   :  { %v2130_v20 = vmax.f32 %v2129_v11, %v1892_v50  ;;  %1336 = vmatmul.f32.gmra.mxu3 %v5163_v1  ;;  %v5191_v11 = vpop.trf.xlu0 }
 0x321   :  { %6147 = vst [vmem:[#allocation39_spill] sm:$0xff] %v5191_v11 }
 0x322   :  { %v1176_v55 = vpop.f32.mrf.mxu2 }
 0x323   :  { %v1177_v53 = vadd.f32 %v1176_v55, %v5042_v51  ;;  %v1289_v8 = vpop.f32.mrf.mxu3  ;;  %v5182_v56 = vpop.f32.mrf.mxu0 }
 0x324   :  { %v1290_v28 = vadd.f32 %v1289_v8, %v5045_v59  ;;  %v5185_v29 = vpop.f32.mrf.mxu1 }
 0x325   :  { %v1899_v40 = vmax.f32 %v1177_v53, 0.0 }
 0x326   :  { %v1900_v2 = vmax.f32 %v1290_v28, 0.0  ;;  %1000 = vmatmul.f32.gmra.mxu0 %v5176_v47 }
 0x327   :  { %v2110_v6 = vmax.f32 %v2109_v26, %v1899_v40  ;;  %1113 = vmatmul.f32.gmra.mxu1 %v5176_v47  ;;  %1226 = vmatmul.f32.gmra.mxu2 %v5176_v47 }
 0x328   :  { %v2131_v7 = vmax.f32 %v2130_v20, %v1900_v2  ;;  %1339 = vmatmul.f32.gmra.mxu3 %v5176_v47  ;;  %v5203_v53 = vpop.trf.xlu0 }
 0x329   :  { %6148 = vst [vmem:[#allocation40_spill] sm:$0xff] %v5203_v53 }
 0x32a   :  { %v1179_v22 = vpop.f32.mrf.mxu2 }
 0x32b   :  { %v1180_v23 = vadd.f32 %v1179_v22, %v5042_v51  ;;  %v1292_v24 = vpop.f32.mrf.mxu3  ;;  %v5194_v46 = vpop.f32.mrf.mxu0 }
 0x32c   :  { %v1293_v39 = vadd.f32 %v1292_v24, %v5045_v59  ;;  %v5197_v50 = vpop.f32.mrf.mxu1 }
 0x32d   :  { %v1907_v54 = vmax.f32 %v1180_v23, 0.0 }
 0x32e   :  { %v1908_v32 = vmax.f32 %v1293_v39, 0.0  ;;  %1003 = vmatmul.f32.gmra.mxu0 %v5191_v11 }
 0x32f   :  { %v2111_v26 = vmax.f32 %v2110_v6, %v1907_v54  ;;  %1116 = vmatmul.f32.gmra.mxu1 %v5191_v11  ;;  %1229 = vmatmul.f32.gmra.mxu2 %v5191_v11 }
 0x330   :  { %v2132_v20 = vmax.f32 %v2131_v7, %v1908_v32  ;;  %1342 = vmatmul.f32.gmra.mxu3 %v5191_v11 }
 0x332   :  { %v1182_v55 = vpop.f32.mrf.mxu2 }
 0x333   :  { %v1183_v8 = vadd.f32 %v1182_v55, %v5042_v51  ;;  %v1295_v28 = vpop.f32.mrf.mxu3  ;;  %v5206_v40 = vpop.f32.mrf.mxu0 }
 0x334   :  { %v1296_v2 = vadd.f32 %v1295_v28, %v5045_v59  ;;  %v5209_v22 = vpop.f32.mrf.mxu1 }
 0x335   :  { %v1915_v6 = vmax.f32 %v1183_v8, 0.0 }
 0x336   :  { %v1916_v23 = vmax.f32 %v1296_v2, 0.0  ;;  %1006 = vmatmul.f32.gmra.mxu0 %v5203_v53 }
 0x337   :  { %v2112_v24 = vmax.f32 %v2111_v26, %v1915_v6  ;;  %1119 = vmatmul.f32.gmra.mxu1 %v5203_v53  ;;  %1232 = vmatmul.f32.gmra.mxu2 %v5203_v53 }
 0x338   :  { %v2133_v7 = vmax.f32 %v2132_v20, %v1916_v23  ;;  %1345 = vmatmul.f32.gmra.mxu3 %v5203_v53 }
 0x33a   :  { %v1185_v39 = vpop.f32.mrf.mxu2 }
 0x33b   :  { %v1186_v54 = vadd.f32 %v1185_v39, %v5042_v51  ;;  %v1298_v32 = vpop.f32.mrf.mxu3  ;;  %v5216_v55 = vpop.f32.mrf.mxu0 }
 0x33c   :  { %v1299_v28 = vadd.f32 %v1298_v32, %v5045_v59  ;;  %v5219_v8 = vpop.f32.mrf.mxu1 }
 0x33d   :  { %v1923_v2 = vmax.f32 %v1186_v54, 0.0 }
 0x33e   :  { %v1924_v11 = vmax.f32 %v1299_v28, 0.0  ;;  %4134 = vmatmul.lmr.bf16.vlgmr.msra.gmra.16.mxu0 }
 0x33f   :  { %v2113_v26 = vmax.f32 %v2112_v24, %v1923_v2  ;;  %4189 = vmatmul.lmr.bf16.vlgmr.msra.gmra.16.mxu1  ;;  %4244 = vmatmul.lmr.bf16.vlgmr.msra.gmra.16.mxu2 }
 0x340   :  { %v2134_v6 = vmax.f32 %v2133_v7, %v1924_v11  ;;  %4299 = vmatmul.lmr.bf16.vlgmr.msra.gmra.16.mxu3 }
 0x341   :  { %v2114_v20 = vrot.slane %v2113_v26, 4 }
 0x342   :  { %v2135_v23 = vrot.slane %v2134_v6, 4  ;;  %v1188_v53 = vpop.f32.mrf.mxu2 }
 0x343   :  { %v2115_v47 = vmax.f32 %v2113_v26, %v2114_v20  ;;  %v1301_v39 = vpop.f32.mrf.mxu3  ;;  %v5221_v1 = vpop.f32.mrf.mxu0  ;;  %v1189_v7 = vadd.f32 %v1188_v53, %v5042_v51 }
 0x344   :  { %v2136_v41 = vmax.f32 %v2134_v6, %v2135_v23  ;;  %v5223_v60 = vpop.f32.mrf.mxu1  ;;  %v1302_v2 = vadd.f32 %v1301_v39, %v5045_v59 }
 0x345   :  { %v2116_v32 = vrot.slane %v2115_v47, 2 }
 0x346   :  { %v2137_v38 = vrot.slane %v2136_v41, 2  ;;  %4135 = vmatmul.lmr.bf16.gmra.16.mxu0  ;;  %v1932_v21 = vmax.f32 %v1302_v2, 0.0 }
 0x347   :  { %v2117_v54 = vmax.f32 %v2115_v47, %v2116_v32  ;;  %4190 = vmatmul.lmr.bf16.gmra.16.mxu1  ;;  %4245 = vmatmul.lmr.bf16.gmra.16.mxu2 }
 0x348   :  { %v2138_v24 = vmax.f32 %v2136_v41, %v2137_v38  ;;  %4300 = vmatmul.lmr.bf16.gmra.16.mxu3  ;;  %v1931_v41 = vmax.f32 %v1189_v7, 0.0 }
 0x349   :  { %v2118_v11 = vrot.slane %v2117_v54, 1 }
 0x34a   :  { %v2139_v28 = vrot.slane %v2138_v24, 1  ;;  %v1191_v26 = vpop.f32.mrf.mxu2 }
 0x34b   :  { %v2119_v20 = vmax.f32 %v2117_v54, %v2118_v11  ;;  %v1192_v6 = vadd.f32 %v1191_v26, %v5042_v51  ;;  %v1304_v23 = vpop.f32.mrf.mxu3  ;;  %v5228_v18 = vpop.f32.mrf.mxu0 }
 0x34c   :  { %v2140_v63 = vmax.f32 %v2138_v24, %v2139_v28  ;;  %v1305_v47 = vadd.f32 %v1304_v23, %v5045_v59  ;;  %v5231_v32 = vpop.f32.mrf.mxu1 }
 0x34d   :  { %v2410_v38 = vrot.slane %v2119_v20, 4  ;;  %v1939_v44 = vmax.f32 %v1192_v6, 0.0 }
 0x34e   :  { %v2411_v53 = vrot.slane %v2140_v63, 2  ;;  %v1940_v48 = vmax.f32 %v1305_v47, 0.0  ;;  %4136 = vmatmul.lmr.bf16.gmra.16.mxu0 }
 0x34f   :  { %v2267_v39 = vmax.f32 %v1931_v41, %v1939_v44  ;;  %4191 = vmatmul.lmr.bf16.gmra.16.mxu1  ;;  %4246 = vmatmul.lmr.bf16.gmra.16.mxu2 }
 0x350   :  { %v5234_v54 = vsel %vm2423_vm3, %v2410_v38, %v2411_v53  ;;  %v2288_v11 = vmax.f32 %v1932_v21, %v1940_v48  ;;  %4301 = vmatmul.lmr.bf16.gmra.16.mxu3 }
 0x351   :  { %6149 = vst [vmem:[#allocation41_spill] sm:$0xff] %v5234_v54 }
 0x352   :  { %v1194_v24 = vpop.f32.mrf.mxu2 }
 0x353   :  { %v1195_v28 = vadd.f32 %v1194_v24, %v5042_v51  ;;  %v1307_v26 = vpop.f32.mrf.mxu3  ;;  %v5237_v20 = vpop.f32.mrf.mxu0 }
 0x354   :  { %v1308_v7 = vadd.f32 %v1307_v26, %v5045_v59  ;;  %v5240_v63 = vpop.f32.mrf.mxu1 }
 0x355   :  { %v1947_v2 = vmax.f32 %v1195_v28, 0.0 }
 0x356   :  { %v1948_v6 = vmax.f32 %v1308_v7, 0.0  ;;  %4137 = vmatmul.lmr.bf16.gmra.16.mxu0 }
 0x357   :  { %v2268_v44 = vmax.f32 %v2267_v39, %v1947_v2  ;;  %4192 = vmatmul.lmr.bf16.gmra.16.mxu1  ;;  %4247 = vmatmul.lmr.bf16.gmra.16.mxu2 }
 0x358   :  { %v2289_v23 = vmax.f32 %v2288_v11, %v1948_v6  ;;  %4302 = vmatmul.lmr.bf16.gmra.16.mxu3 }
 0x35a   :  { %v1197_v48 = vpop.f32.mrf.mxu2 }
 0x35b   :  { %v1198_v21 = vadd.f32 %v1197_v48, %v5042_v51  ;;  %v1310_v47 = vpop.f32.mrf.mxu3  ;;  %v5243_v38 = vpop.f32.mrf.mxu0 }
 0x35c   :  { %v1311_v41 = vadd.f32 %v1310_v47, %v5045_v59  ;;  %v5246_v53 = vpop.f32.mrf.mxu1 }
 0x35d   :  { %v1955_v24 = vmax.f32 %v1198_v21, 0.0 }
 0x35e   :  { %v1956_v26 = vmax.f32 %v1311_v41, 0.0  ;;  %4138 = vmatmul.lmr.bf16.gmra.16.mxu0 }
 0x35f   :  { %v2269_v28 = vmax.f32 %v2268_v44, %v1955_v24  ;;  %4193 = vmatmul.lmr.bf16.gmra.16.mxu1  ;;  %4248 = vmatmul.lmr.bf16.gmra.16.mxu2 }
 0x360   :  { %v2290_v39 = vmax.f32 %v2289_v23, %v1956_v26  ;;  %4303 = vmatmul.lmr.bf16.gmra.16.mxu3 }
 0x362   :  { %v1200_v11 = vpop.f32.mrf.mxu2 }
 0x363   :  { %v1201_v7 = vadd.f32 %v1200_v11, %v5042_v51  ;;  %v1313_v2 = vpop.f32.mrf.mxu3  ;;  %v5249_v6 = vpop.f32.mrf.mxu0  ;;  %v5267_v11 = vperm.slane %v5033_v36, 0 }
 0x364   :  { %v1314_v48 = vadd.f32 %v1313_v2, %v5045_v59  ;;  %v5252_v30 = vpop.f32.mrf.mxu1 }
 0x365   :  { %v1963_v47 = vmax.f32 %v1201_v7, 0.0  ;;  %v918_v7 = vadd.f32 %v5035_v42, %v5267_v11 }
 0x366   :  { %v1964_v54 = vmax.f32 %v1314_v48, 0.0  ;;  %4139 = vmatmul.lmr.bf16.gmra.16.mxu0 }
 0x367   :  { %v5254_v21 = vmax.f32 %v2269_v28, %v1963_v47  ;;  %4194 = vmatmul.lmr.bf16.gmra.16.mxu1  ;;  %4249 = vmatmul.lmr.bf16.gmra.16.mxu2  ;;  %v5270_v28 = vperm.slane %v5033_v36, 1  ;;  %v921_v36 = vadd.f32 %v5054_v10, %v5267_v11  ;;  %v1809_v14 = vmax.f32 %v918_v7, 0.0 }
 0x368   :  { %v5256_v44 = vmax.f32 %v2290_v39, %v1964_v54  ;;  %4304 = vmatmul.lmr.bf16.gmra.16.mxu3  ;;  %v915_v39 = vadd.f32 %v5025_v31, %v5267_v11 }
 0x369   :  { %6150 = vst [vmem:[#allocation42_spill] sm:$0xff] %v5254_v21  ;;  %v1031_v47 = vadd.f32 %v5037_v45, %v5270_v28  ;;  %v1028_v3 = vadd.f32 %v5027_v33, %v5270_v28  ;;  %v1034_v31 = vadd.f32 %v5057_v13, %v5270_v28  ;;  %v1037_v21 = vadd.f32 %v5069_v19, %v5270_v28 }
 0x36a   :  { %6151 = vst [vmem:[#allocation43_spill] sm:$0xff] %v5256_v44  ;;  %v5258_v23 = vpop.f32.mrf.mxu2  ;;  %v1801_v42 = vmax.f32 %v915_v39, 0.0  ;;  %v924_v44 = vadd.f32 %v5066_v43, %v5267_v11  ;;  %v1817_v10 = vmax.f32 %v921_v36, 0.0  ;;  %v927_v33 = vadd.f32 %v5078_v49, %v5267_v11 }
 0x36b   :  { %v5260_v41 = vpop.f32.mrf.mxu3  ;;  %v5262_v24 = vpop.f32.mrf.mxu0  ;;  %v1810_v45 = vmax.f32 %v1031_v47, 0.0  ;;  %v1040_v13 = vadd.f32 %v5081_v61, %v5270_v28  ;;  %v930_v47 = vadd.f32 %v5090_v34, %v5267_v11  ;;  %v1046_v34 = vadd.f32 %v5103_v17, %v5270_v28  ;;  %v2519_v17 = vld [vmem:[#allocation9 + $0x1e0] sm:$0xff] }
 0x36c   :  { %v5264_v26 = vpop.f32.mrf.mxu1  ;;  %v2057_v7 = vmax.f32 %v1801_v42, %v1809_v14  ;;  %v1825_v43 = vmax.f32 %v924_v44, 0.0  ;;  %v1833_v61 = vmax.f32 %v927_v33, 0.0  ;;  %v933_v14 = vadd.f32 %v5100_v15, %v5267_v11  ;;  %3132 = vmatpush.msra.mxu0 %v2519_v17 }
 0x36d   :  { %v1834_v42 = vmax.f32 %v1040_v13, 0.0  ;;  %v1850_v13 = vmax.f32 %v1046_v34, 0.0 }
 0x36e   :  { %4140 = vmatmul.lmr.bf16.gmra.16.mxu0 }
 0x36f   :  { %4195 = vmatmul.lmr.bf16.gmra.16.mxu1  ;;  %4250 = vmatmul.lmr.bf16.gmra.16.mxu2 }
 0x370   :  { %4305 = vmatmul.lmr.bf16.gmra.16.mxu3 }
 0x372   :  { %v5272_v54 = vpop.f32.mrf.mxu2 }
 0x373   :  { %6152 = vst [vmem:[#allocation44_spill] sm:$0xff] %v5272_v54  ;;  %v5278_v2 = vpop.f32.mrf.mxu3  ;;  %v5280_v48 = vpop.f32.mrf.mxu0  ;;  %v1826_v54 = vmax.f32 %v1037_v21, 0.0 }
 0x374   :  { %6153 = vst [vmem:[#allocation45_spill] sm:$0xff] %v5278_v2  ;;  %v5284_v57 = vpop.f32.mrf.mxu1 }
 0x375   :  { %6154 = vst [vmem:[#allocation46_spill] sm:$0xff] %v5280_v48  ;;  %v1818_v48 = vmax.f32 %v1034_v31, 0.0  ;;  %v2058_v31 = vmax.f32 %v2057_v7, %v1817_v10  ;;  %v939_v10 = vadd.f32 %v5124_v4, %v5267_v11  ;;  %v1052_v7 = vadd.f32 %v5127_v62, %v5270_v28 }
 0x376   :  { %6155 = vst [vmem:[#allocation47_spill] sm:$0xff] %v5284_v57  ;;  %4141 = vmatmul.lmr.bf16.gmra.16.mxu0  ;;  %v1802_v57 = vmax.f32 %v1028_v3, 0.0  ;;  %v1043_v3 = vadd.f32 %v5093_v37, %v5270_v28 }
 0x377   :  { %4196 = vmatmul.lmr.bf16.gmra.16.mxu1  ;;  %4251 = vmatmul.lmr.bf16.gmra.16.mxu2 }
 0x378   :  { %4306 = vmatmul.lmr.bf16.gmra.16.mxu3  ;;  %v2078_v36 = vmax.f32 %v1802_v57, %v1810_v45  ;;  %v936_v57 = vadd.f32 %v5112_v12, %v5267_v11  ;;  %v1842_v21 = vmax.f32 %v1043_v3, 0.0  ;;  %v1049_v45 = vadd.f32 %v5115_v5, %v5270_v28 }
 0x379   :  { %v942_v5 = vadd.f32 %v5136_v9, %v5267_v11  ;;  %v1055_v3 = vadd.f32 %v5139_v16, %v5270_v28  ;;  %v1058_v9 = vadd.f32 %v5151_v52, %v5270_v28  ;;  %v951_v52 = vadd.f32 %v5170_v25, %v5267_v11 }
 0x37a   :  { %v5300_v39 = vpop.f32.mrf.mxu2  ;;  %v2079_v44 = vmax.f32 %v2078_v36, %v1818_v48  ;;  %v1849_v48 = vmax.f32 %v933_v14, 0.0  ;;  %v1858_v4 = vmax.f32 %v1049_v45, 0.0  ;;  %v1067_v25 = vadd.f32 %v5185_v29, %v5270_v28 }
 0x37b   :  { %v5304_v2 = vpop.f32.mrf.mxu3  ;;  %v5306_v19 = vpop.f32.mrf.mxu0  ;;  %v1873_v34 = vmax.f32 %v942_v5, 0.0  ;;  %v1079_v29 = vadd.f32 %v5223_v60, %v5270_v28 }
 0x37c   :  { %6156 = vst [vmem:[#allocation48_spill] sm:$0xff] %v5304_v2  ;;  %v5310_v49 = vpop.f32.mrf.mxu1  ;;  %v2059_v2 = vmax.f32 %v2058_v31, %v1825_v43  ;;  %v2080_v37 = vmax.f32 %v2079_v44, %v1826_v54  ;;  %v1857_v43 = vmax.f32 %v936_v57, 0.0  ;;  %v1866_v44 = vmax.f32 %v1052_v7, 0.0 }
 0x37d   :  { %6157 = vst [vmem:[#allocation49_spill] sm:$0xff] %v5306_v19  ;;  %v1841_v19 = vmax.f32 %v930_v47, 0.0  ;;  %v948_v57 = vadd.f32 %v5158_v35, %v5267_v11  ;;  %v1064_v35 = vadd.f32 %v5173_v27, %v5270_v28  ;;  %v1897_v27 = vmax.f32 %v951_v52, 0.0 }
 0x37e   :  { %4142 = vmatmul.lmr.bf16.gmra.16.mxu0  ;;  %v2060_v15 = vmax.f32 %v2059_v2, %v1833_v61  ;;  %v2081_v33 = vmax.f32 %v2080_v37, %v1834_v42  ;;  %v1865_v61 = vmax.f32 %v939_v10, 0.0  ;;  %v1874_v37 = vmax.f32 %v1055_v3, 0.0 }
 0x37f   :  { %4197 = vmatmul.lmr.bf16.gmra.16.mxu1  ;;  %4252 = vmatmul.lmr.bf16.gmra.16.mxu2  ;;  %v1882_v10 = vmax.f32 %v1058_v9, 0.0  ;;  %v957_v9 = vadd.f32 %v5194_v46, %v5267_v11  ;;  %v1082_v46 = vadd.f32 %v5231_v32, %v5270_v28  ;;  %v1085_v32 = vadd.f32 %v5240_v63, %v5270_v28 }
 0x380   :  { %4307 = vmatmul.lmr.bf16.gmra.16.mxu3  ;;  %v2061_v54 = vmax.f32 %v2060_v15, %v1841_v19  ;;  %v2082_v36 = vmax.f32 %v2081_v33, %v1842_v21  ;;  %v945_v19 = vadd.f32 %v5148_v58, %v5267_v11  ;;  %v1061_v21 = vadd.f32 %v5161_v0, %v5270_v28  ;;  %v2583_v58 = vld [vmem:[#allocation9 + $0x3e0] sm:$0xff] }
 0x381   :  { %3152 = vmatpush.msra.mxu1 %v2583_v58  ;;  %v954_v0 = vadd.f32 %v5182_v56, %v5267_v11  ;;  %v966_v56 = vadd.f32 %v5221_v1, %v5267_v11  ;;  %v969_v1 = vadd.f32 %v5228_v18, %v5267_v11 }
 0x382   :  { %v5324_v12 = vpop.f32.mrf.mxu2  ;;  %v2062_v62 = vmax.f32 %v2061_v54, %v1849_v48  ;;  %v2083_v14 = vmax.f32 %v2082_v36, %v1850_v13  ;;  %v1881_v15 = vmax.f32 %v945_v19, 0.0  ;;  %v1889_v13 = vmax.f32 %v948_v57, 0.0 }
 0x383   :  { %v5328_v47 = vpop.f32.mrf.mxu3  ;;  %v5330_v2 = vpop.f32.mrf.mxu0  ;;  %v1890_v5 = vmax.f32 %v1061_v21, 0.0  ;;  %v1905_v19 = vmax.f32 %v954_v0, 0.0  ;;  %v963_v57 = vadd.f32 %v5216_v55, %v5267_v11  ;;  %v1076_v21 = vadd.f32 %v5219_v8, %v5270_v28 }
 0x384   :  { %v5334_v31 = vpop.f32.mrf.mxu1  ;;  %v2063_v42 = vmax.f32 %v2062_v62, %v1857_v43  ;;  %v2084_v16 = vmax.f32 %v2083_v14, %v1858_v4  ;;  %v1898_v62 = vmax.f32 %v1064_v35, 0.0  ;;  %v972_v55 = vadd.f32 %v5237_v20, %v5267_v11 }
 0x385   :  { %v1913_v8 = vmax.f32 %v957_v9, 0.0  ;;  %v5394_v20 = vadd.f32 %v5206_v40, %v5267_v11  ;;  %v1930_v0 = vmax.f32 %v1076_v21, 0.0  ;;  %v1091_v40 = vadd.f32 %v5252_v30, %v5270_v28 }
 0x386   :  { %4143 = vmatmul.lmr.bf16.gmra.16.mxu0  ;;  %v2064_v45 = vmax.f32 %v2063_v42, %v1865_v61  ;;  %v2085_v48 = vmax.f32 %v2084_v16, %v1866_v44  ;;  %v1906_v44 = vmax.f32 %v1067_v25, 0.0  ;;  %v2515_v16 = vld [vmem:[#allocation9 + $0x1c0] sm:$0xff] }
 0x387   :  { %4198 = vmatmul.lmr.bf16.gmra.16.mxu1  ;;  %4253 = vmatmul.lmr.bf16.gmra.16.mxu2  ;;  %v1970_v21 = vmax.f32 %v1091_v40, 0.0  ;;  %v6164_v40 = vld [vmem:[#allocation42_spill] sm:$0xff] }
 0x388   :  { %4308 = vmatmul.lmr.bf16.gmra.16.mxu3  ;;  %v2065_v33 = vmax.f32 %v2064_v45, %v1873_v34  ;;  %v2086_v43 = vmax.f32 %v2085_v48, %v1874_v37  ;;  %v1070_v34 = vadd.f32 %v5197_v50, %v5270_v28  ;;  %3133 = vmatpush.msra.mxu0 %v2515_v16  ;;  %v1073_v50 = vadd.f32 %v5209_v22, %v5270_v28 }
 0x389   :  { %v1937_v45 = vmax.f32 %v966_v56, 0.0  ;;  %v1938_v48 = vmax.f32 %v1079_v29, 0.0  ;;  %v975_v22 = vadd.f32 %v5243_v38, %v5267_v11  ;;  %v1317_v29 = vadd.f32 %v5260_v41, %v5045_v59  ;;  %v6158_v41 = vld [vmem:[#allocation44_spill] sm:$0xff] }
 0x38a   :  { %v5348_v17 = vpop.f32.mrf.mxu2  ;;  %v2066_v4 = vmax.f32 %v2065_v33, %v1881_v15  ;;  %v2087_v3 = vmax.f32 %v2086_v43, %v1882_v10  ;;  %v1914_v35 = vmax.f32 %v1070_v34, 0.0  ;;  %v1929_v33 = vmax.f32 %v963_v57, 0.0 }
 0x38b   :  { %v5352_v7 = vpop.f32.mrf.mxu3  ;;  %v5354_v54 = vpop.f32.mrf.mxu0  ;;  %v1946_v43 = vmax.f32 %v1082_v46, 0.0  ;;  %v1922_v25 = vmax.f32 %v1073_v50, 0.0  ;;  %v2246_v38 = vmax.f32 %v1930_v0, %v1938_v48  ;;  %v1961_v56 = vmax.f32 %v975_v22, 0.0 }
 0x38c   :  { %v5358_v36 = vpop.f32.mrf.mxu1  ;;  %v2067_v61 = vmax.f32 %v2066_v4, %v1889_v13  ;;  %v2088_v14 = vmax.f32 %v2087_v3, %v1890_v5  ;;  %v1945_v13 = vmax.f32 %v969_v1, 0.0  ;;  %v1088_v5 = vadd.f32 %v5246_v53, %v5270_v28 }
 0x38d   :  { %v2225_v63 = vmax.f32 %v1929_v33, %v1937_v45  ;;  %v1953_v4 = vmax.f32 %v972_v55, 0.0  ;;  %v981_v1 = vadd.f32 %v5262_v24, %v5267_v11  ;;  %v1094_v46 = vadd.f32 %v5264_v26, %v5270_v28  ;;  %v6160_v24 = vld [vmem:[#allocation46_spill] sm:$0xff]  ;;  %v6161_v33 = vld [vmem:[#allocation47_spill] sm:$0xff] }
 0x38e   :  { %4144 = vmatmul.lmr.bf16.gmra.16.mxu0  ;;  %v2068_v42 = vmax.f32 %v2067_v61, %v1897_v27  ;;  %v2089_v37 = vmax.f32 %v2088_v14, %v1898_v62  ;;  %v978_v27 = vadd.f32 %v5249_v6, %v5267_v11  ;;  %v1954_v62 = vmax.f32 %v1085_v32, 0.0  ;;  %v2579_v61 = vld [vmem:[#allocation9 + $0x3c0] sm:$0xff] }
 0x38f   :  { %4199 = vmatmul.lmr.bf16.gmra.16.mxu1  ;;  %4254 = vmatmul.lmr.bf16.gmra.16.mxu2  ;;  %v2226_v53 = vmax.f32 %v2225_v63, %v1945_v13  ;;  %v1204_v14 = vadd.f32 %v5258_v23, %v5042_v51  ;;  %v1921_v6 = vmax.f32 %v5394_v20, 0.0  ;;  %v1962_v9 = vmax.f32 %v1088_v5, 0.0  ;;  %v6162_v5 = vld [vmem:[#allocation48_spill] sm:$0xff] }
 0x390   :  { %4309 = vmatmul.lmr.bf16.gmra.16.mxu3  ;;  %v2069_v58 = vmax.f32 %v2068_v42, %v1905_v19  ;;  %v2090_v52 = vmax.f32 %v2089_v37, %v1906_v44  ;;  %3153 = vmatpush.msra.mxu1 %v2579_v61  ;;  %v2247_v44 = vmax.f32 %v2246_v38, %v1946_v43  ;;  %v1969_v57 = vmax.f32 %v978_v27, 0.0  ;;  %v6163_v38 = vld [vmem:[#allocation49_spill] sm:$0xff] }
 0x391   :  { %v2227_v30 = vmax.f32 %v2226_v53, %v1953_v4  ;;  %v1971_v55 = vmax.f32 %v1204_v14, 0.0  ;;  %v984_v48 = vadd.f32 %v6160_v24, %v5267_v11  ;;  %v1097_v13 = vadd.f32 %v6161_v33, %v5270_v28 }
 0x392   :  { %v5376_v60 = vpop.f32.mrf.mxu2  ;;  %v5400_v3 = vmax.f32 %v2069_v58, %v1913_v8  ;;  %v2091_v19 = vmax.f32 %v2090_v52, %v1914_v35  ;;  %v2248_v37 = vmax.f32 %v2247_v44, %v1954_v62  ;;  %v1207_v58 = vadd.f32 %v6158_v41, %v5042_v51  ;;  %v6159_v52 = vld [vmem:[#allocation45_spill] sm:$0xff] }
 0x393   :  { %v5382_v18 = vpop.f32.mrf.mxu3  ;;  %v5384_v15 = vpop.f32.mrf.mxu0  ;;  %v2228_v45 = vmax.f32 %v2227_v30, %v1961_v56  ;;  %v1320_v8 = vadd.f32 %v6159_v52, %v5045_v59  ;;  %v1972_v35 = vmax.f32 %v1317_v29, 0.0  ;;  %v1210_v26 = vadd.f32 %v5300_v39, %v5042_v51  ;;  %v6165_v56 = vld [vmem:[#allocation43_spill] sm:$0xff] }
 0x394   :  { %v5388_v10 = vpop.f32.mrf.mxu1  ;;  %v5411_v34 = vmax.f32 %v2091_v19, %v1922_v25  ;;  %v2249_v32 = vmax.f32 %v2248_v37, %v1962_v9  ;;  %v1977_v43 = vmax.f32 %v981_v1, 0.0  ;;  %v1323_v25 = vadd.f32 %v6162_v5, %v5045_v59 }
 0x395   :  { %v2229_v0 = vmax.f32 %v2228_v45, %v1969_v57  ;;  %v1978_v4 = vmax.f32 %v1094_v46, 0.0  ;;  %v1979_v27 = vmax.f32 %v1207_v58, 0.0  ;;  %v987_v62 = vadd.f32 %v6163_v38, %v5267_v11 }
 0x396   :  { %4145 = vmatmul.lmr.bf16.gmra.16.mxu0  ;;  %v2093_v22 = vrot.slane %v5411_v34, 4  ;;  %v2250_v63 = vmax.f32 %v2249_v32, %v1970_v21  ;;  %v2271_v61 = vmax.f32 %v6164_v40, %v1971_v55  ;;  %v1980_v39 = vmax.f32 %v1320_v8, 0.0 }
 0x397   :  { %4200 = vmatmul.lmr.bf16.gmra.16.mxu1  ;;  %4255 = vmatmul.lmr.bf16.gmra.16.mxu2  ;;  %v1985_v19 = vmax.f32 %v984_v48, 0.0  ;;  %v1100_v53 = vadd.f32 %v5310_v49, %v5270_v28  ;;  %v2292_v14 = vmax.f32 %v6165_v56, %v1972_v35  ;;  %v1986_v44 = vmax.f32 %v1097_v13, 0.0 }
 0x398   :  { %4310 = vmatmul.lmr.bf16.gmra.16.mxu3  ;;  %v1987_v9 = vmax.f32 %v1210_v26, 0.0  ;;  %v1213_v29 = vadd.f32 %v5324_v12, %v5042_v51  ;;  %v2230_v57 = vmax.f32 %v2229_v0, %v1977_v43  ;;  %v1988_v1 = vmax.f32 %v1323_v25, 0.0 }
 0x399   :  { %v1326_v37 = vadd.f32 %v5328_v47, %v5045_v59  ;;  %v990_v21 = vadd.f32 %v5330_v2, %v5267_v11  ;;  %v2251_v41 = vmax.f32 %v2250_v63, %v1978_v4  ;;  %v2272_v58 = vmax.f32 %v2271_v61, %v1979_v27 }
 0x39a   :  { %v5409_v42 = vpop.f32.mrf.mxu2  ;;  %v1993_v45 = vmax.f32 %v987_v62, 0.0  ;;  %v1103_v55 = vadd.f32 %v5334_v31, %v5270_v28  ;;  %v2293_v52 = vmax.f32 %v2292_v14, %v1980_v39  ;;  %v2231_v8 = vmax.f32 %v2230_v57, %v1985_v19 }
 0x39b   :  { %v5415_v16 = vpop.f32.mrf.mxu3  ;;  %v5417_v23 = vpop.f32.mrf.mxu0  ;;  %v1994_v24 = vmax.f32 %v1100_v53, 0.0  ;;  %v1216_v48 = vadd.f32 %v5348_v17, %v5042_v51  ;;  %v2252_v47 = vmax.f32 %v2251_v41, %v1986_v44  ;;  %v2273_v32 = vmax.f32 %v2272_v58, %v1987_v9 }
 0x39c   :  { %v5423_v50 = vpop.f32.mrf.mxu1  ;;  %v1995_v35 = vmax.f32 %v1213_v29, 0.0  ;;  %v993_v2 = vadd.f32 %v5354_v54, %v5267_v11  ;;  %v2294_v33 = vmax.f32 %v2293_v52, %v1988_v1  ;;  %v1996_v13 = vmax.f32 %v1326_v37, 0.0 }
 0x39d   :  { %v2001_v26 = vmax.f32 %v990_v21, 0.0  ;;  %v1106_v31 = vadd.f32 %v5358_v36, %v5270_v28  ;;  %v2232_v0 = vmax.f32 %v2231_v8, %v1993_v45  ;;  %v2002_v43 = vmax.f32 %v1103_v55, 0.0 }
 0x39e   :  { %4146 = vmatmul.lmr.bf16.gmra.16.mxu0  ;;  %v1329_v17 = vadd.f32 %v5352_v7, %v5045_v59  ;;  %v996_v5 = vadd.f32 %v5384_v15, %v5267_v11  ;;  %v2253_v25 = vmax.f32 %v2252_v47, %v1994_v24  ;;  %v2003_v54 = vmax.f32 %v1216_v48, 0.0 }
 0x39f   :  { %4201 = vmatmul.lmr.bf16.gmra.16.mxu1  ;;  %4256 = vmatmul.lmr.bf16.gmra.16.mxu2  ;;  %v1219_v63 = vadd.f32 %v5376_v60, %v5042_v51  ;;  %v1109_v4 = vadd.f32 %v5388_v10, %v5270_v28  ;;  %v2274_v36 = vmax.f32 %v2273_v32, %v1995_v35  ;;  %v2009_v27 = vmax.f32 %v993_v2, 0.0 }
 0x3a0   :  { %4311 = vmatmul.lmr.bf16.gmra.16.mxu3  ;;  %v1332_v38 = vadd.f32 %v5382_v18, %v5045_v59  ;;  %v999_v7 = vadd.f32 %v5417_v23, %v5267_v11  ;;  %v2295_v40 = vmax.f32 %v2294_v33, %v1996_v13  ;;  %v2233_v15 = vmax.f32 %v2232_v0, %v2001_v26 }
 0x3a1   :  { %v2010_v61 = vmax.f32 %v1106_v31, 0.0  ;;  %v1112_v39 = vadd.f32 %v5423_v50, %v5270_v28  ;;  %v2254_v53 = vmax.f32 %v2253_v25, %v2002_v43  ;;  %v2004_v56 = vmax.f32 %v1329_v17, 0.0 }
 0x3a2   :  { %v5444_v30 = vpop.f32.mrf.mxu2  ;;  %v2017_v10 = vmax.f32 %v996_v5, 0.0  ;;  %v2275_v9 = vmax.f32 %v2274_v36, %v2003_v54  ;;  %v2011_v18 = vmax.f32 %v1219_v63, 0.0  ;;  %v2018_v29 = vmax.f32 %v1109_v4, 0.0 }
 0x3a3   :  { %v5450_v46 = vpop.f32.mrf.mxu3  ;;  %v1001_v49 = vpop.f32.mrf.mxu0  ;;  %v2234_v57 = vmax.f32 %v2233_v15, %v2009_v27  ;;  %v2012_v1 = vmax.f32 %v1332_v38, 0.0  ;;  %v2025_v37 = vmax.f32 %v999_v7, 0.0  ;;  %v2255_v50 = vmax.f32 %v2254_v53, %v2010_v61 }
 0x3a4   :  { %v1114_v12 = vpop.f32.mrf.mxu1  ;;  %v1002_v14 = vadd.f32 %v1001_v49, %v5267_v11  ;;  %v1222_v41 = vadd.f32 %v5409_v42, %v5042_v51  ;;  %v2026_v58 = vmax.f32 %v1112_v39, 0.0  ;;  %v2296_v49 = vmax.f32 %v2295_v40, %v2004_v56  ;;  %v2575_v56 = vld [vmem:[#allocation9 + $0x3a0] sm:$0xff] }
 0x3a5   :  { %v1115_v23 = vadd.f32 %v1114_v12, %v5270_v28  ;;  %v2235_v55 = vmax.f32 %v2234_v57, %v2017_v10  ;;  %v1335_v12 = vadd.f32 %v5415_v16, %v5045_v59  ;;  %v2276_v8 = vmax.f32 %v2275_v9, %v2011_v18  ;;  %v2507_v10 = vld [vmem:[#allocation9 + $0x180] sm:$0xff]  ;;  %3154 = vmatpush.msra.mxu1 %v2575_v56 }
 0x3a6   :  { %4147 = vmatmul.lmr.bf16.gmra.16.mxu0  ;;  %v2033_v52 = vmax.f32 %v1002_v14, 0.0  ;;  %v2256_v24 = vmax.f32 %v2255_v50, %v2018_v29  ;;  %v1225_v48 = vadd.f32 %v5444_v30, %v5042_v51  ;;  %v2297_v32 = vmax.f32 %v2296_v49, %v2012_v1  ;;  %v2571_v18 = vld [vmem:[#allocation9 + $0x380] sm:$0xff] }
 0x3a7   :  { %4202 = vmatmul.lmr.bf16.gmra.16.mxu1  ;;  %4257 = vmatmul.lmr.bf16.gmra.16.mxu2  ;;  %v2034_v47 = vmax.f32 %v1115_v23, 0.0  ;;  %v2236_v42 = vmax.f32 %v2235_v55, %v2025_v37  ;;  %v1338_v35 = vadd.f32 %v5450_v46, %v5045_v59  ;;  %v2019_v13 = vmax.f32 %v1222_v41, 0.0 }
 0x3a8   :  { %4312 = vmatmul.lmr.bf16.gmra.16.mxu3  ;;  %v2257_v26 = vmax.f32 %v2256_v24, %v2026_v58  ;;  %v2020_v17 = vmax.f32 %v1335_v12, 0.0  ;;  %v2027_v63 = vmax.f32 %v1225_v48, 0.0  ;;  %v2094_v29 = vmax.f32 %v5411_v34, %v2093_v22  ;;  %3155 = vmatpush.msra.mxu1 %v2571_v18 }
 0x3a9   :  { %v2237_v5 = vmax.f32 %v2236_v42, %v2033_v52  ;;  %v2028_v27 = vmax.f32 %v1338_v35, 0.0  ;;  %v2277_v40 = vmax.f32 %v2276_v8, %v2019_v13  ;;  %v2903_v13 = vld [vmem:[#allocation9 + $0xde0] sm:$0xff] }
 0x3aa   :  { %v1227_v62 = vpop.f32.mrf.mxu2  ;;  %v2258_v4 = vmax.f32 %v2257_v26, %v2034_v47  ;;  %v2095_v52 = vrot.slane %v2094_v29, 2  ;;  %v2503_v26 = vld [vmem:[#allocation9 + $0x160] sm:$0xff]  ;;  %3252 = vmatpush.msra.mxu2 %v2903_v13  ;;  %v6169_v13 = vld [vmem:[#allocation41_spill] sm:$0xff] }
 0x3ab   :  { %v1340_v19 = vpop.f32.mrf.mxu3  ;;  %v1004_v60 = vpop.f32.mrf.mxu0  ;;  %v1228_v31 = vadd.f32 %v1227_v62, %v5042_v51  ;;  %v2278_v14 = vmax.f32 %v2277_v40, %v2027_v63 }
 0x3ac   :  { %v1117_v44 = vpop.f32.mrf.mxu1  ;;  %v1005_v21 = vadd.f32 %v1004_v60, %v5267_v11  ;;  %v1341_v25 = vadd.f32 %v1340_v19, %v5045_v59  ;;  %v2298_v19 = vmax.f32 %v2297_v32, %v2020_v17 }
 0x3ad   :  { %v1118_v45 = vadd.f32 %v1117_v44, %v5270_v28  ;;  %v2035_v15 = vmax.f32 %v1228_v31, 0.0  ;;  %v2967_v31 = vld [vmem:[#allocation9 + $0xfe0] sm:$0xff] }
 0x3ae   :  { %4148 = vmatmul.lmr.bf16.gmra.16.mxu0  ;;  %v2041_v2 = vmax.f32 %v1005_v21, 0.0  ;;  %v2036_v60 = vmax.f32 %v1341_v25, 0.0  ;;  %v2299_v20 = vmax.f32 %v2298_v19, %v2028_v27  ;;  %3272 = vmatpush.msra.mxu3 %v2967_v31 }
 0x3af   :  { %4203 = vmatmul.lmr.bf16.gmra.16.mxu1  ;;  %4258 = vmatmul.lmr.bf16.gmra.16.mxu2  ;;  %v2042_v16 = vmax.f32 %v1118_v45, 0.0  ;;  %v2279_v57 = vmax.f32 %v2278_v14, %v2035_v15 }
 0x3b0   :  { %4313 = vmatmul.lmr.bf16.gmra.16.mxu3  ;;  %v2238_v38 = vmax.f32 %v2237_v5, %v2041_v2  ;;  %v2300_v58 = vmax.f32 %v2299_v20, %v2036_v60 }
 0x3b1   :  { %v2259_v61 = vmax.f32 %v2258_v4, %v2042_v16  ;;  %v2096_v16 = vmax.f32 %v2094_v29, %v2095_v52  ;;  %v6168_v52 = vld [vmem:[#allocation27_spill] sm:$0xff] }
 0x3b2   :  { %v1230_v33 = vpop.f32.mrf.mxu2 }
 0x3b3   :  { %v1343_v0 = vpop.f32.mrf.mxu3  ;;  %v1007_v43 = vpop.f32.mrf.mxu0  ;;  %v1231_v46 = vadd.f32 %v1230_v33, %v5042_v51 }
 0x3b4   :  { %v1008_v30 = vadd.f32 %v1007_v43, %v5267_v11  ;;  %v1120_v54 = vpop.f32.mrf.mxu1  ;;  %v1344_v7 = vadd.f32 %v1343_v0, %v5045_v59  ;;  %v2071_v11 = vmax.f32 %v5400_v3, %v1921_v6 }
 0x3b5   :  { %v1121_v36 = vadd.f32 %v1120_v54, %v5270_v28  ;;  %v2511_v28 = vld [vmem:[#allocation9 + $0x1a0] sm:$0xff]  ;;  %v2043_v44 = vmax.f32 %v1231_v46, 0.0 }
 0x3b6   :  { %v2049_v62 = vmax.f32 %v1008_v30, 0.0  ;;  %4149 = vmatmul.lmr.bf16.gmra.16.mxu0  ;;  %v2044_v23 = vmax.f32 %v1344_v7, 0.0  ;;  %v2072_v41 = vrot.slane %v2071_v11, 4 }
 0x3b7   :  { %v2050_v39 = vmax.f32 %v1121_v36, 0.0  ;;  %4204 = vmatmul.lmr.bf16.gmra.16.mxu1  ;;  %4259 = vmatmul.lmr.bf16.gmra.16.mxu2  ;;  %v2280_v34 = vmax.f32 %v2279_v57, %v2043_v44 }
 0x3b8   :  { %v2239_v53 = vmax.f32 %v2238_v38, %v2049_v62  ;;  %4314 = vmatmul.lmr.bf16.gmra.16.mxu3  ;;  %3134 = vmatpush.msra.mxu0 %v2511_v28  ;;  %v2301_v8 = vmax.f32 %v2300_v58, %v2044_v23  ;;  %v2073_v42 = vmax.f32 %v2071_v11, %v2072_v41  ;;  %v5512_v38 = vld [vmem:[#allocation8] sm:$0xff]  ;;  %v2097_v62 = vrot.slane %v2096_v16, 1  ;;  %v2567_v28 = vld [vmem:[#allocation9 + $0x360] sm:$0xff] }
 0x3b9   :  { %v2260_v9 = vmax.f32 %v2259_v61, %v2050_v39  ;;  %v5515_v7 = vperm.slane %v5512_v38, 6  ;;  %v5518_v15 = vperm.slane %v5512_v38, 7  ;;  %v6167_v61 = vld [vmem:[#allocation26_spill] sm:$0xff]  ;;  %3156 = vmatpush.msra.mxu1 %v2567_v28 }
 0x3ba   :  { %v2240_v3 = vrot.slane %v2239_v53, 4  ;;  %v1233_v6 = vpop.f32.mrf.mxu2  ;;  %3135 = vmatpush.msra.mxu0 %v2507_v10  ;;  %v2074_v63 = vrot.slane %v2073_v42, 2  ;;  %v2098_v44 = vmax.f32 %v2096_v16, %v2097_v62 }
 0x3bb   :  { %v2261_v1 = vrot.slane %v2260_v9, 4  ;;  %v1234_v37 = vadd.f32 %v1233_v6, %v5042_v51  ;;  %v1346_v21 = vpop.f32.mrf.mxu3  ;;  %v5499_v50 = vpop.f32.mrf.mxu0  ;;  %v6166_v51 = vld [vmem:[#allocation25_spill] sm:$0xff] }
 0x3bc   :  { %v2241_v45 = vmax.f32 %v2239_v53, %v2240_v3  ;;  %v1347_v49 = vadd.f32 %v1346_v21, %v5045_v59  ;;  %v5502_v55 = vpop.f32.mrf.mxu1  ;;  %3136 = vmatpush.msra.mxu0 %v2503_v26  ;;  %v2075_v60 = vmax.f32 %v2073_v42, %v2074_v63  ;;  %v2499_v42 = vld [vmem:[#allocation9 + $0x140] sm:$0xff] }
 0x3bd   :  { %v2262_v22 = vmax.f32 %v2260_v9, %v2261_v1  ;;  %v2051_v12 = vmax.f32 %v1234_v37, 0.0 }
 0x3be   :  { %v2242_v24 = vrot.slane %v2241_v45, 2  ;;  %v2052_v48 = vmax.f32 %v1347_v49, 0.0  ;;  %1413 = vmatmul.f32.gmra.mxu0 %v6166_v51  ;;  %v2076_v57 = vrot.slane %v2075_v60, 1  ;;  %v2409_v49 = vrot.slane %v2098_v44, 6 }
 0x3bf   :  { %v2263_v47 = vrot.slane %v2262_v22, 2  ;;  %v2281_v32 = vmax.f32 %v2280_v34, %v2051_v12  ;;  %1526 = vmatmul.f32.gmra.mxu1 %v6166_v51  ;;  %1639 = vmatmul.f32.gmra.mxu2 %v6166_v51 }
 0x3c0   :  { %v2243_v35 = vmax.f32 %v2241_v45, %v2242_v24  ;;  %v2302_v59 = vmax.f32 %v2301_v8, %v2052_v48  ;;  %1752 = vmatmul.f32.gmra.mxu3 %v6166_v51  ;;  %v2077_v24 = vmax.f32 %v2075_v60, %v2076_v57  ;;  %3137 = vmatpush.msra.mxu0 %v2499_v42 }
 0x3c1   :  { %v2264_v2 = vmax.f32 %v2262_v22, %v2263_v47  ;;  %v2282_v33 = vrot.slane %v2281_v32, 4 }
 0x3c2   :  { %v2303_v0 = vrot.slane %v2302_v59, 4  ;;  %v1592_v43 = vpop.f32.mrf.mxu2  ;;  %v2244_v17 = vrot.slane %v2243_v35, 1 }
 0x3c3   :  { %v2265_v5 = vrot.slane %v2264_v2, 1  ;;  %v2283_v25 = vmax.f32 %v2281_v32, %v2282_v33  ;;  %v1705_v30 = vpop.f32.mrf.mxu3  ;;  %v5508_v54 = vpop.f32.mrf.mxu0  ;;  %v1593_v14 = vadd.f32 %v1592_v43, %v5515_v7  ;;  %v2899_v32 = vld [vmem:[#allocation9 + $0xdc0] sm:$0xff] }
 0x3c4   :  { %v2304_v4 = vmax.f32 %v2302_v59, %v2303_v0  ;;  %v5510_v46 = vpop.f32.mrf.mxu1  ;;  %v2245_v39 = vmax.f32 %v2243_v35, %v2244_v17  ;;  %v1706_v18 = vadd.f32 %v1705_v30, %v5518_v15  ;;  %v2963_v35 = vld [vmem:[#allocation9 + $0xfc0] sm:$0xff]  ;;  %v2422_v59 = vsel %vm2421_vm4, %v2077_v24, %v2409_v49  ;;  %3253 = vmatpush.msra.mxu2 %v2899_v32  ;;  %v6172_v49 = vld [vmem:[#allocation30_spill] sm:$0xff] }
 0x3c5   :  { %v2266_v36 = vmax.f32 %v2264_v2, %v2265_v5  ;;  %v2284_v27 = vrot.slane %v2283_v25, 2  ;;  %v1807_v58 = vmax.f32 %v1593_v14, 0.0  ;;  %v2425_v26 = vsel %vm261_vm0, %v2422_v59, %v6169_v13  ;;  %3273 = vmatpush.msra.mxu3 %v2963_v35  ;;  %v6171_v14 = vld [vmem:[#allocation29_spill] sm:$0xff]  ;;  %v6173_v35 = vld [vmem:[#allocation31_spill] sm:$0xff] }
 0x3c6   :  { %v2305_v40 = vrot.slane %v2304_v4, 2  ;;  %1416 = vmatmul.f32.gmra.mxu0 %v6167_v61  ;;  %v1808_v22 = vmax.f32 %v1706_v18, 0.0  ;;  %v2895_v18 = vld [vmem:[#allocation9 + $0xda0] sm:$0xff] }
 0x3c7   :  { %v2415_v11 = vrot.slane %v2266_v36, 6  ;;  %v2285_v19 = vmax.f32 %v2283_v25, %v2284_v27  ;;  %1529 = vmatmul.f32.gmra.mxu1 %v6167_v61  ;;  %1642 = vmatmul.f32.gmra.mxu2 %v6167_v61  ;;  %v6170_v36 = vld [vmem:[#allocation28_spill] sm:$0xff] }
 0x3c8   :  { %v2306_v53 = vmax.f32 %v2304_v4, %v2305_v40  ;;  %1755 = vmatmul.f32.gmra.mxu3 %v6167_v61  ;;  %v2563_v61 = vld [vmem:[#allocation9 + $0x340] sm:$0xff]  ;;  %3254 = vmatpush.msra.mxu2 %v2895_v18 }
 0x3c9   :  { %v2429_v56 = vsel %vm2421_vm4, %v2245_v39, %v2415_v11  ;;  %v2286_v10 = vrot.slane %v2285_v19, 1  ;;  %3157 = vmatpush.msra.mxu1 %v2563_v61  ;;  %v2491_v13 = vld [vmem:[#allocation9 + $0x100] sm:$0xff] }
 0x3ca   :  { %v2307_v9 = vrot.slane %v2306_v53, 1  ;;  %v1595_v29 = vpop.f32.mrf.mxu2 }
 0x3cb   :  { %v2287_v20 = vmax.f32 %v2285_v19, %v2286_v10  ;;  %v1596_v23 = vadd.f32 %v1595_v29, %v5515_v7  ;;  %v1708_v3 = vpop.f32.mrf.mxu3  ;;  %v5528_v6 = vpop.f32.mrf.mxu0  ;;  %v2495_v29 = vld [vmem:[#allocation9 + $0x120] sm:$0xff] }
 0x3cc   :  { %v2308_v1 = vmax.f32 %v2306_v53, %v2307_v9  ;;  %v1709_v37 = vadd.f32 %v1708_v3, %v5518_v15  ;;  %v5531_v21 = vpop.f32.mrf.mxu1  ;;  %3138 = vmatpush.msra.mxu0 %v2495_v29  ;;  %v2887_v29 = vld [vmem:[#allocation9 + $0xd60] sm:$0xff] }
 0x3cd   :  { %v2416_v41 = vrot.slane %v2287_v20, 4  ;;  %v1815_v45 = vmax.f32 %v1596_v23, 0.0  ;;  %v2959_v20 = vld [vmem:[#allocation9 + $0xfa0] sm:$0xff] }
 0x3ce   :  { %v2417_v34 = vrot.slane %v2308_v1, 2  ;;  %v1816_v12 = vmax.f32 %v1709_v37, 0.0  ;;  %1419 = vmatmul.f32.gmra.mxu0 %v6168_v52  ;;  %3274 = vmatpush.msra.mxu3 %v2959_v20  ;;  %v2487_v20 = vld [vmem:[#allocation9 + $0xe0] sm:$0xff] }
 0x3cf   :  { %v2183_v8 = vmax.f32 %v1807_v58, %v1815_v45  ;;  %1532 = vmatmul.f32.gmra.mxu1 %v6168_v52  ;;  %1645 = vmatmul.f32.gmra.mxu2 %v6168_v52 }
 0x3d0   :  { %v2430_v48 = vsel %vm2423_vm3, %v2416_v41, %v2417_v34  ;;  %v2204_v51 = vmax.f32 %v1808_v22, %v1816_v12  ;;  %1758 = vmatmul.f32.gmra.mxu3 %v6168_v52  ;;  %v2559_v12 = vld [vmem:[#allocation9 + $0x320] sm:$0xff]  ;;  %3139 = vmatpush.msra.mxu0 %v2491_v13 }
 0x3d1   :  { %v2431_v47 = vsel %vm261_vm0, %v2429_v56, %v2430_v48  ;;  %3158 = vmatpush.msra.mxu1 %v2559_v12  ;;  %v2543_v13 = vld [vmem:[#allocation9 + $0x2a0] sm:$0xff] }
 0x3d2   :  { %v2439_v2 = vrot.slane %v2431_v47, 7  ;;  %v1598_v33 = vpop.f32.mrf.mxu2  ;;  %3140 = vmatpush.msra.mxu0 %v2487_v20 }
 0x3d3   :  { %v1599_v31 = vadd.f32 %v1598_v33, %v5515_v7  ;;  %v1711_v16 = vpop.f32.mrf.mxu3  ;;  %v5543_v0 = vpop.f32.mrf.mxu0  ;;  %v2891_v33 = vld [vmem:[#allocation9 + $0xd80] sm:$0xff] }
 0x3d4   :  { %v2441_v43 = vsel %vm2440_vm5, %v2439_v2, %v2425_v26  ;;  %v1712_v17 = vadd.f32 %v1711_v16, %v5518_v15  ;;  %v5547_v5 = vpop.f32.mrf.mxu1  ;;  %v2955_v26 = vld [vmem:[#allocation9 + $0xf80] sm:$0xff]  ;;  %3255 = vmatpush.msra.mxu2 %v2891_v33 }
 0x3d5   :  { %v2443_v25 = vsel %vm2442_vm6, %v2439_v2, %v2441_v43  ;;  %v1823_v30 = vmax.f32 %v1599_v31, 0.0  ;;  %3275 = vmatpush.msra.mxu3 %v2955_v26  ;;  %v2479_v33 = vld [vmem:[#allocation9 + $0xa0] sm:$0xff] }
 0x3d6   :  { %v2445_v63 = vsel %vm2444_vm7, %v2439_v2, %v2443_v25  ;;  %v1824_v4 = vmax.f32 %v1712_v17, 0.0  ;;  %1422 = vmatmul.f32.gmra.mxu0 %v6170_v36  ;;  %3256 = vmatpush.msra.mxu2 %v2887_v29 }
 0x3d7   :  { %v2447_v27 = vsel %vm2446_vm8, %v2439_v2, %v2445_v63  ;;  %v2184_v62 = vmax.f32 %v2183_v8, %v1823_v30  ;;  %1535 = vmatmul.f32.gmra.mxu1 %v6170_v36  ;;  %1648 = vmatmul.f32.gmra.mxu2 %v6170_v36 }
 0x3d8   :  { %3113 = vst [vmem:[#allocation1] ss:$4 sm:$0xff] %v2447_v27  ;;  %v2205_v40 = vmax.f32 %v2204_v51, %v1824_v4  ;;  %1761 = vmatmul.f32.gmra.mxu3 %v6170_v36  ;;  %v6174_v36 = vld [vmem:[#allocation32_spill] sm:$0xff] }
 0x3da   :  { %v1601_v39 = vpop.f32.mrf.mxu2 }
 0x3db   :  { %v1602_v11 = vadd.f32 %v1601_v39, %v5515_v7  ;;  %v1714_v19 = vpop.f32.mrf.mxu3  ;;  %v5557_v60 = vpop.f32.mrf.mxu0 }
 0x3dc   :  { %v1715_v53 = vadd.f32 %v1714_v19, %v5518_v15  ;;  %v5560_v28 = vpop.f32.mrf.mxu1 }
 0x3dd   :  { %v1831_v56 = vmax.f32 %v1602_v11, 0.0 }
 0x3de   :  { %v1832_v10 = vmax.f32 %v1715_v53, 0.0  ;;  %1425 = vmatmul.f32.gmra.mxu0 %v6171_v14 }
 0x3df   :  { %v2185_v44 = vmax.f32 %v2184_v62, %v1831_v56  ;;  %1538 = vmatmul.f32.gmra.mxu1 %v6171_v14  ;;  %1651 = vmatmul.f32.gmra.mxu2 %v6171_v14 }
 0x3e0   :  { %v2206_v9 = vmax.f32 %v2205_v40, %v1832_v10  ;;  %1764 = vmatmul.f32.gmra.mxu3 %v6171_v14  ;;  %v2555_v40 = vld [vmem:[#allocation9 + $0x300] sm:$0xff] }
 0x3e1   :  { %3159 = vmatpush.msra.mxu1 %v2555_v40 }
 0x3e2   :  { %v1604_v23 = vpop.f32.mrf.mxu2 }
 0x3e3   :  { %v1605_v3 = vadd.f32 %v1604_v23, %v5515_v7  ;;  %v1717_v57 = vpop.f32.mrf.mxu3  ;;  %v5567_v1 = vpop.f32.mrf.mxu0  ;;  %v2951_v23 = vld [vmem:[#allocation9 + $0xf60] sm:$0xff] }
 0x3e4   :  { %v1718_v37 = vadd.f32 %v1717_v57, %v5518_v15  ;;  %v5570_v41 = vpop.f32.mrf.mxu1  ;;  %3276 = vmatpush.msra.mxu3 %v2951_v23 }
 0x3e5   :  { %v1839_v58 = vmax.f32 %v1605_v3, 0.0 }
 0x3e6   :  { %v1840_v45 = vmax.f32 %v1718_v37, 0.0  ;;  %1428 = vmatmul.f32.gmra.mxu0 %v6172_v49 }
 0x3e7   :  { %v2186_v34 = vmax.f32 %v2185_v44, %v1839_v58  ;;  %1541 = vmatmul.f32.gmra.mxu1 %v6172_v49  ;;  %1654 = vmatmul.f32.gmra.mxu2 %v6172_v49  ;;  %v6175_v44 = vld [vmem:[#allocation33_spill] sm:$0xff] }
 0x3e8   :  { %v2207_v22 = vmax.f32 %v2206_v9, %v1840_v45  ;;  %1767 = vmatmul.f32.gmra.mxu3 %v6172_v49  ;;  %v6176_v45 = vld [vmem:[#allocation34_spill] sm:$0xff]  ;;  %v2551_v49 = vld [vmem:[#allocation9 + $0x2e0] sm:$0xff] }
 0x3e9   :  { %3160 = vmatpush.msra.mxu1 %v2551_v49 }
 0x3ea   :  { %v1607_v52 = vpop.f32.mrf.mxu2 }
 0x3eb   :  { %v1608_v8 = vadd.f32 %v1607_v52, %v5515_v7  ;;  %v1720_v24 = vpop.f32.mrf.mxu3  ;;  %v5577_v48 = vpop.f32.mrf.mxu0 }
 0x3ec   :  { %v1721_v51 = vadd.f32 %v1720_v24, %v5518_v15  ;;  %v5580_v47 = vpop.f32.mrf.mxu1  ;;  %v2883_v24 = vld [vmem:[#allocation9 + $0xd40] sm:$0xff] }
 0x3ed   :  { %v1847_v32 = vmax.f32 %v1608_v8, 0.0  ;;  %v6177_v8 = vld [vmem:[#allocation35_spill] sm:$0xff]  ;;  %3257 = vmatpush.msra.mxu2 %v2883_v24 }
 0x3ee   :  { %v1848_v42 = vmax.f32 %v1721_v51, 0.0  ;;  %1431 = vmatmul.f32.gmra.mxu0 %v6173_v35  ;;  %v2483_v51 = vld [vmem:[#allocation9 + $0xc0] sm:$0xff] }
 0x3ef   :  { %v2187_v59 = vmax.f32 %v2186_v34, %v1847_v32  ;;  %1544 = vmatmul.f32.gmra.mxu1 %v6173_v35  ;;  %1657 = vmatmul.f32.gmra.mxu2 %v6173_v35  ;;  %v2547_v32 = vld [vmem:[#allocation9 + $0x2c0] sm:$0xff] }
 0x3f0   :  { %v2208_v2 = vmax.f32 %v2207_v22, %v1848_v42  ;;  %1770 = vmatmul.f32.gmra.mxu3 %v6173_v35  ;;  %3141 = vmatpush.msra.mxu0 %v2483_v51  ;;  %v2947_v35 = vld [vmem:[#allocation9 + $0xf40] sm:$0xff] }
 0x3f1   :  { %3161 = vmatpush.msra.mxu1 %v2547_v32  ;;  %3277 = vmatpush.msra.mxu3 %v2947_v35 }
 0x3f2   :  { %v1610_v31 = vpop.f32.mrf.mxu2  ;;  %3142 = vmatpush.msra.mxu0 %v2479_v33 }
 0x3f3   :  { %v1611_v16 = vadd.f32 %v1610_v31, %v5515_v7  ;;  %v1723_v43 = vpop.f32.mrf.mxu3  ;;  %v5587_v17 = vpop.f32.mrf.mxu0  ;;  %3162 = vmatpush.msra.mxu1 %v2543_v13  ;;  %v2475_v31 = vld [vmem:[#allocation9 + $0x80] sm:$0xff] }
 0x3f4   :  { %v1724_v25 = vadd.f32 %v1723_v43, %v5518_v15  ;;  %v5590_v30 = vpop.f32.mrf.mxu1  ;;  %v2539_v43 = vld [vmem:[#allocation9 + $0x280] sm:$0xff]  ;;  %3143 = vmatpush.msra.mxu0 %v2475_v31 }
 0x3f5   :  { %v1855_v63 = vmax.f32 %v1611_v16, 0.0  ;;  %v6178_v16 = vld [vmem:[#allocation36_spill] sm:$0xff]  ;;  %3163 = vmatpush.msra.mxu1 %v2539_v43 }
 0x3f6   :  { %v1856_v4 = vmax.f32 %v1724_v25, 0.0  ;;  %1434 = vmatmul.f32.gmra.mxu0 %v6174_v36  ;;  %v2471_v25 = vld [vmem:[#allocation9 + $0x60] sm:$0xff] }
 0x3f7   :  { %v2188_v27 = vmax.f32 %v2187_v59, %v1855_v63  ;;  %1547 = vmatmul.f32.gmra.mxu1 %v6174_v36  ;;  %1660 = vmatmul.f32.gmra.mxu2 %v6174_v36  ;;  %v2535_v63 = vld [vmem:[#allocation9 + $0x260] sm:$0xff] }
 0x3f8   :  { %v2209_v62 = vmax.f32 %v2208_v2, %v1856_v4  ;;  %1773 = vmatmul.f32.gmra.mxu3 %v6174_v36  ;;  %v2467_v4 = vld [vmem:[#allocation9 + $0x40] sm:$0xff]  ;;  %3144 = vmatpush.msra.mxu0 %v2471_v25 }
 0x3f9   :  { %3164 = vmatpush.msra.mxu1 %v2535_v63  ;;  %v6181_v25 = vld [vmem:[#allocation39_spill] sm:$0xff] }
 0x3fa   :  { %v1613_v61 = vpop.f32.mrf.mxu2  ;;  %3145 = vmatpush.msra.mxu0 %v2467_v4 }
 0x3fb   :  { %v1614_v39 = vadd.f32 %v1613_v61, %v5515_v7  ;;  %v1726_v11 = vpop.f32.mrf.mxu3  ;;  %v5597_v19 = vpop.f32.mrf.mxu0 }
 0x3fc   :  { %v1727_v53 = vadd.f32 %v1726_v11, %v5518_v15  ;;  %v5600_v56 = vpop.f32.mrf.mxu1  ;;  %v6179_v11 = vld [vmem:[#allocation37_spill] sm:$0xff] }
 0x3fd   :  { %v1863_v10 = vmax.f32 %v1614_v39, 0.0  ;;  %v2463_v39 = vld [vmem:[#allocation9 + $0x20] sm:$0xff] }
 0x3fe   :  { %v1864_v14 = vmax.f32 %v1727_v53, 0.0  ;;  %1437 = vmatmul.f32.gmra.mxu0 %v6175_v44  ;;  %v2527_v53 = vld [vmem:[#allocation9 + $0x220] sm:$0xff] }
 0x3ff   :  { %v5603_v9 = vmax.f32 %v2188_v27, %v1863_v10  ;;  %1550 = vmatmul.f32.gmra.mxu1 %v6175_v44  ;;  %1663 = vmatmul.f32.gmra.mxu2 %v6175_v44  ;;  %v2531_v27 = vld [vmem:[#allocation9 + $0x240] sm:$0xff] }
 0x400   :  { %v5607_v18 = vmax.f32 %v2209_v62, %v1864_v14  ;;  %1776 = vmatmul.f32.gmra.mxu3 %v6175_v44  ;;  %3165 = vmatpush.msra.mxu1 %v2531_v27  ;;  %v2459_v10 = vld [vmem:[#allocation9] sm:$0xff] }
 0x401   :  { %3146 = vmatpush.msra.mxu0 %v2463_v39  ;;  %v2523_v14 = vld [vmem:[#allocation9 + $0x200] sm:$0xff] }
 0x402   :  { %v5610_v3 = vpop.f32.mrf.mxu2  ;;  %3166 = vmatpush.msra.mxu1 %v2527_v53  ;;  %v2943_v39 = vld [vmem:[#allocation9 + $0xf20] sm:$0xff] }
 0x403   :  { %v5612_v57 = vpop.f32.mrf.mxu3  ;;  %v5614_v37 = vpop.f32.mrf.mxu0  ;;  %3147 = vmatpush.msra.mxu0 %v2459_v10  ;;  %v1617_v49 = vadd.f32 %v5610_v3, %v5515_v7  ;;  %3278 = vmatpush.msra.mxu3 %v2943_v39 }
 0x404   :  { %v5616_v58 = vpop.f32.mrf.mxu1  ;;  %3167 = vmatpush.msra.mxu1 %v2523_v14 }
 0x405   :  { %v1871_v31 = vmax.f32 %v1617_v49, 0.0 }
 0x406   :  { %1440 = vmatmul.f32.gmra.mxu0 %v6176_v45 }
 0x407   :  { %1553 = vmatmul.f32.gmra.mxu1 %v6176_v45  ;;  %1666 = vmatmul.f32.gmra.mxu2 %v6176_v45  ;;  %v2190_v4 = vmax.f32 %v5603_v9, %v1871_v31 }
 0x408   :  { %1779 = vmatmul.f32.gmra.mxu3 %v6176_v45  ;;  %v6180_v45 = vld [vmem:[#allocation38_spill] sm:$0xff] }
 0x40a   :  { %v5622_v34 = vpop.f32.mrf.mxu2 }
 0x40b   :  { %v5624_v22 = vpop.f32.mrf.mxu3  ;;  %v5626_v12 = vpop.f32.mrf.mxu0  ;;  %v1620_v51 = vadd.f32 %v5622_v34, %v5515_v7 }
 0x40c   :  { %v5628_v52 = vpop.f32.mrf.mxu1  ;;  %v1733_v33 = vadd.f32 %v5624_v22, %v5518_v15 }
 0x40e   :  { %1443 = vmatmul.f32.gmra.mxu0 %v6177_v8  ;;  %v1880_v34 = vmax.f32 %v1733_v33, 0.0 }
 0x40f   :  { %1556 = vmatmul.f32.gmra.mxu1 %v6177_v8  ;;  %1669 = vmatmul.f32.gmra.mxu2 %v6177_v8 }
 0x410   :  { %1782 = vmatmul.f32.gmra.mxu3 %v6177_v8  ;;  %v1730_v8 = vadd.f32 %v5612_v57, %v5518_v15  ;;  %v1879_v57 = vmax.f32 %v1620_v51, 0.0 }
 0x412   :  { %v1622_v42 = vpop.f32.mrf.mxu2  ;;  %v1872_v43 = vmax.f32 %v1730_v8, 0.0 }
 0x413   :  { %v1735_v59 = vpop.f32.mrf.mxu3  ;;  %v5634_v2 = vpop.f32.mrf.mxu0 }
 0x414   :  { %v5636_v26 = vpop.f32.mrf.mxu1  ;;  %v1736_v3 = vadd.f32 %v1735_v59, %v5518_v15  ;;  %v2879_v59 = vld [vmem:[#allocation9 + $0xd20] sm:$0xff]  ;;  %v2211_v53 = vmax.f32 %v5607_v18, %v1872_v43 }
 0x415   :  { %3258 = vmatpush.msra.mxu2 %v2879_v59 }
 0x416   :  { %1446 = vmatmul.f32.gmra.mxu0 %v6178_v16 }
 0x417   :  { %1559 = vmatmul.f32.gmra.mxu1 %v6178_v16  ;;  %1672 = vmatmul.f32.gmra.mxu2 %v6178_v16 }
 0x418   :  { %1785 = vmatmul.f32.gmra.mxu3 %v6178_v16  ;;  %v1623_v16 = vadd.f32 %v1622_v42, %v5515_v7 }
 0x41a   :  { %v1625_v36 = vpop.f32.mrf.mxu2  ;;  %v1887_v42 = vmax.f32 %v1623_v16, 0.0 }
 0x41b   :  { %v1738_v62 = vpop.f32.mrf.mxu3  ;;  %v5642_v40 = vpop.f32.mrf.mxu0  ;;  %v1626_v63 = vadd.f32 %v1625_v36, %v5515_v7  ;;  %v1888_v36 = vmax.f32 %v1736_v3, 0.0 }
 0x41c   :  { %v5644_v61 = vpop.f32.mrf.mxu1  ;;  %v1739_v22 = vadd.f32 %v1738_v62, %v5518_v15  ;;  %v2191_v62 = vmax.f32 %v2190_v4, %v1879_v57 }
 0x41d   :  { %v1895_v49 = vmax.f32 %v1626_v63, 0.0 }
 0x41e   :  { %1449 = vmatmul.f32.gmra.mxu0 %v6179_v11  ;;  %v1896_v33 = vmax.f32 %v1739_v22, 0.0  ;;  %v2192_v18 = vmax.f32 %v2191_v62, %v1887_v42 }
 0x41f   :  { %1562 = vmatmul.f32.gmra.mxu1 %v6179_v11  ;;  %1675 = vmatmul.f32.gmra.mxu2 %v6179_v11 }
 0x420   :  { %1788 = vmatmul.f32.gmra.mxu3 %v6179_v11  ;;  %v2875_v11 = vld [vmem:[#allocation9 + $0xd00] sm:$0xff]  ;;  %v2193_v63 = vmax.f32 %v2192_v18, %v1895_v49 }
 0x421   :  { %3259 = vmatpush.msra.mxu2 %v2875_v11  ;;  %v2647_v49 = vld [vmem:[#allocation9 + $0x5e0] sm:$0xff] }
 0x422   :  { %v1628_v44 = vpop.f32.mrf.mxu2 }
 0x423   :  { %v1741_v29 = vpop.f32.mrf.mxu3  ;;  %v5650_v20 = vpop.f32.mrf.mxu0  ;;  %v1629_v27 = vadd.f32 %v1628_v44, %v5515_v7  ;;  %v2212_v44 = vmax.f32 %v2211_v53, %v1880_v34 }
 0x424   :  { %v5652_v23 = vpop.f32.mrf.mxu1  ;;  %v1742_v10 = vadd.f32 %v1741_v29, %v5518_v15 }
 0x425   :  { %v1903_v29 = vmax.f32 %v1629_v27, 0.0  ;;  %v2213_v3 = vmax.f32 %v2212_v44, %v1888_v36  ;;  %v3116_v44 = vld.sshfl [vmem:[#allocation1] sm:$0xff pattern:$0x73625140] }
 0x426   :  { %1452 = vmatmul.f32.gmra.mxu0 %v6180_v45 }
 0x427   :  { %1565 = vmatmul.f32.gmra.mxu1 %v6180_v45  ;;  %1678 = vmatmul.f32.gmra.mxu2 %v6180_v45  ;;  %v2194_v22 = vmax.f32 %v2193_v63, %v1903_v29  ;;  %v3117_v29 = vld.sshfl [vmem:[#allocation1 + $0x8] sm:$0xff pattern:$0x73625140] }
 0x428   :  { %1791 = vmatmul.f32.gmra.mxu3 %v6180_v45  ;;  %v2939_v45 = vld [vmem:[#allocation9 + $0xf00] sm:$0xff] }
 0x429   :  { %3279 = vmatpush.msra.mxu3 %v2939_v45 }
 0x42a   :  { %v1631_v24 = vpop.f32.mrf.mxu2 }
 0x42b   :  { %v1744_v32 = vpop.f32.mrf.mxu3  ;;  %v5664_v35 = vpop.f32.mrf.mxu0  ;;  %v1632_v8 = vadd.f32 %v1631_v24, %v5515_v7  ;;  %v6183_v24 = vld [vmem:[#allocation40_spill] sm:$0xff] }
 0x42c   :  { %v5668_v13 = vpop.f32.mrf.mxu1  ;;  %v1745_v31 = vadd.f32 %v1744_v32, %v5518_v15  ;;  %v2214_v32 = vmax.f32 %v2213_v3, %v1896_v33  ;;  %v2711_v33 = vld [vmem:[#allocation9 + $0x7e0] sm:$0xff] }
 0x42d   :  { %v1911_v4 = vmax.f32 %v1632_v8, 0.0 }
 0x42e   :  { %1455 = vmatmul.f32.gmra.mxu0 %v6181_v25  ;;  %v1912_v34 = vmax.f32 %v1745_v31, 0.0 }
 0x42f   :  { %1568 = vmatmul.f32.gmra.mxu1 %v6181_v25  ;;  %1681 = vmatmul.f32.gmra.mxu2 %v6181_v25  ;;  %v2195_v11 = vmax.f32 %v2194_v22, %v1911_v4  ;;  %v2703_v4 = vld [vmem:[#allocation9 + $0x7a0] sm:$0xff] }
 0x430   :  { %1794 = vmatmul.f32.gmra.mxu3 %v6181_v25  ;;  %v1904_v25 = vmax.f32 %v1742_v10, 0.0 }
 0x432   :  { %v1634_v14 = vpop.f32.mrf.mxu2  ;;  %v2215_v27 = vmax.f32 %v2214_v32, %v1904_v25  ;;  %v2707_v25 = vld [vmem:[#allocation9 + $0x7c0] sm:$0xff] }
 0x433   :  { %v1747_v9 = vpop.f32.mrf.mxu3  ;;  %v5683_v51 = vpop.f32.mrf.mxu0  ;;  %v1635_v43 = vadd.f32 %v1634_v14, %v5515_v7  ;;  %v2871_v32 = vld [vmem:[#allocation9 + $0xce0] sm:$0xff] }
 0x434   :  { %6182 = vst [vmem:[#allocation44_spill] sm:$0xff] %v5683_v51  ;;  %v5686_v16 = vpop.f32.mrf.mxu1  ;;  %v1748_v57 = vadd.f32 %v1747_v9, %v5518_v15  ;;  %v2216_v14 = vmax.f32 %v2215_v27, %v1912_v34  ;;  %v2935_v34 = vld [vmem:[#allocation9 + $0xee0] sm:$0xff]  ;;  %3260 = vmatpush.msra.mxu2 %v2871_v32 }
 0x435   :  { %v1919_v42 = vmax.f32 %v1635_v43, 0.0  ;;  %v2643_v43 = vld [vmem:[#allocation9 + $0x5c0] sm:$0xff]  ;;  %3280 = vmatpush.msra.mxu3 %v2935_v34 }
 0x436   :  { %1458 = vmatmul.f32.gmra.mxu0 %v6183_v24  ;;  %v1920_v59 = vmax.f32 %v1748_v57, 0.0  ;;  %v2635_v27 = vld [vmem:[#allocation9 + $0x580] sm:$0xff] }
 0x437   :  { %1571 = vmatmul.f32.gmra.mxu1 %v6183_v24  ;;  %1684 = vmatmul.f32.gmra.mxu2 %v6183_v24  ;;  %v2196_v8 = vmax.f32 %v2195_v11, %v1919_v42  ;;  %v2683_v34 = vld [vmem:[#allocation9 + $0x700] sm:$0xff] }
 0x438   :  { %1797 = vmatmul.f32.gmra.mxu3 %v6183_v24  ;;  %v2217_v31 = vmax.f32 %v2216_v14, %v1920_v59  ;;  %v2639_v24 = vld [vmem:[#allocation9 + $0x5a0] sm:$0xff] }
 0x43a   :  { %v1637_v39 = vpop.f32.mrf.mxu2 }
 0x43b   :  { %v1638_v53 = vadd.f32 %v1637_v39, %v5515_v7  ;;  %v1750_v36 = vpop.f32.mrf.mxu3  ;;  %v5695_v10 = vpop.f32.mrf.mxu0 }
 0x43c   :  { %v1751_v45 = vadd.f32 %v1750_v36, %v5518_v15  ;;  %v5698_v62 = vpop.f32.mrf.mxu1 }
 0x43d   :  { %v1927_v9 = vmax.f32 %v1638_v53, 0.0  ;;  %v2699_v53 = vld [vmem:[#allocation9 + $0x780] sm:$0xff] }
 0x43e   :  { %v1928_v18 = vmax.f32 %v1751_v45, 0.0  ;;  %3148 = vmatmul.f32.vlgmr.msra.gmra.mxu0 %v3116_v44  ;;  %v2631_v45 = vld [vmem:[#allocation9 + $0x560] sm:$0xff] }
 0x43f   :  { %v2197_v3 = vmax.f32 %v2196_v8, %v1927_v9  ;;  %3168 = vmatmul.f32.vlgmr.msra.gmra.mxu1 %v3117_v29  ;;  %3172 = vmatpush.msra.mxu0 %v2647_v49  ;;  %v2695_v8 = vld [vmem:[#allocation9 + $0x760] sm:$0xff] }
 0x440   :  { %v2218_v57 = vmax.f32 %v2217_v31, %v1928_v18  ;;  %3192 = vmatpush.msra.mxu1 %v2711_v33  ;;  %v2627_v44 = vld [vmem:[#allocation9 + $0x540] sm:$0xff] }
 0x441   :  { %v2198_v63 = vrot.slane %v2197_v3, 4  ;;  %3173 = vmatpush.msra.mxu0 %v2643_v43  ;;  %v2691_v31 = vld [vmem:[#allocation9 + $0x740] sm:$0xff] }
 0x442   :  { %v2219_v22 = vrot.slane %v2218_v57, 4  ;;  %3193 = vmatpush.msra.mxu1 %v2707_v25  ;;  %v1640_v42 = vpop.f32.mrf.mxu2  ;;  %v2623_v29 = vld [vmem:[#allocation9 + $0x520] sm:$0xff] }
 0x443   :  { %v2199_v59 = vmax.f32 %v2197_v3, %v2198_v63  ;;  %v1753_v39 = vpop.f32.mrf.mxu3  ;;  %3174 = vmatpush.msra.mxu0 %v2639_v24  ;;  %v5700_v11 = vpop.f32.mrf.mxu0  ;;  %v2687_v3 = vld [vmem:[#allocation9 + $0x720] sm:$0xff] }
 0x444   :  { %v2220_v36 = vmax.f32 %v2218_v57, %v2219_v22  ;;  %3194 = vmatpush.msra.mxu1 %v2703_v4  ;;  %v5702_v14 = vpop.f32.mrf.mxu1  ;;  %v2619_v24 = vld [vmem:[#allocation9 + $0x500] sm:$0xff] }
 0x445   :  { %v2200_v49 = vrot.slane %v2199_v59, 2  ;;  %3175 = vmatpush.msra.mxu0 %v2635_v27 }
 0x446   :  { %v2221_v9 = vrot.slane %v2220_v36, 2  ;;  %3195 = vmatpush.msra.mxu1 %v2699_v53 }
 0x447   :  { %v2201_v33 = vmax.f32 %v2199_v59, %v2200_v49  ;;  %3176 = vmatpush.msra.mxu0 %v2631_v45  ;;  %v2615_v59 = vld [vmem:[#allocation9 + $0x4e0] sm:$0xff] }
 0x448   :  { %v2222_v18 = vmax.f32 %v2220_v36, %v2221_v9  ;;  %3196 = vmatpush.msra.mxu1 %v2695_v8  ;;  %v2679_v45 = vld [vmem:[#allocation9 + $0x6e0] sm:$0xff] }
 0x449   :  { %v2202_v43 = vrot.slane %v2201_v33, 1  ;;  %3177 = vmatpush.msra.mxu0 %v2627_v44  ;;  %v2611_v9 = vld [vmem:[#allocation9 + $0x4c0] sm:$0xff]  ;;  %v1641_v44 = vadd.f32 %v1640_v42, %v5515_v7 }
 0x44a   :  { %v2223_v25 = vrot.slane %v2222_v18, 1  ;;  %3197 = vmatpush.msra.mxu1 %v2691_v31  ;;  %v1643_v57 = vpop.f32.mrf.mxu2 }
 0x44b   :  { %v2203_v63 = vmax.f32 %v2201_v33, %v2202_v43  ;;  %v1756_v4 = vpop.f32.mrf.mxu3  ;;  %3178 = vmatpush.msra.mxu0 %v2623_v29  ;;  %v5704_v32 = vpop.f32.mrf.mxu0  ;;  %v1644_v36 = vadd.f32 %v1643_v57, %v5515_v7  ;;  %v2675_v33 = vld [vmem:[#allocation9 + $0x6c0] sm:$0xff]  ;;  %v1935_v42 = vmax.f32 %v1641_v44, 0.0 }
 0x44c   :  { %v2224_v22 = vmax.f32 %v2222_v18, %v2223_v25  ;;  %3198 = vmatpush.msra.mxu1 %v2687_v3  ;;  %v5706_v27 = vpop.f32.mrf.mxu1  ;;  %v1757_v8 = vadd.f32 %v1756_v4, %v5518_v15  ;;  %v1754_v18 = vadd.f32 %v1753_v39, %v5518_v15  ;;  %v2607_v29 = vld [vmem:[#allocation9 + $0x4a0] sm:$0xff] }
 0x44d   :  { %v2413_v53 = vrot.slane %v2203_v63, 4  ;;  %3179 = vmatpush.msra.mxu0 %v2619_v24  ;;  %v1943_v43 = vmax.f32 %v1644_v36, 0.0  ;;  %v2671_v3 = vld [vmem:[#allocation9 + $0x6a0] sm:$0xff] }
 0x44e   :  { %v2414_v49 = vrot.slane %v2224_v22, 2  ;;  %3199 = vmatpush.msra.mxu1 %v2683_v34  ;;  %v2867_v25 = vld [vmem:[#allocation9 + $0xcc0] sm:$0xff]  ;;  %v1944_v24 = vmax.f32 %v1757_v8, 0.0 }
 0x44f   :  { %3180 = vmatpush.msra.mxu0 %v2615_v59  ;;  %v2931_v57 = vld [vmem:[#allocation9 + $0xec0] sm:$0xff]  ;;  %3261 = vmatpush.msra.mxu2 %v2867_v25  ;;  %v2351_v8 = vmax.f32 %v1935_v42, %v1943_v43 }
 0x450   :  { %v5712_v31 = vsel %vm2423_vm3, %v2413_v53, %v2414_v49  ;;  %3200 = vmatpush.msra.mxu1 %v2679_v45  ;;  %v2603_v4 = vld [vmem:[#allocation9 + $0x480] sm:$0xff]  ;;  %3281 = vmatpush.msra.mxu3 %v2931_v57  ;;  %v1936_v53 = vmax.f32 %v1754_v18, 0.0 }
 0x451   :  { %6184 = vst [vmem:[#allocation45_spill] sm:$0xff] %v5712_v31  ;;  %3181 = vmatpush.msra.mxu0 %v2611_v9  ;;  %v2667_v39 = vld [vmem:[#allocation9 + $0x680] sm:$0xff] }
 0x452   :  { %3201 = vmatpush.msra.mxu1 %v2675_v33  ;;  %v1646_v63 = vpop.f32.mrf.mxu2  ;;  %v2599_v49 = vld [vmem:[#allocation9 + $0x460] sm:$0xff]  ;;  %v2372_v44 = vmax.f32 %v1936_v53, %v1944_v24 }
 0x453   :  { %v1647_v34 = vadd.f32 %v1646_v63, %v5515_v7  ;;  %v1759_v22 = vpop.f32.mrf.mxu3  ;;  %3182 = vmatpush.msra.mxu0 %v2607_v29  ;;  %v5716_v59 = vpop.f32.mrf.mxu0  ;;  %v2663_v33 = vld [vmem:[#allocation9 + $0x660] sm:$0xff] }
 0x454   :  { %v1760_v36 = vadd.f32 %v1759_v22, %v5518_v15  ;;  %3202 = vmatpush.msra.mxu1 %v2671_v3  ;;  %v5719_v45 = vpop.f32.mrf.mxu1  ;;  %v2595_v63 = vld [vmem:[#allocation9 + $0x440] sm:$0xff] }
 0x455   :  { %v1951_v9 = vmax.f32 %v1647_v34, 0.0  ;;  %3183 = vmatpush.msra.mxu0 %v2603_v4  ;;  %v2659_v31 = vld [vmem:[#allocation9 + $0x640] sm:$0xff] }
 0x456   :  { %v1952_v25 = vmax.f32 %v1760_v36, 0.0  ;;  %3203 = vmatpush.msra.mxu1 %v2667_v39  ;;  %v2591_v18 = vld [vmem:[#allocation9 + $0x420] sm:$0xff]  ;;  %v3118_v36 = vld.sshfl [vmem:[#allocation1 + $0x10] sm:$0xff pattern:$0x73625140] }
 0x457   :  { %v2352_v29 = vmax.f32 %v2351_v8, %v1951_v9  ;;  %3184 = vmatpush.msra.mxu0 %v2599_v49  ;;  %v2655_v57 = vld [vmem:[#allocation9 + $0x620] sm:$0xff] }
 0x458   :  { %v2373_v51 = vmax.f32 %v2372_v44, %v1952_v25  ;;  %3204 = vmatpush.msra.mxu1 %v2663_v33  ;;  %v2587_v22 = vld [vmem:[#allocation9 + $0x400] sm:$0xff] }
 0x459   :  { %3185 = vmatpush.msra.mxu0 %v2595_v63  ;;  %v2651_v24 = vld [vmem:[#allocation9 + $0x600] sm:$0xff] }
 0x45a   :  { %3205 = vmatpush.msra.mxu1 %v2659_v31  ;;  %v1649_v3 = vpop.f32.mrf.mxu2  ;;  %v3119_v31 = vld.sshfl [vmem:[#allocation1 + $0x18] sm:$0xff pattern:$0x73625140] }
 0x45b   :  { %v1650_v43 = vadd.f32 %v1649_v3, %v5515_v7  ;;  %v1762_v42 = vpop.f32.mrf.mxu3  ;;  %3186 = vmatpush.msra.mxu0 %v2591_v18  ;;  %v5722_v4 = vpop.f32.mrf.mxu0  ;;  %v2863_v33 = vld [vmem:[#allocation9 + $0xca0] sm:$0xff] }
 0x45c   :  { %v1763_v34 = vadd.f32 %v1762_v42, %v5518_v15  ;;  %3206 = vmatpush.msra.mxu1 %v2655_v57  ;;  %v5725_v39 = vpop.f32.mrf.mxu1  ;;  %v2927_v44 = vld [vmem:[#allocation9 + $0xea0] sm:$0xff]  ;;  %3262 = vmatpush.msra.mxu2 %v2863_v33 }
 0x45d   :  { %v1959_v53 = vmax.f32 %v1650_v43, 0.0  ;;  %3187 = vmatpush.msra.mxu0 %v2587_v22  ;;  %3282 = vmatpush.msra.mxu3 %v2927_v44  ;;  %v2923_v33 = vld [vmem:[#allocation9 + $0xe80] sm:$0xff]  ;;  %v5749_v44 = vperm.slane %v5512_v38, 5 }
 0x45e   :  { %v1960_v49 = vmax.f32 %v1763_v34, 0.0  ;;  %3207 = vmatpush.msra.mxu1 %v2651_v24  ;;  %3188 = vmatmul.f32.vlgmr.msra.gmra.mxu0 %v3118_v36 }
 0x45f   :  { %v2353_v8 = vmax.f32 %v2352_v29, %v1959_v53  ;;  %3208 = vmatmul.f32.vlgmr.msra.gmra.mxu1 %v3119_v31  ;;  %v2859_v31 = vld [vmem:[#allocation9 + $0xc80] sm:$0xff]  ;;  %3283 = vmatpush.msra.mxu3 %v2923_v33 }
 0x460   :  { %v2374_v9 = vmax.f32 %v2373_v51, %v1960_v49  ;;  %v5746_v49 = vperm.slane %v5512_v38, 4  ;;  %3263 = vmatpush.msra.mxu2 %v2859_v31 }
 0x462   :  { %v1652_v25 = vpop.f32.mrf.mxu2  ;;  %v1373_v38 = vadd.f32 %v5528_v6, %v5746_v49  ;;  %v1376_v33 = vadd.f32 %v5543_v0, %v5746_v49  ;;  %v1382_v0 = vadd.f32 %v5567_v1, %v5746_v49  ;;  %v1498_v1 = vadd.f32 %v5580_v47, %v5749_v44 }
 0x463   :  { %v1653_v63 = vadd.f32 %v1652_v25, %v5515_v7  ;;  %v1765_v18 = vpop.f32.mrf.mxu3  ;;  %v5728_v57 = vpop.f32.mrf.mxu0  ;;  %v1370_v25 = vadd.f32 %v5508_v54, %v5746_v49  ;;  %v1504_v47 = vadd.f32 %v5600_v56, %v5749_v44 }
 0x464   :  { %v1766_v3 = vadd.f32 %v1765_v18, %v5518_v15  ;;  %v5731_v22 = vpop.f32.mrf.mxu1 }
 0x465   :  { %v1967_v43 = vmax.f32 %v1653_v63, 0.0  ;;  %v1813_v54 = vmax.f32 %v1370_v25, 0.0 }
 0x466   :  { %v1968_v42 = vmax.f32 %v1766_v3, 0.0  ;;  %v1483_v3 = vadd.f32 %v5510_v46, %v5749_v44  ;;  %v1489_v46 = vadd.f32 %v5547_v5, %v5749_v44 }
 0x467   :  { %v5733_v24 = vmax.f32 %v2353_v8, %v1967_v43 }
 0x468   :  { %v5735_v29 = vmax.f32 %v2374_v9, %v1968_v42  ;;  %v1367_v9 = vadd.f32 %v5499_v50, %v5746_v49  ;;  %v1480_v42 = vadd.f32 %v5502_v55, %v5749_v44  ;;  %v1486_v50 = vadd.f32 %v5531_v21, %v5749_v44 }
 0x469   :  { %6185 = vst [vmem:[#allocation46_spill] sm:$0xff] %v5733_v24  ;;  %v1821_v24 = vmax.f32 %v1373_v38, 0.0  ;;  %v1492_v55 = vadd.f32 %v5560_v28, %v5749_v44  ;;  %v1830_v38 = vmax.f32 %v1489_v46, 0.0 }
 0x46a   :  { %6186 = vst [vmem:[#allocation47_spill] sm:$0xff] %v5735_v29  ;;  %v5737_v51 = vpop.f32.mrf.mxu2  ;;  %v1805_v31 = vmax.f32 %v1367_v9, 0.0  ;;  %v1814_v29 = vmax.f32 %v1483_v3, 0.0  ;;  %v1806_v6 = vmax.f32 %v1480_v42, 0.0  ;;  %v1829_v9 = vmax.f32 %v1376_v33, 0.0 }
 0x46b   :  { %v5739_v34 = vpop.f32.mrf.mxu3  ;;  %v5741_v53 = vpop.f32.mrf.mxu0  ;;  %v1838_v33 = vmax.f32 %v1492_v55, 0.0  ;;  %v2919_v55 = vld [vmem:[#allocation9 + $0xe60] sm:$0xff] }
 0x46c   :  { %v5743_v36 = vpop.f32.mrf.mxu1  ;;  %v2141_v21 = vmax.f32 %v1805_v31, %v1813_v54  ;;  %v2162_v5 = vmax.f32 %v1806_v6, %v1814_v29  ;;  %v1385_v31 = vadd.f32 %v5577_v48, %v5746_v49  ;;  %v1388_v29 = vadd.f32 %v5587_v17, %v5746_v49  ;;  %3284 = vmatpush.msra.mxu3 %v2919_v55 }
 0x46d   :  { %v1391_v48 = vadd.f32 %v5597_v19, %v5746_v49 }
 0x472   :  { %v5751_v8 = vpop.f32.mrf.mxu2 }
 0x473   :  { %v5757_v63 = vpop.f32.mrf.mxu3  ;;  %v5759_v18 = vpop.f32.mrf.mxu0 }
 0x474   :  { %6187 = vst [vmem:[#allocation48_spill] sm:$0xff] %v5757_v63  ;;  %v5763_v43 = vpop.f32.mrf.mxu1 }
 0x475   :  { %6188 = vst [vmem:[#allocation49_spill] sm:$0xff] %v5759_v18  ;;  %v1822_v18 = vmax.f32 %v1486_v50, 0.0  ;;  %v2142_v50 = vmax.f32 %v2141_v21, %v1821_v24 }
 0x476   :  { %6189 = vst [vmem:[#allocation42_spill] sm:$0xff] %v5763_v43  ;;  %v1379_v43 = vadd.f32 %v5557_v60, %v5746_v49  ;;  %v1495_v60 = vadd.f32 %v5570_v41, %v5749_v44  ;;  %v1501_v41 = vadd.f32 %v5590_v30, %v5749_v44  ;;  %v1394_v30 = vadd.f32 %v5614_v37, %v5746_v49 }
 0x477   :  { %v2163_v54 = vmax.f32 %v2162_v5, %v1822_v18  ;;  %v2855_v18 = vld [vmem:[#allocation9 + $0xc60] sm:$0xff]  ;;  %v1854_v5 = vmax.f32 %v1498_v1, 0.0  ;;  %v1510_v37 = vadd.f32 %v5628_v52, %v5749_v44  ;;  %v1516_v52 = vadd.f32 %v5644_v61, %v5749_v44 }
 0x478   :  { %v1837_v28 = vmax.f32 %v1379_v43, 0.0  ;;  %v1846_v6 = vmax.f32 %v1495_v60, 0.0  ;;  %v1853_v43 = vmax.f32 %v1385_v31, 0.0  ;;  %3264 = vmatpush.msra.mxu2 %v2855_v18  ;;  %v1862_v60 = vmax.f32 %v1501_v41, 0.0 }
 0x479   :  { %v2164_v46 = vmax.f32 %v2163_v54, %v1830_v38  ;;  %v1869_v31 = vmax.f32 %v1391_v48, 0.0  ;;  %v1886_v18 = vmax.f32 %v1510_v37, 0.0  ;;  %v1531_v37 = vadd.f32 %v5702_v14, %v5749_v44 }
 0x47a   :  { %v5779_v63 = vpop.f32.mrf.mxu2 }
 0x47b   :  { %6190 = vst [vmem:[#allocation43_spill] sm:$0xff] %v5779_v63  ;;  %v5783_v25 = vpop.f32.mrf.mxu3  ;;  %v5785_v3 = vpop.f32.mrf.mxu0  ;;  %v1845_v63 = vmax.f32 %v1382_v0, 0.0  ;;  %v2165_v21 = vmax.f32 %v2164_v46, %v1838_v33  ;;  %v1861_v0 = vmax.f32 %v1388_v29, 0.0  ;;  %v1870_v33 = vmax.f32 %v1504_v47, 0.0 }
 0x47c   :  { %6191 = vst [vmem:[#allocation25_spill] sm:$0xff] %v5783_v25  ;;  %v5789_v42 = vpop.f32.mrf.mxu1  ;;  %v2143_v25 = vmax.f32 %v2142_v50, %v1829_v9  ;;  %v1507_v50 = vadd.f32 %v5616_v58, %v5749_v44  ;;  %v1877_v29 = vmax.f32 %v1394_v30, 0.0  ;;  %v1400_v46 = vadd.f32 %v5634_v2, %v5746_v49 }
 0x47d   :  { %v2166_v19 = vmax.f32 %v2165_v21, %v1846_v6  ;;  %v1513_v58 = vadd.f32 %v5636_v26, %v5749_v44  ;;  %v1406_v2 = vadd.f32 %v5650_v20, %v5746_v49  ;;  %v1418_v20 = vadd.f32 %v5700_v11, %v5746_v49  ;;  %v2915_v11 = vld [vmem:[#allocation9 + $0xe40] sm:$0xff] }
 0x47e   :  { %v2144_v24 = vmax.f32 %v2143_v25, %v1837_v28  ;;  %v1878_v41 = vmax.f32 %v1507_v50, 0.0  ;;  %v1902_v50 = vmax.f32 %v1516_v52, 0.0  ;;  %3285 = vmatpush.msra.mxu3 %v2915_v11 }
 0x47f   :  { %v2167_v54 = vmax.f32 %v2166_v19, %v1854_v5  ;;  %v1893_v5 = vmax.f32 %v1400_v46, 0.0  ;;  %v1421_v46 = vadd.f32 %v5704_v32, %v5746_v49  ;;  %v1424_v32 = vadd.f32 %v5716_v59, %v5746_v49  ;;  %v6192_v59 = vld [vmem:[#allocation44_spill] sm:$0xff] }
 0x480   :  { %v2145_v17 = vmax.f32 %v2144_v24, %v1845_v63  ;;  %v1397_v63 = vadd.f32 %v5626_v12, %v5746_v49  ;;  %v1403_v12 = vadd.f32 %v5642_v40, %v5746_v49  ;;  %v1519_v40 = vadd.f32 %v5652_v23, %v5749_v44 }
 0x481   :  { %v2168_v6 = vmax.f32 %v2167_v54, %v1862_v60 }
 0x482   :  { %v5803_v9 = vpop.f32.mrf.mxu2  ;;  %v2146_v56 = vmax.f32 %v2145_v17, %v1853_v43  ;;  %v1885_v43 = vmax.f32 %v1397_v63, 0.0  ;;  %v1901_v61 = vmax.f32 %v1403_v12, 0.0  ;;  %v1910_v54 = vmax.f32 %v1519_v40, 0.0 }
 0x483   :  { %v5807_v25 = vpop.f32.mrf.mxu3  ;;  %v5809_v38 = vpop.f32.mrf.mxu0  ;;  %v2169_v48 = vmax.f32 %v2168_v6, %v1870_v33  ;;  %v1409_v33 = vadd.f32 %v5664_v35, %v5746_v49  ;;  %v2851_v6 = vld [vmem:[#allocation9 + $0xc40] sm:$0xff]  ;;  %v1534_v35 = vadd.f32 %v5706_v27, %v5749_v44  ;;  %v1537_v27 = vadd.f32 %v5719_v45, %v5749_v44 }
 0x484   :  { %v5813_v28 = vpop.f32.mrf.mxu1  ;;  %v2147_v1 = vmax.f32 %v2146_v56, %v1861_v0  ;;  %v1894_v0 = vmax.f32 %v1513_v58, 0.0  ;;  %v1528_v58 = vadd.f32 %v5698_v62, %v5749_v44  ;;  %3265 = vmatpush.msra.mxu2 %v2851_v6  ;;  %v1957_v45 = vmax.f32 %v1424_v32, 0.0 }
 0x485   :  { %v2170_v17 = vmax.f32 %v2169_v48, %v1878_v41  ;;  %v1917_v48 = vmax.f32 %v1409_v33, 0.0  ;;  %v1950_v40 = vmax.f32 %v1534_v35, 0.0 }
 0x486   :  { %v2148_v24 = vmax.f32 %v2147_v1, %v1869_v31  ;;  %v1909_v31 = vmax.f32 %v1406_v2, 0.0  ;;  %v1522_v1 = vadd.f32 %v5668_v13, %v5749_v44  ;;  %v1949_v2 = vmax.f32 %v1421_v46, 0.0 }
 0x487   :  { %v2171_v60 = vmax.f32 %v2170_v17, %v1886_v18  ;;  %v1942_v18 = vmax.f32 %v1531_v37, 0.0  ;;  %v5873_v17 = vadd.f32 %v6192_v59, %v5746_v49  ;;  %v1656_v37 = vadd.f32 %v5737_v51, %v5515_v7 }
 0x488   :  { %v2149_v21 = vmax.f32 %v2148_v24, %v1877_v29  ;;  %v1415_v29 = vadd.f32 %v5695_v10, %v5746_v49  ;;  %v1525_v10 = vadd.f32 %v5686_v16, %v5749_v44  ;;  %v1941_v24 = vmax.f32 %v1418_v20, 0.0 }
 0x489   :  { %v2172_v63 = vmax.f32 %v2171_v60, %v1894_v0  ;;  %v1427_v16 = vadd.f32 %v5722_v4, %v5746_v49  ;;  %v1934_v0 = vmax.f32 %v1528_v58, 0.0  ;;  %v1958_v20 = vmax.f32 %v1537_v27, 0.0 }
 0x48a   :  { %v5827_v55 = vpop.f32.mrf.mxu2  ;;  %v2150_v19 = vmax.f32 %v2149_v21, %v1885_v43  ;;  %v1918_v21 = vmax.f32 %v1522_v1, 0.0  ;;  %v1543_v4 = vadd.f32 %v5731_v22, %v5749_v44  ;;  %v1433_v22 = vadd.f32 %v5741_v53, %v5746_v49  ;;  %v6194_v53 = vld [vmem:[#allocation49_spill] sm:$0xff] }
 0x48b   :  { %v5831_v47 = vpop.f32.mrf.mxu3  ;;  %v5833_v26 = vpop.f32.mrf.mxu0  ;;  %v2173_v41 = vmax.f32 %v2172_v63, %v1902_v50  ;;  %v1430_v50 = vadd.f32 %v5728_v57, %v5746_v49  ;;  %v1965_v33 = vmax.f32 %v1427_v16, 0.0  ;;  %v1769_v57 = vadd.f32 %v5739_v34, %v5518_v15 }
 0x48c   :  { %v5837_v30 = vpop.f32.mrf.mxu1  ;;  %v2151_v56 = vmax.f32 %v2150_v19, %v1893_v5  ;;  %v1933_v5 = vmax.f32 %v1415_v29, 0.0  ;;  %v1540_v19 = vadd.f32 %v5725_v39, %v5749_v44  ;;  %v1925_v39 = vmax.f32 %v5873_v17, 0.0 }
 0x48d   :  { %v2174_v62 = vmax.f32 %v2173_v41, %v1910_v54  ;;  %v1973_v11 = vmax.f32 %v1430_v50, 0.0  ;;  %v1974_v35 = vmax.f32 %v1543_v4, 0.0  ;;  %v1659_v34 = vadd.f32 %v5751_v8, %v5515_v7 }
 0x48e   :  { %v2152_v23 = vmax.f32 %v2151_v56, %v1901_v61  ;;  %v1926_v61 = vmax.f32 %v1525_v10, 0.0  ;;  %v2309_v60 = vmax.f32 %v1933_v5, %v1941_v24  ;;  %v1966_v1 = vmax.f32 %v1540_v19, 0.0  ;;  %v6195_v5 = vld [vmem:[#allocation42_spill] sm:$0xff] }
 0x48f   :  { %v2175_v63 = vmax.f32 %v2174_v62, %v1918_v21  ;;  %v1975_v32 = vmax.f32 %v1656_v37, 0.0  ;;  %v6193_v62 = vld [vmem:[#allocation48_spill] sm:$0xff]  ;;  %v1976_v21 = vmax.f32 %v1769_v57, 0.0  ;;  %v1439_v50 = vadd.f32 %v5785_v3, %v5746_v49 }
 0x490   :  { %v2153_v13 = vmax.f32 %v2152_v23, %v1909_v31  ;;  %v2330_v31 = vmax.f32 %v1934_v0, %v1942_v18  ;;  %v2310_v54 = vmax.f32 %v2309_v60, %v1949_v2  ;;  %v1436_v18 = vadd.f32 %v6194_v53, %v5746_v49  ;;  %v2771_v53 = vld [vmem:[#allocation9 + $0x9c0] sm:$0xff] }
 0x491   :  { %v5890_v46 = vmax.f32 %v2175_v63, %v1926_v61  ;;  %v1549_v2 = vadd.f32 %v6195_v5, %v5749_v44  ;;  %v1981_v0 = vmax.f32 %v1433_v22, 0.0  ;;  %v1665_v57 = vadd.f32 %v5803_v9, %v5515_v7  ;;  %v2839_v22 = vld [vmem:[#allocation9 + $0xbe0] sm:$0xff] }
 0x492   :  { %v5855_v14 = vpop.f32.mrf.mxu2  ;;  %v5879_v56 = vmax.f32 %v2153_v13, %v1917_v48  ;;  %v2331_v23 = vmax.f32 %v2330_v31, %v1950_v40  ;;  %v2311_v6 = vmax.f32 %v2310_v54, %v1957_v45  ;;  %v1546_v13 = vadd.f32 %v5743_v36, %v5749_v44  ;;  %v6196_v36 = vld [vmem:[#allocation43_spill] sm:$0xff]  ;;  %v6197_v40 = vld [vmem:[#allocation25_spill] sm:$0xff]  ;;  %v6198_v31 = vld [vmem:[#allocation46_spill] sm:$0xff]  ;;  %3232 = vmatpush.msra.mxu1 %v2839_v22 }
 0x493   :  { %v5861_v43 = vpop.f32.mrf.mxu3  ;;  %v5863_v12 = vpop.f32.mrf.mxu0  ;;  %v1772_v48 = vadd.f32 %v6193_v62, %v5518_v15  ;;  %v1662_v16 = vadd.f32 %v6196_v36, %v5515_v7  ;;  %v2177_v8 = vrot.slane %v5890_v46, 4  ;;  %v1775_v19 = vadd.f32 %v6197_v40, %v5518_v15 }
 0x494   :  { %v5867_v52 = vpop.f32.mrf.mxu1  ;;  %v2332_v51 = vmax.f32 %v2331_v23, %v1958_v20  ;;  %v2312_v24 = vmax.f32 %v2311_v6, %v1965_v33  ;;  %v1982_v60 = vmax.f32 %v1546_v13, 0.0  ;;  %v1983_v45 = vmax.f32 %v1659_v34, 0.0  ;;  %v6199_v33 = vld [vmem:[#allocation47_spill] sm:$0xff] }
 0x495   :  { %v2355_v20 = vmax.f32 %v6198_v31, %v1975_v32  ;;  %v1984_v4 = vmax.f32 %v1772_v48, 0.0  ;;  %v1989_v63 = vmax.f32 %v1436_v18, 0.0  ;;  %v1552_v54 = vadd.f32 %v5789_v42, %v5749_v44  ;;  %v2835_v18 = vld [vmem:[#allocation9 + $0xbc0] sm:$0xff] }
 0x496   :  { %v2333_v27 = vmax.f32 %v2332_v51, %v1966_v1  ;;  %v2313_v59 = vmax.f32 %v2312_v24, %v1973_v11  ;;  %v2376_v37 = vmax.f32 %v6199_v33, %v1976_v21  ;;  %v1990_v23 = vmax.f32 %v1549_v2, 0.0  ;;  %v2775_v11 = vld [vmem:[#allocation9 + $0x9e0] sm:$0xff]  ;;  %3233 = vmatpush.msra.mxu1 %v2835_v18 }
 0x497   :  { %v1991_v1 = vmax.f32 %v1662_v16, 0.0  ;;  %v1992_v3 = vmax.f32 %v1775_v19, 0.0  ;;  %v1442_v13 = vadd.f32 %v5809_v38, %v5746_v49  ;;  %3212 = vmatpush.msra.mxu0 %v2775_v11  ;;  %v2356_v32 = vmax.f32 %v2355_v20, %v1983_v45  ;;  %v2763_v31 = vld [vmem:[#allocation9 + $0x980] sm:$0xff] }
 0x498   :  { %v2334_v61 = vmax.f32 %v2333_v27, %v1974_v35  ;;  %v2314_v51 = vmax.f32 %v2313_v59, %v1981_v0  ;;  %v1778_v35 = vadd.f32 %v5807_v25, %v5518_v15  ;;  %v1997_v9 = vmax.f32 %v1439_v50, 0.0  ;;  %v2767_v59 = vld [vmem:[#allocation9 + $0x9a0] sm:$0xff] }
 0x499   :  { %v1555_v62 = vadd.f32 %v5813_v28, %v5749_v44  ;;  %v2377_v27 = vmax.f32 %v2376_v37, %v1984_v4  ;;  %v1998_v25 = vmax.f32 %v1552_v54, 0.0  ;;  %v1668_v38 = vadd.f32 %v5827_v55, %v5515_v7  ;;  %3213 = vmatpush.msra.mxu0 %v2771_v53  ;;  %v2831_v0 = vld [vmem:[#allocation9 + $0xba0] sm:$0xff] }
 0x49a   :  { %v5888_v29 = vpop.f32.mrf.mxu2  ;;  %v2335_v24 = vmax.f32 %v2334_v61, %v1982_v60  ;;  %v2315_v21 = vmax.f32 %v2314_v51, %v1989_v63  ;;  %v2357_v2 = vmax.f32 %v2356_v32, %v1991_v1  ;;  %v1999_v36 = vmax.f32 %v1665_v57, 0.0  ;;  %3234 = vmatpush.msra.mxu1 %v2831_v0  ;;  %v2823_v1 = vld [vmem:[#allocation9 + $0xb60] sm:$0xff] }
 0x49b   :  { %v5894_v41 = vpop.f32.mrf.mxu3  ;;  %v5896_v58 = vpop.f32.mrf.mxu0  ;;  %v1445_v16 = vadd.f32 %v5833_v26, %v5746_v49  ;;  %v2378_v28 = vmax.f32 %v2377_v27, %v1992_v3  ;;  %v2000_v40 = vmax.f32 %v1778_v35, 0.0  ;;  %v2005_v19 = vmax.f32 %v1442_v13, 0.0  ;;  %3214 = vmatpush.msra.mxu0 %v2767_v59  ;;  %v2827_v26 = vld [vmem:[#allocation9 + $0xb80] sm:$0xff] }
 0x49c   :  { %v5902_v10 = vpop.f32.mrf.mxu1  ;;  %v2336_v5 = vmax.f32 %v2335_v24, %v1990_v23  ;;  %v1558_v61 = vadd.f32 %v5837_v30, %v5749_v44  ;;  %v2316_v60 = vmax.f32 %v2315_v21, %v1997_v9  ;;  %v2006_v55 = vmax.f32 %v1555_v62, 0.0  ;;  %3235 = vmatpush.msra.mxu1 %v2827_v26  ;;  %v2759_v23 = vld [vmem:[#allocation9 + $0x960] sm:$0xff] }
 0x49d   :  { %v1781_v45 = vadd.f32 %v5831_v47, %v5518_v15  ;;  %v1448_v50 = vadd.f32 %v5863_v12, %v5746_v49  ;;  %v2007_v4 = vmax.f32 %v1668_v38, 0.0  ;;  %v1671_v63 = vadd.f32 %v5855_v14, %v5515_v7  ;;  %3215 = vmatpush.msra.mxu0 %v2763_v31  ;;  %v2819_v32 = vld [vmem:[#allocation9 + $0xb40] sm:$0xff] }
 0x49e   :  { %v2337_v20 = vmax.f32 %v2336_v5, %v1998_v25  ;;  %v1561_v30 = vadd.f32 %v5867_v52, %v5749_v44  ;;  %v2358_v54 = vmax.f32 %v2357_v2, %v1999_v36  ;;  %v2013_v33 = vmax.f32 %v1445_v16, 0.0  ;;  %3236 = vmatpush.msra.mxu1 %v2823_v1  ;;  %v2751_v38 = vld [vmem:[#allocation9 + $0x920] sm:$0xff] }
 0x49f   :  { %v1784_v47 = vadd.f32 %v5861_v43, %v5518_v15  ;;  %v1451_v12 = vadd.f32 %v5896_v58, %v5746_v49  ;;  %v2379_v57 = vmax.f32 %v2378_v28, %v2000_v40  ;;  %v2317_v11 = vmax.f32 %v2316_v60, %v2005_v19  ;;  %3216 = vmatpush.msra.mxu0 %v2759_v23  ;;  %v2755_v58 = vld [vmem:[#allocation9 + $0x940] sm:$0xff] }
 0x4a0   :  { %v2014_v22 = vmax.f32 %v1558_v61, 0.0  ;;  %v1564_v14 = vadd.f32 %v5902_v10, %v5749_v44  ;;  %v2338_v3 = vmax.f32 %v2337_v20, %v2006_v55  ;;  %v2008_v35 = vmax.f32 %v1781_v45, 0.0  ;;  %3237 = vmatpush.msra.mxu1 %v2819_v32  ;;  %v2815_v5 = vld [vmem:[#allocation9 + $0xb20] sm:$0xff] }
 0x4a1   :  { %v2021_v13 = vmax.f32 %v1448_v50, 0.0  ;;  %v2359_v9 = vmax.f32 %v2358_v54, %v2007_v4  ;;  %v2015_v62 = vmax.f32 %v1671_v63, 0.0  ;;  %v2022_v53 = vmax.f32 %v1561_v30, 0.0  ;;  %3217 = vmatpush.msra.mxu0 %v2755_v58  ;;  %v2747_v40 = vld [vmem:[#allocation9 + $0x900] sm:$0xff] }
 0x4a2   :  { %v5923_v6 = vpop.f32.mrf.mxu2  ;;  %v2318_v10 = vmax.f32 %v2317_v11, %v2013_v33  ;;  %v2016_v27 = vmax.f32 %v1784_v47, 0.0  ;;  %v2029_v21 = vmax.f32 %v1451_v12, 0.0  ;;  %v2339_v2 = vmax.f32 %v2338_v3, %v2014_v22  ;;  %3238 = vmatpush.msra.mxu1 %v2815_v5  ;;  %v2811_v19 = vld [vmem:[#allocation9 + $0xb00] sm:$0xff] }
 0x4a3   :  { %v5929_v42 = vpop.f32.mrf.mxu3  ;;  %v1453_v34 = vpop.f32.mrf.mxu0  ;;  %v2030_v36 = vmax.f32 %v1564_v14, 0.0  ;;  %3218 = vmatpush.msra.mxu0 %v2751_v38  ;;  %v2380_v59 = vmax.f32 %v2379_v57, %v2008_v35  ;;  %v1787_v0 = vadd.f32 %v5894_v41, %v5518_v15  ;;  %v2360_v61 = vmax.f32 %v2359_v9, %v2015_v62  ;;  %v2743_v4 = vld [vmem:[#allocation9 + $0x8e0] sm:$0xff] }
 0x4a4   :  { %v1566_v48 = vpop.f32.mrf.mxu1  ;;  %v1454_v43 = vadd.f32 %v1453_v34, %v5746_v49  ;;  %v1674_v34 = vadd.f32 %v5888_v29, %v5515_v7  ;;  %v2340_v60 = vmax.f32 %v2339_v2, %v2022_v53  ;;  %v1677_v55 = vadd.f32 %v5923_v6, %v5515_v7  ;;  %3239 = vmatpush.msra.mxu1 %v2811_v19  ;;  %v2807_v41 = vld [vmem:[#allocation9 + $0xae0] sm:$0xff] }
 0x4a5   :  { %v1567_v18 = vadd.f32 %v1566_v48, %v5749_v44  ;;  %v2319_v48 = vmax.f32 %v2318_v10, %v2021_v13  ;;  %3219 = vmatpush.msra.mxu0 %v2747_v40  ;;  %v2381_v29 = vmax.f32 %v2380_v59, %v2016_v27  ;;  %v1790_v31 = vadd.f32 %v5929_v42, %v5518_v15  ;;  %v2739_v11 = vld [vmem:[#allocation9 + $0x8c0] sm:$0xff] }
 0x4a6   :  { %v2037_v28 = vmax.f32 %v1454_v43, 0.0  ;;  %v2023_v63 = vmax.f32 %v1674_v34, 0.0  ;;  %v2341_v30 = vmax.f32 %v2340_v60, %v2030_v36  ;;  %3240 = vmatpush.msra.mxu1 %v2807_v41  ;;  %v2024_v6 = vmax.f32 %v1787_v0, 0.0  ;;  %v2803_v22 = vld [vmem:[#allocation9 + $0xac0] sm:$0xff] }
 0x4a7   :  { %v2038_v45 = vmax.f32 %v1567_v18, 0.0  ;;  %v2320_v50 = vmax.f32 %v2319_v48, %v2029_v21  ;;  %3220 = vmatpush.msra.mxu0 %v2743_v4  ;;  %v2031_v14 = vmax.f32 %v1677_v55, 0.0  ;;  %v2032_v35 = vmax.f32 %v1790_v31, 0.0  ;;  %v2735_v58 = vld [vmem:[#allocation9 + $0x8a0] sm:$0xff] }
 0x4a8   :  { %3241 = vmatpush.msra.mxu1 %v2803_v22  ;;  %v2361_v32 = vmax.f32 %v2360_v61, %v2023_v63  ;;  %v2155_v53 = vmax.f32 %v5879_v56, %v1925_v39  ;;  %v2847_v27 = vld [vmem:[#allocation9 + $0xc20] sm:$0xff]  ;;  %v2178_v17 = vmax.f32 %v5890_v46, %v2177_v8 }
 0x4a9   :  { %v2321_v23 = vmax.f32 %v2320_v50, %v2037_v28  ;;  %3221 = vmatpush.msra.mxu0 %v2739_v11  ;;  %v2911_v21 = vld [vmem:[#allocation9 + $0xe20] sm:$0xff]  ;;  %3266 = vmatpush.msra.mxu2 %v2847_v27 }
 0x4aa   :  { %v1679_v37 = vpop.f32.mrf.mxu2  ;;  %v2362_v38 = vmax.f32 %v2361_v32, %v2031_v14  ;;  %3286 = vmatpush.msra.mxu3 %v2911_v21  ;;  %v2907_v34 = vld [vmem:[#allocation9 + $0xe00] sm:$0xff]  ;;  %v2179_v4 = vrot.slane %v2178_v17, 2 }
 0x4ab   :  { %v1792_v52 = vpop.f32.mrf.mxu3  ;;  %v1456_v51 = vpop.f32.mrf.mxu0  ;;  %v1680_v54 = vadd.f32 %v1679_v37, %v5515_v7  ;;  %3222 = vmatpush.msra.mxu0 %v2735_v58  ;;  %v2731_v36 = vld [vmem:[#allocation9 + $0x880] sm:$0xff] }
 0x4ac   :  { %v1569_v24 = vpop.f32.mrf.mxu1  ;;  %v1457_v25 = vadd.f32 %v1456_v51, %v5746_v49  ;;  %v1793_v1 = vadd.f32 %v1792_v52, %v5518_v15  ;;  %v2342_v51 = vmax.f32 %v2341_v30, %v2038_v45  ;;  %v2799_v52 = vld [vmem:[#allocation9 + $0xaa0] sm:$0xff]  ;;  %3287 = vmatpush.msra.mxu3 %v2907_v34  ;;  %v2180_v11 = vmax.f32 %v2178_v17, %v2179_v4  ;;  %v2512_v4 = vld [vmem:[#allocation9 + $0x1a8] sm:$0xff] }
 0x4ad   :  { %v1570_v16 = vadd.f32 %v1569_v24, %v5749_v44  ;;  %3242 = vmatpush.msra.mxu1 %v2799_v52  ;;  %3223 = vmatpush.msra.mxu0 %v2731_v36  ;;  %v2727_v0 = vld [vmem:[#allocation9 + $0x860] sm:$0xff] }
 0x4ae   :  { %v2045_v26 = vmax.f32 %v1457_v25, 0.0  ;;  %v2040_v18 = vmax.f32 %v1793_v1, 0.0  ;;  %v2843_v25 = vld [vmem:[#allocation9 + $0xc00] sm:$0xff] }
 0x4af   :  { %v2046_v33 = vmax.f32 %v1570_v16, 0.0  ;;  %v2795_v16 = vld [vmem:[#allocation9 + $0xa80] sm:$0xff]  ;;  %3267 = vmatpush.msra.mxu2 %v2843_v25  ;;  %3224 = vmatpush.msra.mxu0 %v2727_v0 }
 0x4b0   :  { %v2322_v13 = vmax.f32 %v2321_v23, %v2045_v26  ;;  %3243 = vmatpush.msra.mxu1 %v2795_v16  ;;  %v2791_v28 = vld [vmem:[#allocation9 + $0xa60] sm:$0xff] }
 0x4b1   :  { %v2343_v9 = vmax.f32 %v2342_v51, %v2046_v33  ;;  %v2723_v55 = vld [vmem:[#allocation9 + $0x840] sm:$0xff] }
 0x4b2   :  { %v1682_v20 = vpop.f32.mrf.mxu2  ;;  %v2787_v45 = vld [vmem:[#allocation9 + $0xa40] sm:$0xff]  ;;  %3244 = vmatpush.msra.mxu1 %v2791_v28  ;;  %3225 = vmatpush.msra.mxu0 %v2723_v55  ;;  %v2712_v55 = vld [vmem:[#allocation9 + $0x7e8] sm:$0xff] }
 0x4b3   :  { %v1795_v47 = vpop.f32.mrf.mxu3  ;;  %v1459_v12 = vpop.f32.mrf.mxu0  ;;  %v1683_v3 = vadd.f32 %v1682_v20, %v5515_v7 }
 0x4b4   :  { %v1460_v57 = vadd.f32 %v1459_v12, %v5746_v49  ;;  %v1572_v42 = vpop.f32.mrf.mxu1  ;;  %v1796_v43 = vadd.f32 %v1795_v47, %v5518_v15  ;;  %v2039_v49 = vmax.f32 %v1680_v54, 0.0  ;;  %3245 = vmatpush.msra.mxu1 %v2787_v45  ;;  %v2783_v54 = vld [vmem:[#allocation9 + $0xa20] sm:$0xff] }
 0x4b5   :  { %v1573_v37 = vadd.f32 %v1572_v42, %v5749_v44  ;;  %v2382_v44 = vmax.f32 %v2381_v29, %v2024_v6  ;;  %v2047_v5 = vmax.f32 %v1683_v3, 0.0  ;;  %v2156_v29 = vrot.slane %v2155_v53, 4  ;;  %v2715_v12 = vld [vmem:[#allocation9 + $0x800] sm:$0xff] }
 0x4b6   :  { %v2053_v24 = vmax.f32 %v1460_v57, 0.0  ;;  %v2048_v56 = vmax.f32 %v1796_v43, 0.0  ;;  %v2363_v40 = vmax.f32 %v2362_v38, %v2039_v49  ;;  %v2779_v6 = vld [vmem:[#allocation9 + $0xa00] sm:$0xff]  ;;  %3246 = vmatpush.msra.mxu1 %v2783_v54  ;;  %v2572_v54 = vld [vmem:[#allocation9 + $0x388] sm:$0xff] }
 0x4b7   :  { %v2054_v62 = vmax.f32 %v1573_v37, 0.0  ;;  %v2383_v59 = vmax.f32 %v2382_v44, %v2032_v35  ;;  %v2157_v23 = vmax.f32 %v2155_v53, %v2156_v29 }
 0x4b8   :  { %v2323_v10 = vmax.f32 %v2322_v13, %v2053_v24  ;;  %v2364_v31 = vmax.f32 %v2363_v40, %v2047_v5  ;;  %3247 = vmatpush.msra.mxu1 %v2779_v6  ;;  %v2181_v24 = vrot.slane %v2180_v11, 1  ;;  %v2568_v6 = vld [vmem:[#allocation9 + $0x368] sm:$0xff] }
 0x4b9   :  { %v2344_v2 = vmax.f32 %v2343_v9, %v2054_v62  ;;  %v2384_v50 = vmax.f32 %v2383_v59, %v2040_v18  ;;  %v2158_v37 = vrot.slane %v2157_v23, 2 }
 0x4ba   :  { %v2324_v39 = vrot.slane %v2323_v10, 4  ;;  %v1685_v48 = vpop.f32.mrf.mxu2  ;;  %v2182_v18 = vmax.f32 %v2180_v11, %v2181_v24  ;;  %v2692_v11 = vld [vmem:[#allocation9 + $0x748] sm:$0xff] }
 0x4bb   :  { %v2345_v19 = vrot.slane %v2344_v2, 4  ;;  %v1686_v61 = vadd.f32 %v1685_v48, %v5515_v7  ;;  %v1798_v60 = vpop.f32.mrf.mxu3  ;;  %v2385_v41 = vmax.f32 %v2384_v50, %v2048_v56  ;;  %v2719_v7 = vld [vmem:[#allocation9 + $0x820] sm:$0xff]  ;;  %v2159_v9 = vmax.f32 %v2157_v23, %v2158_v37  ;;  %v6200_v56 = vld [vmem:[#allocation45_spill] sm:$0xff] }
 0x4bc   :  { %v2325_v46 = vmax.f32 %v2323_v10, %v2324_v39  ;;  %v1799_v8 = vadd.f32 %v1798_v60, %v5518_v15  ;;  %3226 = vmatpush.msra.mxu0 %v2719_v7  ;;  %v2412_v5 = vrot.slane %v2182_v18, 6  ;;  %v2648_v60 = vld [vmem:[#allocation9 + $0x5e8] sm:$0xff] }
 0x4bd   :  { %v2346_v26 = vmax.f32 %v2344_v2, %v2345_v19  ;;  %v2055_v20 = vmax.f32 %v1686_v61, 0.0  ;;  %v2160_v21 = vrot.slane %v2159_v9, 1  ;;  %v2520_v19 = vld [vmem:[#allocation9 + $0x1e8] sm:$0xff] }
 0x4be   :  { %v2326_v63 = vrot.slane %v2325_v46, 2  ;;  %v2056_v30 = vmax.f32 %v1799_v8, 0.0  ;;  %3227 = vmatpush.msra.mxu0 %v2715_v12  ;;  %v2584_v61 = vld [vmem:[#allocation9 + $0x3e8] sm:$0xff] }
 0x4bf   :  { %v2347_v33 = vrot.slane %v2346_v26, 2  ;;  %v2365_v47 = vmax.f32 %v2364_v31, %v2055_v20  ;;  %v2161_v34 = vmax.f32 %v2159_v9, %v2160_v21  ;;  %v2516_v8 = vld [vmem:[#allocation9 + $0x1c8] sm:$0xff] }
 0x4c0   :  { %v2327_v1 = vmax.f32 %v2325_v46, %v2326_v63  ;;  %v2386_v15 = vmax.f32 %v2385_v41, %v2056_v30  ;;  %v2580_v31 = vld [vmem:[#allocation9 + $0x3c8] sm:$0xff] }
 0x4c1   :  { %v2348_v57 = vmax.f32 %v2346_v26, %v2347_v33  ;;  %v2366_v42 = vrot.slane %v2365_v47, 4  ;;  %v2426_v17 = vsel %vm2421_vm4, %v2161_v34, %v2412_v5  ;;  %v2644_v26 = vld [vmem:[#allocation9 + $0x5c8] sm:$0xff] }
 0x4c2   :  { %v2387_v22 = vrot.slane %v2386_v15, 4  ;;  %v2328_v14 = vrot.slane %v2327_v1, 1  ;;  %v2428_v39 = vsel %vm261_vm0, %v2426_v17, %v6200_v56  ;;  %v2708_v20 = vld [vmem:[#allocation9 + $0x7c8] sm:$0xff] }
 0x4c3   :  { %v2349_v51 = vrot.slane %v2348_v57, 1  ;;  %v2367_v3 = vmax.f32 %v2365_v47, %v2366_v42  ;;  %v2576_v41 = vld [vmem:[#allocation9 + $0x3a8] sm:$0xff] }
 0x4c4   :  { %v2388_v35 = vmax.f32 %v2386_v15, %v2387_v22  ;;  %v2329_v52 = vmax.f32 %v2327_v1, %v2328_v14  ;;  %v2640_v63 = vld [vmem:[#allocation9 + $0x5a8] sm:$0xff] }
 0x4c5   :  { %v2350_v13 = vmax.f32 %v2348_v57, %v2349_v51  ;;  %v2368_v43 = vrot.slane %v2367_v3, 2  ;;  %v2704_v30 = vld [vmem:[#allocation9 + $0x7a8] sm:$0xff] }
 0x4c6   :  { %v2389_v58 = vrot.slane %v2388_v35, 2  ;;  %v2508_v7 = vld [vmem:[#allocation9 + $0x188] sm:$0xff] }
 0x4c7   :  { %v2418_v32 = vrot.slane %v2350_v13, 6  ;;  %v2369_v49 = vmax.f32 %v2367_v3, %v2368_v43  ;;  %v2636_v33 = vld [vmem:[#allocation9 + $0x588] sm:$0xff] }
 0x4c8   :  { %v2390_v62 = vmax.f32 %v2388_v35, %v2389_v58  ;;  %v2700_v47 = vld [vmem:[#allocation9 + $0x788] sm:$0xff] }
 0x4c9   :  { %v2432_v53 = vsel %vm2421_vm4, %v2329_v52, %v2418_v32  ;;  %v2370_v44 = vrot.slane %v2369_v49, 1  ;;  %v2504_v12 = vld [vmem:[#allocation9 + $0x168] sm:$0xff] }
 0x4ca   :  { %v2391_v10 = vrot.slane %v2390_v62, 1  ;;  %v2632_v23 = vld [vmem:[#allocation9 + $0x568] sm:$0xff] }
 0x4cb   :  { %v2371_v27 = vmax.f32 %v2369_v49, %v2370_v44  ;;  %v2696_v1 = vld [vmem:[#allocation9 + $0x768] sm:$0xff] }
 0x4cc   :  { %v2392_v25 = vmax.f32 %v2390_v62, %v2391_v10  ;;  %v2500_v15 = vld [vmem:[#allocation9 + $0x148] sm:$0xff] }
 0x4cd   :  { %v2419_v38 = vrot.slane %v2371_v27, 4  ;;  %v2564_v57 = vld [vmem:[#allocation9 + $0x348] sm:$0xff] }
 0x4ce   :  { %v2420_v2 = vrot.slane %v2392_v25, 2  ;;  %v2628_v42 = vld [vmem:[#allocation9 + $0x548] sm:$0xff] }
 0x4cf   :  { %v2496_v22 = vld [vmem:[#allocation9 + $0x128] sm:$0xff] }
 0x4d0   :  { %v2433_v36 = vsel %vm2423_vm3, %v2419_v38, %v2420_v2  ;;  %v2560_v14 = vld [vmem:[#allocation9 + $0x328] sm:$0xff] }
 0x4d1   :  { %v2434_v16 = vsel %vm261_vm0, %v2432_v53, %v2433_v36  ;;  %v2624_v51 = vld [vmem:[#allocation9 + $0x528] sm:$0xff] }
 0x4d2   :  { %v2450_v59 = vrot.slane %v2434_v16, 7  ;;  %v2688_v3 = vld [vmem:[#allocation9 + $0x728] sm:$0xff] }
 0x4d3   :  { %v2492_v37 = vld [vmem:[#allocation9 + $0x108] sm:$0xff] }
 0x4d4   :  { %v2451_v48 = vsel %vm2440_vm5, %v2450_v59, %v2428_v39  ;;  %v2556_v35 = vld [vmem:[#allocation9 + $0x308] sm:$0xff] }
 0x4d5   :  { %v2452_v0 = vsel %vm2442_vm6, %v2450_v59, %v2451_v48  ;;  %v2620_v13 = vld [vmem:[#allocation9 + $0x508] sm:$0xff] }
 0x4d6   :  { %v2453_v28 = vsel %vm2444_vm7, %v2450_v59, %v2452_v0  ;;  %v2684_v43 = vld [vmem:[#allocation9 + $0x708] sm:$0xff] }
 0x4d7   :  { %v2454_v40 = vsel %vm2446_vm8, %v2450_v59, %v2453_v28  ;;  %v2488_v24 = vld [vmem:[#allocation9 + $0xe8] sm:$0xff] }
 0x4d8   :  { %3115 = vst [vmem:[#allocation1 + $0x20] ss:$4 sm:$0xff] %v2454_v40  ;;  %v2552_v58 = vld [vmem:[#allocation9 + $0x2e8] sm:$0xff] }
 0x4d9   :  { %v2616_v52 = vld [vmem:[#allocation9 + $0x4e8] sm:$0xff] }
 0x4da   :  { %v2680_v32 = vld [vmem:[#allocation9 + $0x6e8] sm:$0xff] }
 0x4db   :  { %v2484_v49 = vld [vmem:[#allocation9 + $0xc8] sm:$0xff] }
 0x4dc   :  { %v2548_v9 = vld [vmem:[#allocation9 + $0x2c8] sm:$0xff] }
 0x4dd   :  { %v2612_v62 = vld [vmem:[#allocation9 + $0x4c8] sm:$0xff] }
 0x4de   :  { %v2676_v53 = vld [vmem:[#allocation9 + $0x6c8] sm:$0xff] }
 0x4df   :  { %v5989_v45 = vld.sshfl [vmem:[#allocation1 + $0x20] sm:$0xff pattern:$0x73625140]  ;;  %v5991_v29 = vld.sshfl [vmem:[#allocation1 + $0x28] sm:$0xff pattern:$0x73625140] }
 0x4e0   :  { %3228 = vmatmul.f32.vlgmr.msra.gmra.mxu0 %v5989_v45  ;;  %3248 = vmatmul.f32.vlgmr.msra.gmra.mxu1 %v5991_v29  ;;  %v5995_v50 = vld.sshfl [vmem:[#allocation1 + $0x30] sm:$0xff pattern:$0x73625140]  ;;  %v5997_v46 = vld.sshfl [vmem:[#allocation1 + $0x38] sm:$0xff pattern:$0x73625140] }
 0x4e1   :  { %3268 = vmatmul.f32.vlgmr.msra.gmra.mxu2 %v5995_v50  ;;  %3288 = vmatmul.f32.vlgmr.msra.gmra.mxu3 %v5997_v46  ;;  %v2480_v44 = vld [vmem:[#allocation9 + $0xa8] sm:$0xff] }
 0x4e2   :  { %3292 = vmatpush.msra.mxu0 %v2520_v19  ;;  %3312 = vmatpush.msra.mxu1 %v2584_v61  ;;  %v2544_v18 = vld [vmem:[#allocation9 + $0x2a8] sm:$0xff] }
 0x4e3   :  { %3332 = vmatpush.msra.mxu2 %v2648_v60  ;;  %3352 = vmatpush.msra.mxu3 %v2712_v55  ;;  %v2608_v10 = vld [vmem:[#allocation9 + $0x4a8] sm:$0xff] }
 0x4e4   :  { %3293 = vmatpush.msra.mxu0 %v2516_v8  ;;  %3313 = vmatpush.msra.mxu1 %v2580_v31  ;;  %v2672_v27 = vld [vmem:[#allocation9 + $0x6a8] sm:$0xff] }
 0x4e5   :  { %3333 = vmatpush.msra.mxu2 %v2644_v26  ;;  %3353 = vmatpush.msra.mxu3 %v2708_v20  ;;  %v2476_v21 = vld [vmem:[#allocation9 + $0x88] sm:$0xff]  ;;  %v6004_v20 = vld.sshfl [vmem:[#allocation1 + $0x8] sm:$0xff pattern:$0x73625140] }
 0x4e6   :  { %3294 = vmatpush.msra.mxu0 %v2512_v4  ;;  %3314 = vmatpush.msra.mxu1 %v2576_v41  ;;  %v2540_v25 = vld [vmem:[#allocation9 + $0x288] sm:$0xff] }
 0x4e7   :  { %3334 = vmatpush.msra.mxu2 %v2640_v63  ;;  %3354 = vmatpush.msra.mxu3 %v2704_v30  ;;  %v2604_v38 = vld [vmem:[#allocation9 + $0x488] sm:$0xff]  ;;  %v6007_v63 = vld.sshfl [vmem:[#allocation1 + $0x10] sm:$0xff pattern:$0x73625140] }
 0x4e8   :  { %3295 = vmatpush.msra.mxu0 %v2508_v7  ;;  %3315 = vmatpush.msra.mxu1 %v2572_v54  ;;  %v2668_v5 = vld [vmem:[#allocation9 + $0x688] sm:$0xff]  ;;  %v6010_v30 = vld.sshfl [vmem:[#allocation1 + $0x18] sm:$0xff pattern:$0x73625140] }
 0x4e9   :  { %3335 = vmatpush.msra.mxu2 %v2636_v33  ;;  %3355 = vmatpush.msra.mxu3 %v2700_v47  ;;  %v2472_v2 = vld [vmem:[#allocation9 + $0x68] sm:$0xff] }
 0x4ea   :  { %3296 = vmatpush.msra.mxu0 %v2504_v12  ;;  %3316 = vmatpush.msra.mxu1 %v2568_v6  ;;  %v2536_v34 = vld [vmem:[#allocation9 + $0x268] sm:$0xff] }
 0x4eb   :  { %3336 = vmatpush.msra.mxu2 %v2632_v23  ;;  %3356 = vmatpush.msra.mxu3 %v2696_v1  ;;  %v2600_v36 = vld [vmem:[#allocation9 + $0x468] sm:$0xff] }
 0x4ec   :  { %3297 = vmatpush.msra.mxu0 %v2500_v15  ;;  %3317 = vmatpush.msra.mxu1 %v2564_v57  ;;  %v2664_v16 = vld [vmem:[#allocation9 + $0x668] sm:$0xff] }
 0x4ed   :  { %3337 = vmatpush.msra.mxu2 %v2628_v42  ;;  %3357 = vmatpush.msra.mxu3 %v2692_v11  ;;  %v2468_v17 = vld [vmem:[#allocation9 + $0x48] sm:$0xff] }
 0x4ee   :  { %3298 = vmatpush.msra.mxu0 %v2496_v22  ;;  %3318 = vmatpush.msra.mxu1 %v2560_v14  ;;  %v2532_v59 = vld [vmem:[#allocation9 + $0x248] sm:$0xff] }
 0x4ef   :  { %3338 = vmatpush.msra.mxu2 %v2624_v51  ;;  %3358 = vmatpush.msra.mxu3 %v2688_v3  ;;  %v2596_v56 = vld [vmem:[#allocation9 + $0x448] sm:$0xff] }
 0x4f0   :  { %3299 = vmatpush.msra.mxu0 %v2492_v37  ;;  %3319 = vmatpush.msra.mxu1 %v2556_v35  ;;  %v2660_v39 = vld [vmem:[#allocation9 + $0x648] sm:$0xff] }
 0x4f1   :  { %3339 = vmatpush.msra.mxu2 %v2620_v13  ;;  %3359 = vmatpush.msra.mxu3 %v2684_v43  ;;  %v2464_v48 = vld [vmem:[#allocation9 + $0x28] sm:$0xff] }
 0x4f2   :  { %3300 = vmatpush.msra.mxu0 %v2488_v24  ;;  %3320 = vmatpush.msra.mxu1 %v2552_v58  ;;  %v2528_v0 = vld [vmem:[#allocation9 + $0x228] sm:$0xff] }
 0x4f3   :  { %3340 = vmatpush.msra.mxu2 %v2616_v52  ;;  %3360 = vmatpush.msra.mxu3 %v2680_v32  ;;  %v2592_v28 = vld [vmem:[#allocation9 + $0x428] sm:$0xff] }
 0x4f4   :  { %3301 = vmatpush.msra.mxu0 %v2484_v49  ;;  %3321 = vmatpush.msra.mxu1 %v2548_v9  ;;  %v2656_v40 = vld [vmem:[#allocation9 + $0x628] sm:$0xff] }
 0x4f5   :  { %3341 = vmatpush.msra.mxu2 %v2612_v62  ;;  %3361 = vmatpush.msra.mxu3 %v2676_v53  ;;  %v2460_v19 = vld [vmem:[#allocation9 + $0x8] sm:$0xff] }
 0x4f6   :  { %3302 = vmatpush.msra.mxu0 %v2480_v44  ;;  %3322 = vmatpush.msra.mxu1 %v2544_v18  ;;  %v2524_v61 = vld [vmem:[#allocation9 + $0x208] sm:$0xff] }
 0x4f7   :  { %3342 = vmatpush.msra.mxu2 %v2608_v10  ;;  %3362 = vmatpush.msra.mxu3 %v2672_v27  ;;  %v2588_v60 = vld [vmem:[#allocation9 + $0x408] sm:$0xff] }
 0x4f8   :  { %3303 = vmatpush.msra.mxu0 %v2476_v21  ;;  %3323 = vmatpush.msra.mxu1 %v2540_v25  ;;  %v2652_v55 = vld [vmem:[#allocation9 + $0x608] sm:$0xff] }
 0x4f9   :  { %3343 = vmatpush.msra.mxu2 %v2604_v38  ;;  %3363 = vmatpush.msra.mxu3 %v2668_v5  ;;  %v2776_v8 = vld [vmem:[#allocation9 + $0x9e8] sm:$0xff] }
 0x4fa   :  { %3304 = vmatpush.msra.mxu0 %v2472_v2  ;;  %3324 = vmatpush.msra.mxu1 %v2536_v34  ;;  %v2840_v31 = vld [vmem:[#allocation9 + $0xbe8] sm:$0xff] }
 0x4fb   :  { %3344 = vmatpush.msra.mxu2 %v2600_v36  ;;  %3364 = vmatpush.msra.mxu3 %v2664_v16  ;;  %v6001_v26 = vld.sshfl [vmem:[#allocation1] sm:$0xff pattern:$0x73625140] }
 0x4fc   :  { %3305 = vmatpush.msra.mxu0 %v2468_v17  ;;  %3325 = vmatpush.msra.mxu1 %v2532_v59  ;;  %v2904_v4 = vld [vmem:[#allocation9 + $0xde8] sm:$0xff] }
 0x4fd   :  { %3345 = vmatpush.msra.mxu2 %v2596_v56  ;;  %3365 = vmatpush.msra.mxu3 %v2660_v39  ;;  %v2968_v41 = vld [vmem:[#allocation9 + $0xfe8] sm:$0xff] }
 0x4fe   :  { %3306 = vmatpush.msra.mxu0 %v2464_v48  ;;  %3326 = vmatpush.msra.mxu1 %v2528_v0  ;;  %v2772_v7 = vld [vmem:[#allocation9 + $0x9c8] sm:$0xff] }
 0x4ff   :  { %3346 = vmatpush.msra.mxu2 %v2592_v28  ;;  %3366 = vmatpush.msra.mxu3 %v2656_v40  ;;  %v2836_v54 = vld [vmem:[#allocation9 + $0xbc8] sm:$0xff] }
 0x500   :  { %3307 = vmatpush.msra.mxu0 %v2460_v19  ;;  %3327 = vmatpush.msra.mxu1 %v2524_v61  ;;  %v2900_v33 = vld [vmem:[#allocation9 + $0xdc8] sm:$0xff] }
 0x501   :  { %3347 = vmatpush.msra.mxu2 %v2588_v60  ;;  %3367 = vmatpush.msra.mxu3 %v2652_v55  ;;  %v2964_v47 = vld [vmem:[#allocation9 + $0xfc8] sm:$0xff] }
 0x502   :  { %3308 = vmatmul.f32.vlgmr.msra.gmra.mxu0 %v6001_v26  ;;  %3328 = vmatmul.f32.vlgmr.msra.gmra.mxu1 %v6004_v20  ;;  %v2768_v12 = vld [vmem:[#allocation9 + $0x9a8] sm:$0xff] }
 0x503   :  { %3348 = vmatmul.f32.vlgmr.msra.gmra.mxu2 %v6007_v63  ;;  %3368 = vmatmul.f32.vlgmr.msra.gmra.mxu3 %v6010_v30  ;;  %v2832_v6 = vld [vmem:[#allocation9 + $0xba8] sm:$0xff] }
 0x504   :  { %3372 = vmatpush.msra.mxu0 %v2776_v8  ;;  %3392 = vmatpush.msra.mxu1 %v2840_v31  ;;  %v2896_v23 = vld [vmem:[#allocation9 + $0xda8] sm:$0xff] }
 0x505   :  { %3412 = vmatpush.msra.mxu2 %v2904_v4  ;;  %3432 = vmatpush.msra.mxu3 %v2968_v41  ;;  %v2960_v1 = vld [vmem:[#allocation9 + $0xfa8] sm:$0xff] }
 0x506   :  { %3373 = vmatpush.msra.mxu0 %v2772_v7  ;;  %3393 = vmatpush.msra.mxu1 %v2836_v54  ;;  %v2764_v15 = vld [vmem:[#allocation9 + $0x988] sm:$0xff] }
 0x507   :  { %3413 = vmatpush.msra.mxu2 %v2900_v33  ;;  %3433 = vmatpush.msra.mxu3 %v2964_v47  ;;  %v2828_v57 = vld [vmem:[#allocation9 + $0xb88] sm:$0xff] }
 0x508   :  { %3374 = vmatpush.msra.mxu0 %v2768_v12  ;;  %3394 = vmatpush.msra.mxu1 %v2832_v6  ;;  %v2892_v42 = vld [vmem:[#allocation9 + $0xd88] sm:$0xff]  ;;  %v2521_v12 = vld [vmem:[#allocation9 + $0x1f0] sm:$0xff] }
 0x509   :  { %v2956_v11 = vld [vmem:[#allocation9 + $0xf88] sm:$0xff]  ;;  %3414 = vmatpush.msra.mxu2 %v2896_v23  ;;  %3434 = vmatpush.msra.mxu3 %v2960_v1  ;;  %v2585_v6 = vld [vmem:[#allocation9 + $0x3f0] sm:$0xff] }
 0x50a   :  { %v2760_v22 = vld [vmem:[#allocation9 + $0x968] sm:$0xff]  ;;  %3375 = vmatpush.msra.mxu0 %v2764_v15  ;;  %3395 = vmatpush.msra.mxu1 %v2828_v57  ;;  %v2649_v23 = vld [vmem:[#allocation9 + $0x5f0] sm:$0xff] }
 0x50b   :  { %v2824_v14 = vld [vmem:[#allocation9 + $0xb68] sm:$0xff]  ;;  %3415 = vmatpush.msra.mxu2 %v2892_v42  ;;  %3435 = vmatpush.msra.mxu3 %v2956_v11  ;;  %v2713_v1 = vld [vmem:[#allocation9 + $0x7f0] sm:$0xff] }
 0x50c   :  { %v2888_v51 = vld [vmem:[#allocation9 + $0xd68] sm:$0xff]  ;;  %3376 = vmatpush.msra.mxu0 %v2760_v22  ;;  %3396 = vmatpush.msra.mxu1 %v2824_v14  ;;  %v2517_v15 = vld [vmem:[#allocation9 + $0x1d0] sm:$0xff] }
 0x50d   :  { %v2952_v3 = vld [vmem:[#allocation9 + $0xf68] sm:$0xff]  ;;  %3416 = vmatpush.msra.mxu2 %v2888_v51  ;;  %v2581_v57 = vld [vmem:[#allocation9 + $0x3d0] sm:$0xff] }
 0x50e   :  { %v2756_v37 = vld [vmem:[#allocation9 + $0x948] sm:$0xff]  ;;  %3436 = vmatpush.msra.mxu3 %v2952_v3  ;;  %v2645_v42 = vld [vmem:[#allocation9 + $0x5d0] sm:$0xff] }
 0x50f   :  { %v2820_v35 = vld [vmem:[#allocation9 + $0xb48] sm:$0xff]  ;;  %3377 = vmatpush.msra.mxu0 %v2756_v37  ;;  %v2709_v11 = vld [vmem:[#allocation9 + $0x7d0] sm:$0xff] }
 0x510   :  { %v2884_v13 = vld [vmem:[#allocation9 + $0xd48] sm:$0xff]  ;;  %3397 = vmatpush.msra.mxu1 %v2820_v35  ;;  %v2513_v22 = vld [vmem:[#allocation9 + $0x1b0] sm:$0xff] }
 0x511   :  { %v2948_v43 = vld [vmem:[#allocation9 + $0xf48] sm:$0xff]  ;;  %3417 = vmatpush.msra.mxu2 %v2884_v13  ;;  %v2577_v14 = vld [vmem:[#allocation9 + $0x3b0] sm:$0xff] }
 0x512   :  { %v2752_v24 = vld [vmem:[#allocation9 + $0x928] sm:$0xff]  ;;  %3437 = vmatpush.msra.mxu3 %v2948_v43  ;;  %v2509_v51 = vld [vmem:[#allocation9 + $0x190] sm:$0xff] }
 0x513   :  { %v2816_v58 = vld [vmem:[#allocation9 + $0xb28] sm:$0xff]  ;;  %3378 = vmatpush.msra.mxu0 %v2752_v24  ;;  %v2701_v3 = vld [vmem:[#allocation9 + $0x790] sm:$0xff] }
 0x514   :  { %v2880_v52 = vld [vmem:[#allocation9 + $0xd28] sm:$0xff]  ;;  %3398 = vmatpush.msra.mxu1 %v2816_v58  ;;  %v2505_v37 = vld [vmem:[#allocation9 + $0x170] sm:$0xff] }
 0x515   :  { %v2944_v32 = vld [vmem:[#allocation9 + $0xf28] sm:$0xff]  ;;  %3418 = vmatpush.msra.mxu2 %v2880_v52  ;;  %v2569_v35 = vld [vmem:[#allocation9 + $0x370] sm:$0xff] }
 0x516   :  { %v2748_v49 = vld [vmem:[#allocation9 + $0x908] sm:$0xff]  ;;  %3438 = vmatpush.msra.mxu3 %v2944_v32  ;;  %v2633_v13 = vld [vmem:[#allocation9 + $0x570] sm:$0xff] }
 0x517   :  { %v2812_v9 = vld [vmem:[#allocation9 + $0xb08] sm:$0xff]  ;;  %3379 = vmatpush.msra.mxu0 %v2748_v49  ;;  %v2697_v43 = vld [vmem:[#allocation9 + $0x770] sm:$0xff] }
 0x518   :  { %v2876_v62 = vld [vmem:[#allocation9 + $0xd08] sm:$0xff]  ;;  %3399 = vmatpush.msra.mxu1 %v2812_v9  ;;  %v2501_v24 = vld [vmem:[#allocation9 + $0x150] sm:$0xff] }
 0x519   :  { %v2940_v53 = vld [vmem:[#allocation9 + $0xf08] sm:$0xff]  ;;  %3419 = vmatpush.msra.mxu2 %v2876_v62  ;;  %v2565_v58 = vld [vmem:[#allocation9 + $0x350] sm:$0xff] }
 0x51a   :  { %v2744_v44 = vld [vmem:[#allocation9 + $0x8e8] sm:$0xff]  ;;  %3439 = vmatpush.msra.mxu3 %v2940_v53  ;;  %v2629_v52 = vld [vmem:[#allocation9 + $0x550] sm:$0xff] }
 0x51b   :  { %v2808_v18 = vld [vmem:[#allocation9 + $0xae8] sm:$0xff]  ;;  %3380 = vmatpush.msra.mxu0 %v2744_v44  ;;  %v2693_v32 = vld [vmem:[#allocation9 + $0x750] sm:$0xff] }
 0x51c   :  { %v2872_v10 = vld [vmem:[#allocation9 + $0xce8] sm:$0xff]  ;;  %3400 = vmatpush.msra.mxu1 %v2808_v18  ;;  %v2497_v49 = vld [vmem:[#allocation9 + $0x130] sm:$0xff] }
 0x51d   :  { %v2936_v27 = vld [vmem:[#allocation9 + $0xee8] sm:$0xff]  ;;  %3420 = vmatpush.msra.mxu2 %v2872_v10  ;;  %v2561_v9 = vld [vmem:[#allocation9 + $0x330] sm:$0xff] }
 0x51e   :  { %v2740_v21 = vld [vmem:[#allocation9 + $0x8c8] sm:$0xff]  ;;  %3440 = vmatpush.msra.mxu3 %v2936_v27  ;;  %v2625_v62 = vld [vmem:[#allocation9 + $0x530] sm:$0xff] }
 0x51f   :  { %v2804_v25 = vld [vmem:[#allocation9 + $0xac8] sm:$0xff]  ;;  %3381 = vmatpush.msra.mxu0 %v2740_v21  ;;  %v2689_v53 = vld [vmem:[#allocation9 + $0x730] sm:$0xff] }
 0x520   :  { %v2868_v38 = vld [vmem:[#allocation9 + $0xcc8] sm:$0xff]  ;;  %3401 = vmatpush.msra.mxu1 %v2804_v25  ;;  %v2493_v44 = vld [vmem:[#allocation9 + $0x110] sm:$0xff] }
 0x521   :  { %v2932_v5 = vld [vmem:[#allocation9 + $0xec8] sm:$0xff]  ;;  %3421 = vmatpush.msra.mxu2 %v2868_v38  ;;  %v2557_v18 = vld [vmem:[#allocation9 + $0x310] sm:$0xff] }
 0x522   :  { %v2736_v2 = vld [vmem:[#allocation9 + $0x8a8] sm:$0xff]  ;;  %3441 = vmatpush.msra.mxu3 %v2932_v5  ;;  %v2621_v10 = vld [vmem:[#allocation9 + $0x510] sm:$0xff] }
 0x523   :  { %v2800_v34 = vld [vmem:[#allocation9 + $0xaa8] sm:$0xff]  ;;  %3382 = vmatpush.msra.mxu0 %v2736_v2  ;;  %v2685_v27 = vld [vmem:[#allocation9 + $0x710] sm:$0xff] }
 0x524   :  { %v2864_v36 = vld [vmem:[#allocation9 + $0xca8] sm:$0xff]  ;;  %3402 = vmatpush.msra.mxu1 %v2800_v34  ;;  %v2489_v21 = vld [vmem:[#allocation9 + $0xf0] sm:$0xff] }
 0x525   :  { %v2928_v16 = vld [vmem:[#allocation9 + $0xea8] sm:$0xff]  ;;  %3422 = vmatpush.msra.mxu2 %v2864_v36  ;;  %v2553_v25 = vld [vmem:[#allocation9 + $0x2f0] sm:$0xff] }
 0x526   :  { %v2732_v17 = vld [vmem:[#allocation9 + $0x888] sm:$0xff]  ;;  %3442 = vmatpush.msra.mxu3 %v2928_v16  ;;  %v2617_v38 = vld [vmem:[#allocation9 + $0x4f0] sm:$0xff] }
 0x527   :  { %v2796_v59 = vld [vmem:[#allocation9 + $0xa88] sm:$0xff]  ;;  %3383 = vmatpush.msra.mxu0 %v2732_v17  ;;  %v2681_v5 = vld [vmem:[#allocation9 + $0x6f0] sm:$0xff] }
 0x528   :  { %v2860_v56 = vld [vmem:[#allocation9 + $0xc88] sm:$0xff]  ;;  %3403 = vmatpush.msra.mxu1 %v2796_v59  ;;  %v2485_v2 = vld [vmem:[#allocation9 + $0xd0] sm:$0xff] }
 0x529   :  { %v2924_v39 = vld [vmem:[#allocation9 + $0xe88] sm:$0xff]  ;;  %3423 = vmatpush.msra.mxu2 %v2860_v56  ;;  %v2549_v34 = vld [vmem:[#allocation9 + $0x2d0] sm:$0xff] }
 0x52a   :  { %v2728_v48 = vld [vmem:[#allocation9 + $0x868] sm:$0xff]  ;;  %3443 = vmatpush.msra.mxu3 %v2924_v39  ;;  %v2613_v36 = vld [vmem:[#allocation9 + $0x4d0] sm:$0xff] }
 0x52b   :  { %v2792_v0 = vld [vmem:[#allocation9 + $0xa68] sm:$0xff]  ;;  %3384 = vmatpush.msra.mxu0 %v2728_v48  ;;  %v2677_v16 = vld [vmem:[#allocation9 + $0x6d0] sm:$0xff] }
 0x52c   :  { %v2856_v28 = vld [vmem:[#allocation9 + $0xc68] sm:$0xff]  ;;  %3404 = vmatpush.msra.mxu1 %v2792_v0  ;;  %v2481_v17 = vld [vmem:[#allocation9 + $0xb0] sm:$0xff] }
 0x52d   :  { %v2920_v40 = vld [vmem:[#allocation9 + $0xe68] sm:$0xff]  ;;  %3424 = vmatpush.msra.mxu2 %v2856_v28  ;;  %v2545_v59 = vld [vmem:[#allocation9 + $0x2b0] sm:$0xff] }
 0x52e   :  { %v2724_v19 = vld [vmem:[#allocation9 + $0x848] sm:$0xff]  ;;  %3444 = vmatpush.msra.mxu3 %v2920_v40  ;;  %v2609_v56 = vld [vmem:[#allocation9 + $0x4b0] sm:$0xff] }
 0x52f   :  { %v2788_v61 = vld [vmem:[#allocation9 + $0xa48] sm:$0xff]  ;;  %3385 = vmatpush.msra.mxu0 %v2724_v19  ;;  %v2673_v39 = vld [vmem:[#allocation9 + $0x6b0] sm:$0xff] }
 0x530   :  { %v2852_v60 = vld [vmem:[#allocation9 + $0xc48] sm:$0xff]  ;;  %3405 = vmatpush.msra.mxu1 %v2788_v61  ;;  %v2477_v48 = vld [vmem:[#allocation9 + $0x90] sm:$0xff] }
 0x531   :  { %v2916_v55 = vld [vmem:[#allocation9 + $0xe48] sm:$0xff]  ;;  %3425 = vmatpush.msra.mxu2 %v2852_v60  ;;  %v2541_v0 = vld [vmem:[#allocation9 + $0x290] sm:$0xff] }
 0x532   :  { %v2720_v8 = vld [vmem:[#allocation9 + $0x828] sm:$0xff]  ;;  %3445 = vmatpush.msra.mxu3 %v2916_v55  ;;  %v2605_v28 = vld [vmem:[#allocation9 + $0x490] sm:$0xff] }
 0x533   :  { %v2784_v31 = vld [vmem:[#allocation9 + $0xa28] sm:$0xff]  ;;  %3386 = vmatpush.msra.mxu0 %v2720_v8  ;;  %v2669_v40 = vld [vmem:[#allocation9 + $0x690] sm:$0xff] }
 0x534   :  { %v2848_v4 = vld [vmem:[#allocation9 + $0xc28] sm:$0xff]  ;;  %3406 = vmatpush.msra.mxu1 %v2784_v31  ;;  %v2473_v19 = vld [vmem:[#allocation9 + $0x70] sm:$0xff] }
 0x535   :  { %v2912_v41 = vld [vmem:[#allocation9 + $0xe28] sm:$0xff]  ;;  %3426 = vmatpush.msra.mxu2 %v2848_v4  ;;  %v2537_v61 = vld [vmem:[#allocation9 + $0x270] sm:$0xff] }
 0x536   :  { %v2716_v7 = vld [vmem:[#allocation9 + $0x808] sm:$0xff]  ;;  %3446 = vmatpush.msra.mxu3 %v2912_v41  ;;  %v2601_v60 = vld [vmem:[#allocation9 + $0x470] sm:$0xff] }
 0x537   :  { %v2780_v54 = vld [vmem:[#allocation9 + $0xa08] sm:$0xff]  ;;  %3387 = vmatpush.msra.mxu0 %v2716_v7  ;;  %v2665_v55 = vld [vmem:[#allocation9 + $0x670] sm:$0xff] }
 0x538   :  { %v2844_v33 = vld [vmem:[#allocation9 + $0xc08] sm:$0xff]  ;;  %3407 = vmatpush.msra.mxu1 %v2780_v54  ;;  %3388 = vmatmul.f32.vlgmr.msra.gmra.mxu0 %v5989_v45  ;;  %v2641_v45 = vld [vmem:[#allocation9 + $0x5b0] sm:$0xff] }
 0x539   :  { %v2908_v47 = vld [vmem:[#allocation9 + $0xe08] sm:$0xff]  ;;  %3427 = vmatpush.msra.mxu2 %v2844_v33  ;;  %3408 = vmatmul.f32.vlgmr.msra.gmra.mxu1 %v5991_v29  ;;  %v2705_v29 = vld [vmem:[#allocation9 + $0x7b0] sm:$0xff] }
 0x53a   :  { %3447 = vmatpush.msra.mxu3 %v2908_v47  ;;  %3428 = vmatmul.f32.vlgmr.msra.gmra.mxu2 %v5995_v50  ;;  %v2573_v50 = vld [vmem:[#allocation9 + $0x390] sm:$0xff] }
 0x53b   :  { %3448 = vmatmul.f32.vlgmr.msra.gmra.mxu3 %v5997_v46  ;;  %3452 = vmatpush.msra.mxu0 %v2521_v12  ;;  %v2637_v46 = vld [vmem:[#allocation9 + $0x590] sm:$0xff] }
 0x53c   :  { %3472 = vmatpush.msra.mxu1 %v2585_v6  ;;  %3492 = vmatpush.msra.mxu2 %v2649_v23  ;;  %v2469_v8 = vld [vmem:[#allocation9 + $0x50] sm:$0xff] }
 0x53d   :  { %3512 = vmatpush.msra.mxu3 %v2713_v1  ;;  %3453 = vmatpush.msra.mxu0 %v2517_v15  ;;  %v2533_v31 = vld [vmem:[#allocation9 + $0x250] sm:$0xff] }
 0x53e   :  { %3473 = vmatpush.msra.mxu1 %v2581_v57  ;;  %3493 = vmatpush.msra.mxu2 %v2645_v42  ;;  %v2597_v4 = vld [vmem:[#allocation9 + $0x450] sm:$0xff] }
 0x53f   :  { %3513 = vmatpush.msra.mxu3 %v2709_v11  ;;  %3454 = vmatpush.msra.mxu0 %v2513_v22  ;;  %v2661_v41 = vld [vmem:[#allocation9 + $0x650] sm:$0xff] }
 0x540   :  { %3474 = vmatpush.msra.mxu1 %v2577_v14  ;;  %3494 = vmatpush.msra.mxu2 %v2641_v45  ;;  %v2465_v7 = vld [vmem:[#allocation9 + $0x30] sm:$0xff] }
 0x541   :  { %3514 = vmatpush.msra.mxu3 %v2705_v29  ;;  %3455 = vmatpush.msra.mxu0 %v2509_v51  ;;  %v2529_v54 = vld [vmem:[#allocation9 + $0x230] sm:$0xff] }
 0x542   :  { %3475 = vmatpush.msra.mxu1 %v2573_v50  ;;  %3495 = vmatpush.msra.mxu2 %v2637_v46  ;;  %v2593_v33 = vld [vmem:[#allocation9 + $0x430] sm:$0xff] }
 0x543   :  { %3515 = vmatpush.msra.mxu3 %v2701_v3  ;;  %3456 = vmatpush.msra.mxu0 %v2505_v37  ;;  %v2657_v47 = vld [vmem:[#allocation9 + $0x630] sm:$0xff] }
 0x544   :  { %3476 = vmatpush.msra.mxu1 %v2569_v35  ;;  %3496 = vmatpush.msra.mxu2 %v2633_v13  ;;  %v2461_v12 = vld [vmem:[#allocation9 + $0x10] sm:$0xff] }
 0x545   :  { %3516 = vmatpush.msra.mxu3 %v2697_v43  ;;  %3457 = vmatpush.msra.mxu0 %v2501_v24  ;;  %v2525_v6 = vld [vmem:[#allocation9 + $0x210] sm:$0xff] }
 0x546   :  { %3477 = vmatpush.msra.mxu1 %v2565_v58  ;;  %3497 = vmatpush.msra.mxu2 %v2629_v52  ;;  %v2589_v23 = vld [vmem:[#allocation9 + $0x410] sm:$0xff] }
 0x547   :  { %3517 = vmatpush.msra.mxu3 %v2693_v32  ;;  %3458 = vmatpush.msra.mxu0 %v2497_v49  ;;  %v2653_v1 = vld [vmem:[#allocation9 + $0x610] sm:$0xff] }
 0x548   :  { %3478 = vmatpush.msra.mxu1 %v2561_v9  ;;  %3498 = vmatpush.msra.mxu2 %v2625_v62  ;;  %v2777_v15 = vld [vmem:[#allocation9 + $0x9f0] sm:$0xff] }
 0x549   :  { %3518 = vmatpush.msra.mxu3 %v2689_v53  ;;  %3459 = vmatpush.msra.mxu0 %v2493_v44  ;;  %v2841_v57 = vld [vmem:[#allocation9 + $0xbf0] sm:$0xff] }
 0x54a   :  { %3479 = vmatpush.msra.mxu1 %v2557_v18  ;;  %3499 = vmatpush.msra.mxu2 %v2621_v10  ;;  %v2905_v42 = vld [vmem:[#allocation9 + $0xdf0] sm:$0xff] }
 0x54b   :  { %3519 = vmatpush.msra.mxu3 %v2685_v27  ;;  %3460 = vmatpush.msra.mxu0 %v2489_v21  ;;  %v2969_v11 = vld [vmem:[#allocation9 + $0xff0] sm:$0xff] }
 0x54c   :  { %3480 = vmatpush.msra.mxu1 %v2553_v25  ;;  %3500 = vmatpush.msra.mxu2 %v2617_v38  ;;  %v2773_v22 = vld [vmem:[#allocation9 + $0x9d0] sm:$0xff] }
 0x54d   :  { %3520 = vmatpush.msra.mxu3 %v2681_v5  ;;  %3461 = vmatpush.msra.mxu0 %v2485_v2  ;;  %v2837_v14 = vld [vmem:[#allocation9 + $0xbd0] sm:$0xff] }
 0x54e   :  { %3481 = vmatpush.msra.mxu1 %v2549_v34  ;;  %3501 = vmatpush.msra.mxu2 %v2613_v36  ;;  %v2901_v45 = vld [vmem:[#allocation9 + $0xdd0] sm:$0xff] }
 0x54f   :  { %3521 = vmatpush.msra.mxu3 %v2677_v16  ;;  %3462 = vmatpush.msra.mxu0 %v2481_v17  ;;  %v2965_v29 = vld [vmem:[#allocation9 + $0xfd0] sm:$0xff] }
 0x550   :  { %3482 = vmatpush.msra.mxu1 %v2545_v59  ;;  %3502 = vmatpush.msra.mxu2 %v2609_v56  ;;  %v2769_v51 = vld [vmem:[#allocation9 + $0x9b0] sm:$0xff] }
 0x551   :  { %3522 = vmatpush.msra.mxu3 %v2673_v39  ;;  %3463 = vmatpush.msra.mxu0 %v2477_v48  ;;  %v2833_v50 = vld [vmem:[#allocation9 + $0xbb0] sm:$0xff] }
 0x552   :  { %3483 = vmatpush.msra.mxu1 %v2541_v0  ;;  %3503 = vmatpush.msra.mxu2 %v2605_v28  ;;  %v2765_v46 = vld [vmem:[#allocation9 + $0x990] sm:$0xff] }
 0x553   :  { %3523 = vmatpush.msra.mxu3 %v2669_v40  ;;  %3464 = vmatpush.msra.mxu0 %v2473_v19  ;;  %v2957_v3 = vld [vmem:[#allocation9 + $0xf90] sm:$0xff] }
 0x554   :  { %3484 = vmatpush.msra.mxu1 %v2537_v61  ;;  %3504 = vmatpush.msra.mxu2 %v2601_v60  ;;  %v2761_v37 = vld [vmem:[#allocation9 + $0x970] sm:$0xff] }
 0x555   :  { %3524 = vmatpush.msra.mxu3 %v2665_v55  ;;  %3465 = vmatpush.msra.mxu0 %v2469_v8  ;;  %v2825_v35 = vld [vmem:[#allocation9 + $0xb70] sm:$0xff] }
 0x556   :  { %3485 = vmatpush.msra.mxu1 %v2533_v31  ;;  %3505 = vmatpush.msra.mxu2 %v2597_v4  ;;  %v2889_v13 = vld [vmem:[#allocation9 + $0xd70] sm:$0xff] }
 0x557   :  { %3525 = vmatpush.msra.mxu3 %v2661_v41  ;;  %3466 = vmatpush.msra.mxu0 %v2465_v7  ;;  %v2953_v43 = vld [vmem:[#allocation9 + $0xf70] sm:$0xff] }
 0x558   :  { %3486 = vmatpush.msra.mxu1 %v2529_v54  ;;  %3506 = vmatpush.msra.mxu2 %v2593_v33  ;;  %v2757_v24 = vld [vmem:[#allocation9 + $0x950] sm:$0xff] }
 0x559   :  { %3526 = vmatpush.msra.mxu3 %v2657_v47  ;;  %3467 = vmatpush.msra.mxu0 %v2461_v12  ;;  %v2821_v58 = vld [vmem:[#allocation9 + $0xb50] sm:$0xff] }
 0x55a   :  { %3487 = vmatpush.msra.mxu1 %v2525_v6  ;;  %3507 = vmatpush.msra.mxu2 %v2589_v23  ;;  %v2885_v52 = vld [vmem:[#allocation9 + $0xd50] sm:$0xff] }
 0x55b   :  { %3527 = vmatpush.msra.mxu3 %v2653_v1  ;;  %3468 = vmatmul.f32.vlgmr.msra.gmra.mxu0 %v6001_v26  ;;  %v2897_v26 = vld [vmem:[#allocation9 + $0xdb0] sm:$0xff] }
 0x55c   :  { %3488 = vmatmul.f32.vlgmr.msra.gmra.mxu1 %v6004_v20  ;;  %3508 = vmatmul.f32.vlgmr.msra.gmra.mxu2 %v6007_v63  ;;  %v2961_v20 = vld [vmem:[#allocation9 + $0xfb0] sm:$0xff] }
 0x55d   :  { %3528 = vmatmul.f32.vlgmr.msra.gmra.mxu3 %v6010_v30  ;;  %3532 = vmatpush.msra.mxu0 %v2777_v15  ;;  %v2829_v63 = vld [vmem:[#allocation9 + $0xb90] sm:$0xff]  ;;  %v2522_v15 = vld [vmem:[#allocation9 + $0x1f8] sm:$0xff] }
 0x55e   :  { %3552 = vmatpush.msra.mxu1 %v2841_v57  ;;  %3572 = vmatpush.msra.mxu2 %v2905_v42  ;;  %v2893_v30 = vld [vmem:[#allocation9 + $0xd90] sm:$0xff]  ;;  %v2586_v57 = vld [vmem:[#allocation9 + $0x3f8] sm:$0xff]  ;;  %v6021_v42 = vld.sshfl [vmem:[#allocation1 + $0x20] sm:$0xff pattern:$0x73625140] }
 0x55f   :  { %3592 = vmatpush.msra.mxu3 %v2969_v11  ;;  %3533 = vmatpush.msra.mxu0 %v2773_v22  ;;  %v2949_v32 = vld [vmem:[#allocation9 + $0xf50] sm:$0xff]  ;;  %v2650_v22 = vld [vmem:[#allocation9 + $0x5f8] sm:$0xff] }
 0x560   :  { %3553 = vmatpush.msra.mxu1 %v2837_v14  ;;  %3573 = vmatpush.msra.mxu2 %v2901_v45  ;;  %v2753_v49 = vld [vmem:[#allocation9 + $0x930] sm:$0xff]  ;;  %v2714_v14 = vld [vmem:[#allocation9 + $0x7f8] sm:$0xff] }
 0x561   :  { %3593 = vmatpush.msra.mxu3 %v2965_v29  ;;  %3534 = vmatpush.msra.mxu0 %v2769_v51  ;;  %v2817_v9 = vld [vmem:[#allocation9 + $0xb30] sm:$0xff]  ;;  %v6027_v45 = vld.sshfl [vmem:[#allocation1 + $0x30] sm:$0xff pattern:$0x73625140] }
 0x562   :  { %3554 = vmatpush.msra.mxu1 %v2833_v50  ;;  %3574 = vmatpush.msra.mxu2 %v2897_v26  ;;  %v2881_v62 = vld [vmem:[#allocation9 + $0xd30] sm:$0xff]  ;;  %v6030_v29 = vld.sshfl [vmem:[#allocation1 + $0x38] sm:$0xff pattern:$0x73625140]  ;;  %v2518_v51 = vld [vmem:[#allocation9 + $0x1d8] sm:$0xff] }
 0x563   :  { %3594 = vmatpush.msra.mxu3 %v2961_v20  ;;  %3535 = vmatpush.msra.mxu0 %v2765_v46  ;;  %v2945_v53 = vld [vmem:[#allocation9 + $0xf30] sm:$0xff]  ;;  %v2582_v50 = vld [vmem:[#allocation9 + $0x3d8] sm:$0xff] }
 0x564   :  { %3555 = vmatpush.msra.mxu1 %v2829_v63  ;;  %3575 = vmatpush.msra.mxu2 %v2893_v30  ;;  %v2749_v44 = vld [vmem:[#allocation9 + $0x910] sm:$0xff]  ;;  %v2646_v26 = vld [vmem:[#allocation9 + $0x5d8] sm:$0xff] }
 0x565   :  { %3595 = vmatpush.msra.mxu3 %v2957_v3  ;;  %3536 = vmatpush.msra.mxu0 %v2761_v37  ;;  %v2813_v18 = vld [vmem:[#allocation9 + $0xb10] sm:$0xff]  ;;  %v2710_v20 = vld [vmem:[#allocation9 + $0x7d8] sm:$0xff] }
 0x566   :  { %3556 = vmatpush.msra.mxu1 %v2825_v35  ;;  %3576 = vmatpush.msra.mxu2 %v2889_v13  ;;  %v2877_v10 = vld [vmem:[#allocation9 + $0xd10] sm:$0xff]  ;;  %v2514_v46 = vld [vmem:[#allocation9 + $0x1b8] sm:$0xff] }
 0x567   :  { %3596 = vmatpush.msra.mxu3 %v2953_v43  ;;  %3537 = vmatpush.msra.mxu0 %v2757_v24  ;;  %v2941_v27 = vld [vmem:[#allocation9 + $0xf10] sm:$0xff]  ;;  %v2578_v63 = vld [vmem:[#allocation9 + $0x3b8] sm:$0xff] }
 0x568   :  { %3557 = vmatpush.msra.mxu1 %v2821_v58  ;;  %3577 = vmatpush.msra.mxu2 %v2885_v52  ;;  %v2745_v21 = vld [vmem:[#allocation9 + $0x8f0] sm:$0xff]  ;;  %v2642_v30 = vld [vmem:[#allocation9 + $0x5b8] sm:$0xff] }
 0x569   :  { %3597 = vmatpush.msra.mxu3 %v2949_v32  ;;  %3538 = vmatpush.msra.mxu0 %v2753_v49  ;;  %v2809_v25 = vld [vmem:[#allocation9 + $0xaf0] sm:$0xff]  ;;  %v2706_v3 = vld [vmem:[#allocation9 + $0x7b8] sm:$0xff] }
 0x56a   :  { %3558 = vmatpush.msra.mxu1 %v2817_v9  ;;  %3578 = vmatpush.msra.mxu2 %v2881_v62  ;;  %v2873_v38 = vld [vmem:[#allocation9 + $0xcf0] sm:$0xff]  ;;  %v2510_v37 = vld [vmem:[#allocation9 + $0x198] sm:$0xff] }
 0x56b   :  { %3598 = vmatpush.msra.mxu3 %v2945_v53  ;;  %3539 = vmatpush.msra.mxu0 %v2749_v44  ;;  %v2937_v5 = vld [vmem:[#allocation9 + $0xef0] sm:$0xff]  ;;  %v2574_v35 = vld [vmem:[#allocation9 + $0x398] sm:$0xff] }
 0x56c   :  { %3559 = vmatpush.msra.mxu1 %v2813_v18  ;;  %3579 = vmatpush.msra.mxu2 %v2877_v10  ;;  %v2741_v2 = vld [vmem:[#allocation9 + $0x8d0] sm:$0xff]  ;;  %v2638_v13 = vld [vmem:[#allocation9 + $0x598] sm:$0xff] }
 0x56d   :  { %3599 = vmatpush.msra.mxu3 %v2941_v27  ;;  %v2805_v34 = vld [vmem:[#allocation9 + $0xad0] sm:$0xff]  ;;  %3540 = vmatpush.msra.mxu0 %v2745_v21  ;;  %v2702_v43 = vld [vmem:[#allocation9 + $0x798] sm:$0xff] }
 0x56e   :  { %3560 = vmatpush.msra.mxu1 %v2809_v25  ;;  %v2869_v36 = vld [vmem:[#allocation9 + $0xcd0] sm:$0xff]  ;;  %3580 = vmatpush.msra.mxu2 %v2873_v38  ;;  %v2506_v24 = vld [vmem:[#allocation9 + $0x178] sm:$0xff] }
 0x56f   :  { %v2933_v16 = vld [vmem:[#allocation9 + $0xed0] sm:$0xff]  ;;  %3600 = vmatpush.msra.mxu3 %v2937_v5  ;;  %3541 = vmatpush.msra.mxu0 %v2741_v2  ;;  %v2570_v58 = vld [vmem:[#allocation9 + $0x378] sm:$0xff] }
 0x570   :  { %v2737_v17 = vld [vmem:[#allocation9 + $0x8b0] sm:$0xff]  ;;  %3561 = vmatpush.msra.mxu1 %v2805_v34  ;;  %3581 = vmatpush.msra.mxu2 %v2869_v36  ;;  %v2634_v52 = vld [vmem:[#allocation9 + $0x578] sm:$0xff] }
 0x571   :  { %v2801_v59 = vld [vmem:[#allocation9 + $0xab0] sm:$0xff]  ;;  %3601 = vmatpush.msra.mxu3 %v2933_v16  ;;  %3542 = vmatpush.msra.mxu0 %v2737_v17  ;;  %v2698_v32 = vld [vmem:[#allocation9 + $0x778] sm:$0xff] }
 0x572   :  { %v2865_v56 = vld [vmem:[#allocation9 + $0xcb0] sm:$0xff]  ;;  %3562 = vmatpush.msra.mxu1 %v2801_v59  ;;  %v2502_v49 = vld [vmem:[#allocation9 + $0x158] sm:$0xff] }
 0x573   :  { %v2929_v39 = vld [vmem:[#allocation9 + $0xeb0] sm:$0xff]  ;;  %3582 = vmatpush.msra.mxu2 %v2865_v56  ;;  %v2566_v9 = vld [vmem:[#allocation9 + $0x358] sm:$0xff] }
 0x574   :  { %v2733_v48 = vld [vmem:[#allocation9 + $0x890] sm:$0xff]  ;;  %3602 = vmatpush.msra.mxu3 %v2929_v39  ;;  %v2630_v62 = vld [vmem:[#allocation9 + $0x558] sm:$0xff] }
 0x575   :  { %v2797_v0 = vld [vmem:[#allocation9 + $0xa90] sm:$0xff]  ;;  %3543 = vmatpush.msra.mxu0 %v2733_v48  ;;  %v2694_v53 = vld [vmem:[#allocation9 + $0x758] sm:$0xff] }
 0x576   :  { %v2861_v28 = vld [vmem:[#allocation9 + $0xc90] sm:$0xff]  ;;  %3563 = vmatpush.msra.mxu1 %v2797_v0  ;;  %v2498_v44 = vld [vmem:[#allocation9 + $0x138] sm:$0xff] }
 0x577   :  { %v2925_v40 = vld [vmem:[#allocation9 + $0xe90] sm:$0xff]  ;;  %3583 = vmatpush.msra.mxu2 %v2861_v28  ;;  %v2562_v18 = vld [vmem:[#allocation9 + $0x338] sm:$0xff] }
 0x578   :  { %v2729_v19 = vld [vmem:[#allocation9 + $0x870] sm:$0xff]  ;;  %3603 = vmatpush.msra.mxu3 %v2925_v40  ;;  %v2626_v10 = vld [vmem:[#allocation9 + $0x538] sm:$0xff] }
 0x579   :  { %v2793_v61 = vld [vmem:[#allocation9 + $0xa70] sm:$0xff]  ;;  %3544 = vmatpush.msra.mxu0 %v2729_v19  ;;  %v2690_v27 = vld [vmem:[#allocation9 + $0x738] sm:$0xff] }
 0x57a   :  { %v2857_v60 = vld [vmem:[#allocation9 + $0xc70] sm:$0xff]  ;;  %3564 = vmatpush.msra.mxu1 %v2793_v61  ;;  %v2494_v21 = vld [vmem:[#allocation9 + $0x118] sm:$0xff] }
 0x57b   :  { %v2921_v55 = vld [vmem:[#allocation9 + $0xe70] sm:$0xff]  ;;  %3584 = vmatpush.msra.mxu2 %v2857_v60  ;;  %v2558_v25 = vld [vmem:[#allocation9 + $0x318] sm:$0xff] }
 0x57c   :  { %v2725_v8 = vld [vmem:[#allocation9 + $0x850] sm:$0xff]  ;;  %3604 = vmatpush.msra.mxu3 %v2921_v55  ;;  %v2622_v38 = vld [vmem:[#allocation9 + $0x518] sm:$0xff] }
 0x57d   :  { %v2789_v31 = vld [vmem:[#allocation9 + $0xa50] sm:$0xff]  ;;  %3545 = vmatpush.msra.mxu0 %v2725_v8  ;;  %v2686_v5 = vld [vmem:[#allocation9 + $0x718] sm:$0xff] }
 0x57e   :  { %v2853_v4 = vld [vmem:[#allocation9 + $0xc50] sm:$0xff]  ;;  %3565 = vmatpush.msra.mxu1 %v2789_v31  ;;  %v2490_v2 = vld [vmem:[#allocation9 + $0xf8] sm:$0xff] }
 0x57f   :  { %v2917_v41 = vld [vmem:[#allocation9 + $0xe50] sm:$0xff]  ;;  %3585 = vmatpush.msra.mxu2 %v2853_v4  ;;  %v2554_v34 = vld [vmem:[#allocation9 + $0x2f8] sm:$0xff] }
 0x580   :  { %v2721_v7 = vld [vmem:[#allocation9 + $0x830] sm:$0xff]  ;;  %3605 = vmatpush.msra.mxu3 %v2917_v41  ;;  %v2618_v36 = vld [vmem:[#allocation9 + $0x4f8] sm:$0xff] }
 0x581   :  { %v2785_v54 = vld [vmem:[#allocation9 + $0xa30] sm:$0xff]  ;;  %3546 = vmatpush.msra.mxu0 %v2721_v7  ;;  %v2682_v16 = vld [vmem:[#allocation9 + $0x6f8] sm:$0xff] }
 0x582   :  { %v2849_v33 = vld [vmem:[#allocation9 + $0xc30] sm:$0xff]  ;;  %3566 = vmatpush.msra.mxu1 %v2785_v54  ;;  %v2486_v17 = vld [vmem:[#allocation9 + $0xd8] sm:$0xff] }
 0x583   :  { %v2913_v47 = vld [vmem:[#allocation9 + $0xe30] sm:$0xff]  ;;  %3586 = vmatpush.msra.mxu2 %v2849_v33  ;;  %v2550_v59 = vld [vmem:[#allocation9 + $0x2d8] sm:$0xff] }
 0x584   :  { %v2717_v12 = vld [vmem:[#allocation9 + $0x810] sm:$0xff]  ;;  %3606 = vmatpush.msra.mxu3 %v2913_v47  ;;  %v2614_v56 = vld [vmem:[#allocation9 + $0x4d8] sm:$0xff] }
 0x585   :  { %v2781_v6 = vld [vmem:[#allocation9 + $0xa10] sm:$0xff]  ;;  %3547 = vmatpush.msra.mxu0 %v2717_v12  ;;  %v2678_v39 = vld [vmem:[#allocation9 + $0x6d8] sm:$0xff] }
 0x586   :  { %v2845_v23 = vld [vmem:[#allocation9 + $0xc10] sm:$0xff]  ;;  %3567 = vmatpush.msra.mxu1 %v2781_v6  ;;  %3548 = vmatmul.f32.vlgmr.msra.gmra.mxu0 %v6021_v42  ;;  %v2482_v48 = vld [vmem:[#allocation9 + $0xb8] sm:$0xff] }
 0x587   :  { %v2909_v1 = vld [vmem:[#allocation9 + $0xe10] sm:$0xff]  ;;  %3587 = vmatpush.msra.mxu2 %v2845_v23  ;;  %3612 = vmatpush.msra.mxu0 %v2522_v15  ;;  %v2546_v0 = vld [vmem:[#allocation9 + $0x2b8] sm:$0xff] }
 0x588   :  { %3607 = vmatpush.msra.mxu3 %v2909_v1  ;;  %v6024_v11 = vld.sshfl [vmem:[#allocation1 + $0x28] sm:$0xff pattern:$0x73625140]  ;;  %3588 = vmatmul.f32.vlgmr.msra.gmra.mxu2 %v6027_v45  ;;  %v2610_v28 = vld [vmem:[#allocation9 + $0x4b8] sm:$0xff] }
 0x589   :  { %3568 = vmatmul.f32.vlgmr.msra.gmra.mxu1 %v6024_v11  ;;  %3608 = vmatmul.f32.vlgmr.msra.gmra.mxu3 %v6030_v29  ;;  %v2674_v40 = vld [vmem:[#allocation9 + $0x6b8] sm:$0xff] }
 0x58a   :  { %3632 = vmatpush.msra.mxu1 %v2586_v57  ;;  %3652 = vmatpush.msra.mxu2 %v2650_v22  ;;  %v2478_v19 = vld [vmem:[#allocation9 + $0x98] sm:$0xff] }
 0x58b   :  { %3672 = vmatpush.msra.mxu3 %v2714_v14  ;;  %3613 = vmatpush.msra.mxu0 %v2518_v51  ;;  %v2542_v61 = vld [vmem:[#allocation9 + $0x298] sm:$0xff] }
 0x58c   :  { %3633 = vmatpush.msra.mxu1 %v2582_v50  ;;  %3653 = vmatpush.msra.mxu2 %v2646_v26  ;;  %v2606_v60 = vld [vmem:[#allocation9 + $0x498] sm:$0xff]  ;;  %v4347_v26 = vld.sshfl [vmem:[#allocation1] sm:$0xff pattern:$0x73625140] }
 0x58d   :  { %3673 = vmatpush.msra.mxu3 %v2710_v20  ;;  %3614 = vmatpush.msra.mxu0 %v2514_v46  ;;  %v2670_v55 = vld [vmem:[#allocation9 + $0x698] sm:$0xff]  ;;  %v4348_v20 = vld.sshfl [vmem:[#allocation1 + $0x8] sm:$0xff pattern:$0x73625140] }
 0x58e   :  { %3634 = vmatpush.msra.mxu1 %v2578_v63  ;;  %3654 = vmatpush.msra.mxu2 %v2642_v30  ;;  %v2474_v8 = vld [vmem:[#allocation9 + $0x78] sm:$0xff] }
 0x58f   :  { %3674 = vmatpush.msra.mxu3 %v2706_v3  ;;  %3615 = vmatpush.msra.mxu0 %v2510_v37  ;;  %v2538_v31 = vld [vmem:[#allocation9 + $0x278] sm:$0xff]  ;;  %v4350_v3 = vld.sshfl [vmem:[#allocation1 + $0x18] sm:$0xff pattern:$0x73625140] }
 0x590   :  { %3635 = vmatpush.msra.mxu1 %v2574_v35  ;;  %3655 = vmatpush.msra.mxu2 %v2638_v13  ;;  %v2602_v4 = vld [vmem:[#allocation9 + $0x478] sm:$0xff] }
 0x591   :  { %3675 = vmatpush.msra.mxu3 %v2702_v43  ;;  %3616 = vmatpush.msra.mxu0 %v2506_v24  ;;  %v2666_v41 = vld [vmem:[#allocation9 + $0x678] sm:$0xff] }
 0x592   :  { %3636 = vmatpush.msra.mxu1 %v2570_v58  ;;  %3656 = vmatpush.msra.mxu2 %v2634_v52  ;;  %v2470_v7 = vld [vmem:[#allocation9 + $0x58] sm:$0xff] }
 0x593   :  { %3676 = vmatpush.msra.mxu3 %v2698_v32  ;;  %3617 = vmatpush.msra.mxu0 %v2502_v49  ;;  %v2534_v54 = vld [vmem:[#allocation9 + $0x258] sm:$0xff] }
 0x594   :  { %3637 = vmatpush.msra.mxu1 %v2566_v9  ;;  %3657 = vmatpush.msra.mxu2 %v2630_v62  ;;  %v2598_v33 = vld [vmem:[#allocation9 + $0x458] sm:$0xff] }
 0x595   :  { %3677 = vmatpush.msra.mxu3 %v2694_v53  ;;  %3618 = vmatpush.msra.mxu0 %v2498_v44  ;;  %v2662_v47 = vld [vmem:[#allocation9 + $0x658] sm:$0xff] }
 0x596   :  { %3638 = vmatpush.msra.mxu1 %v2562_v18  ;;  %3658 = vmatpush.msra.mxu2 %v2626_v10  ;;  %v2466_v12 = vld [vmem:[#allocation9 + $0x38] sm:$0xff] }
 0x597   :  { %3678 = vmatpush.msra.mxu3 %v2690_v27  ;;  %3619 = vmatpush.msra.mxu0 %v2494_v21  ;;  %v2530_v6 = vld [vmem:[#allocation9 + $0x238] sm:$0xff] }
 0x598   :  { %3639 = vmatpush.msra.mxu1 %v2558_v25  ;;  %3659 = vmatpush.msra.mxu2 %v2622_v38  ;;  %v2594_v23 = vld [vmem:[#allocation9 + $0x438] sm:$0xff] }
 0x599   :  { %3679 = vmatpush.msra.mxu3 %v2686_v5  ;;  %3620 = vmatpush.msra.mxu0 %v2490_v2  ;;  %v2658_v1 = vld [vmem:[#allocation9 + $0x638] sm:$0xff] }
 0x59a   :  { %3640 = vmatpush.msra.mxu1 %v2554_v34  ;;  %3660 = vmatpush.msra.mxu2 %v2618_v36  ;;  %v2462_v15 = vld [vmem:[#allocation9 + $0x18] sm:$0xff]  ;;  %v6033_v36 = vpop.f32.mrf.mxu0 }
 0x59b   :  { %3680 = vmatpush.msra.mxu3 %v2682_v16  ;;  %3621 = vmatpush.msra.mxu0 %v2486_v17  ;;  %v2526_v57 = vld [vmem:[#allocation9 + $0x218] sm:$0xff] }
 0x59c   :  { %3641 = vmatpush.msra.mxu1 %v2550_v59  ;;  %3661 = vmatpush.msra.mxu2 %v2614_v56  ;;  %v2590_v22 = vld [vmem:[#allocation9 + $0x418] sm:$0xff] }
 0x59d   :  { %3681 = vmatpush.msra.mxu3 %v2678_v39  ;;  %3622 = vmatpush.msra.mxu0 %v2482_v48  ;;  %v2654_v14 = vld [vmem:[#allocation9 + $0x618] sm:$0xff] }
 0x59e   :  { %3642 = vmatpush.msra.mxu1 %v2546_v0  ;;  %3662 = vmatpush.msra.mxu2 %v2610_v28  ;;  %v2778_v51 = vld [vmem:[#allocation9 + $0x9f8] sm:$0xff] }
 0x59f   :  { %3682 = vmatpush.msra.mxu3 %v2674_v40  ;;  %3623 = vmatpush.msra.mxu0 %v2478_v19  ;;  %v2842_v50 = vld [vmem:[#allocation9 + $0xbf8] sm:$0xff] }
 0x5a0   :  { %3643 = vmatpush.msra.mxu1 %v2542_v61  ;;  %3663 = vmatpush.msra.mxu2 %v2606_v60  ;;  %v2906_v46 = vld [vmem:[#allocation9 + $0xdf8] sm:$0xff] }
 0x5a1   :  { %3683 = vmatpush.msra.mxu3 %v2670_v55  ;;  %3624 = vmatpush.msra.mxu0 %v2474_v8  ;;  %v2970_v63 = vld [vmem:[#allocation9 + $0xff8] sm:$0xff]  ;;  %v6035_v55 = vpop.f32.mrf.mxu1 }
 0x5a2   :  { %3644 = vmatpush.msra.mxu1 %v2538_v31  ;;  %3664 = vmatpush.msra.mxu2 %v2602_v4  ;;  %v4349_v30 = vld.sshfl [vmem:[#allocation1 + $0x10] sm:$0xff pattern:$0x73625140] }
 0x5a3   :  { %3684 = vmatpush.msra.mxu3 %v2666_v41  ;;  %3625 = vmatpush.msra.mxu0 %v2470_v7  ;;  %v2774_v37 = vld [vmem:[#allocation9 + $0x9d8] sm:$0xff]  ;;  %v6037_v7 = vpop.f32.mrf.mxu0 }
 0x5a4   :  { %3645 = vmatpush.msra.mxu1 %v2534_v54  ;;  %3665 = vmatpush.msra.mxu2 %v2598_v33  ;;  %v2838_v35 = vld [vmem:[#allocation9 + $0xbd8] sm:$0xff] }
 0x5a5   :  { %3685 = vmatpush.msra.mxu3 %v2662_v47  ;;  %3626 = vmatpush.msra.mxu0 %v2466_v12  ;;  %v2902_v13 = vld [vmem:[#allocation9 + $0xdd8] sm:$0xff] }
 0x5a6   :  { %3646 = vmatpush.msra.mxu1 %v2530_v6  ;;  %3666 = vmatpush.msra.mxu2 %v2594_v23  ;;  %v2966_v43 = vld [vmem:[#allocation9 + $0xfd8] sm:$0xff] }
 0x5a7   :  { %3686 = vmatpush.msra.mxu3 %v2658_v1  ;;  %3627 = vmatpush.msra.mxu0 %v2462_v15  ;;  %v2770_v24 = vld [vmem:[#allocation9 + $0x9b8] sm:$0xff] }
 0x5a8   :  { %3647 = vmatpush.msra.mxu1 %v2526_v57  ;;  %3667 = vmatpush.msra.mxu2 %v2590_v22  ;;  %v2834_v58 = vld [vmem:[#allocation9 + $0xbb8] sm:$0xff] }
 0x5a9   :  { %3687 = vmatpush.msra.mxu3 %v2654_v14  ;;  %3628 = vmatmul.f32.vlgmr.msra.gmra.mxu0 %v4347_v26  ;;  %v2898_v52 = vld [vmem:[#allocation9 + $0xdb8] sm:$0xff] }
 0x5aa   :  { %3648 = vmatmul.f32.vlgmr.msra.gmra.mxu1 %v4348_v20  ;;  %3668 = vmatmul.f32.vlgmr.msra.gmra.mxu2 %v4349_v30  ;;  %v2962_v32 = vld [vmem:[#allocation9 + $0xfb8] sm:$0xff] }
 0x5ab   :  { %3688 = vmatmul.f32.vlgmr.msra.gmra.mxu3 %v4350_v3  ;;  %3692 = vmatpush.msra.mxu0 %v2778_v51  ;;  %v2766_v49 = vld [vmem:[#allocation9 + $0x998] sm:$0xff]  ;;  %v6041_v30 = vpop.f32.mrf.mxu0 }
 0x5ac   :  { %3712 = vmatpush.msra.mxu1 %v2842_v50  ;;  %3732 = vmatpush.msra.mxu2 %v2906_v46  ;;  %v2830_v9 = vld [vmem:[#allocation9 + $0xb98] sm:$0xff]  ;;  %v6039_v50 = vpop.f32.mrf.mxu1 }
 0x5ad   :  { %3752 = vmatpush.msra.mxu3 %v2970_v63  ;;  %3693 = vmatpush.msra.mxu0 %v2774_v37  ;;  %v2894_v62 = vld [vmem:[#allocation9 + $0xd98] sm:$0xff] }
 0x5ae   :  { %3713 = vmatpush.msra.mxu1 %v2838_v35  ;;  %3733 = vmatpush.msra.mxu2 %v2902_v13  ;;  %v2958_v53 = vld [vmem:[#allocation9 + $0xf98] sm:$0xff] }
 0x5af   :  { %3753 = vmatpush.msra.mxu3 %v2966_v43  ;;  %3694 = vmatpush.msra.mxu0 %v2770_v24  ;;  %v2762_v44 = vld [vmem:[#allocation9 + $0x978] sm:$0xff] }
 0x5b0   :  { %3714 = vmatpush.msra.mxu1 %v2834_v58  ;;  %3734 = vmatpush.msra.mxu2 %v2898_v52  ;;  %v2826_v18 = vld [vmem:[#allocation9 + $0xb78] sm:$0xff]  ;;  %v6043_v58 = vld [vmem:[#allocation11] sm:$0xf] }
 0x5b1   :  { %3754 = vmatpush.msra.mxu3 %v2962_v32  ;;  %3695 = vmatpush.msra.mxu0 %v2766_v49  ;;  %v2890_v10 = vld [vmem:[#allocation9 + $0xd78] sm:$0xff] }
 0x5b2   :  { %3715 = vmatpush.msra.mxu1 %v2830_v9  ;;  %v2954_v27 = vld [vmem:[#allocation9 + $0xf78] sm:$0xff]  ;;  %3735 = vmatpush.msra.mxu2 %v2894_v62  ;;  %v6047_v9 = vpop.f32.mrf.mxu2  ;;  %v3103_v62 = vperm.slane %v6043_v58, 0 }
 0x5b3   :  { %3755 = vmatpush.msra.mxu3 %v2958_v53  ;;  %v2758_v21 = vld [vmem:[#allocation9 + $0x958] sm:$0xff]  ;;  %3696 = vmatpush.msra.mxu0 %v2762_v44  ;;  %v3104_v53 = vperm.slane %v6043_v58, 1  ;;  %v2999_v44 = vld [vmem:[#allocation12 + $0xe0] sm:$0xff] }
 0x5b4   :  { %v2822_v25 = vld [vmem:[#allocation9 + $0xb58] sm:$0xff]  ;;  %3716 = vmatpush.msra.mxu1 %v2826_v18  ;;  %3736 = vmatpush.msra.mxu2 %v2890_v10  ;;  %v6045_v49 = vpop.f32.mrf.mxu1  ;;  %v3031_v18 = vld [vmem:[#allocation12 + $0x1e0] sm:$0xff]  ;;  %v3309_v10 = vpop.f32.mrf.mxu0 }
 0x5b5   :  { %v2886_v38 = vld [vmem:[#allocation9 + $0xd58] sm:$0xff]  ;;  %3756 = vmatpush.msra.mxu3 %v2954_v27  ;;  %3697 = vmatpush.msra.mxu0 %v2758_v21 }
 0x5b6   :  { %v2950_v5 = vld [vmem:[#allocation9 + $0xf58] sm:$0xff]  ;;  %3717 = vmatpush.msra.mxu1 %v2822_v25  ;;  %3737 = vmatpush.msra.mxu2 %v2886_v38  ;;  %v2995_v25 = vld [vmem:[#allocation12 + $0xc0] sm:$0xff] }
 0x5b7   :  { %v2754_v2 = vld [vmem:[#allocation9 + $0x938] sm:$0xff]  ;;  %3757 = vmatpush.msra.mxu3 %v2950_v5  ;;  %v3027_v38 = vld [vmem:[#allocation12 + $0x1c0] sm:$0xff]  ;;  %v6056_v5 = vpop.f32.mrf.mxu3 }
 0x5b8   :  { %v2818_v34 = vld [vmem:[#allocation9 + $0xb38] sm:$0xff]  ;;  %3698 = vmatpush.msra.mxu0 %v2754_v2 }
 0x5b9   :  { %v2882_v16 = vld [vmem:[#allocation9 + $0xd38] sm:$0xff]  ;;  %3718 = vmatpush.msra.mxu1 %v2818_v34 }
 0x5ba   :  { %v2946_v17 = vld [vmem:[#allocation9 + $0xf38] sm:$0xff]  ;;  %3738 = vmatpush.msra.mxu2 %v2882_v16  ;;  %v3349_v34 = vpop.f32.mrf.mxu2 }
 0x5bb   :  { %v2750_v59 = vld [vmem:[#allocation9 + $0x918] sm:$0xff]  ;;  %3758 = vmatpush.msra.mxu3 %v2946_v17 }
 0x5bc   :  { %v2814_v56 = vld [vmem:[#allocation9 + $0xb18] sm:$0xff]  ;;  %3699 = vmatpush.msra.mxu0 %v2750_v59  ;;  %v3329_v2 = vpop.f32.mrf.mxu1  ;;  %v2991_v59 = vld [vmem:[#allocation12 + $0xa0] sm:$0xff] }
 0x5bd   :  { %v2878_v39 = vld [vmem:[#allocation9 + $0xd18] sm:$0xff]  ;;  %3719 = vmatpush.msra.mxu1 %v2814_v56  ;;  %v3023_v56 = vld [vmem:[#allocation12 + $0x1a0] sm:$0xff] }
 0x5be   :  { %v2942_v48 = vld [vmem:[#allocation9 + $0xf18] sm:$0xff]  ;;  %3739 = vmatpush.msra.mxu2 %v2878_v39 }
 0x5bf   :  { %v2746_v0 = vld [vmem:[#allocation9 + $0x8f8] sm:$0xff]  ;;  %3759 = vmatpush.msra.mxu3 %v2942_v48 }
 0x5c0   :  { %v2810_v28 = vld [vmem:[#allocation9 + $0xaf8] sm:$0xff]  ;;  %3700 = vmatpush.msra.mxu0 %v2746_v0 }
 0x5c1   :  { %v2874_v40 = vld [vmem:[#allocation9 + $0xcf8] sm:$0xff]  ;;  %3720 = vmatpush.msra.mxu1 %v2810_v28 }
 0x5c2   :  { %v2938_v19 = vld [vmem:[#allocation9 + $0xef8] sm:$0xff]  ;;  %3740 = vmatpush.msra.mxu2 %v2874_v40  ;;  %v3063_v40 = vld [vmem:[#allocation12 + $0x2e0] sm:$0xff] }
 0x5c3   :  { %v2742_v61 = vld [vmem:[#allocation9 + $0x8d8] sm:$0xff]  ;;  %3760 = vmatpush.msra.mxu3 %v2938_v19  ;;  %v2987_v19 = vld [vmem:[#allocation12 + $0x80] sm:$0xff] }
 0x5c4   :  { %v2806_v60 = vld [vmem:[#allocation9 + $0xad8] sm:$0xff]  ;;  %3701 = vmatpush.msra.mxu0 %v2742_v61  ;;  %v3019_v61 = vld [vmem:[#allocation12 + $0x180] sm:$0xff] }
 0x5c5   :  { %v2870_v8 = vld [vmem:[#allocation9 + $0xcd8] sm:$0xff]  ;;  %3721 = vmatpush.msra.mxu1 %v2806_v60  ;;  %v3369_v60 = vpop.f32.mrf.mxu3 }
 0x5c6   :  { %v2934_v31 = vld [vmem:[#allocation9 + $0xed8] sm:$0xff]  ;;  %3741 = vmatpush.msra.mxu2 %v2870_v8 }
 0x5c7   :  { %v2738_v4 = vld [vmem:[#allocation9 + $0x8b8] sm:$0xff]  ;;  %3761 = vmatpush.msra.mxu3 %v2934_v31 }
 0x5c8   :  { %v2802_v41 = vld [vmem:[#allocation9 + $0xab8] sm:$0xff]  ;;  %3702 = vmatpush.msra.mxu0 %v2738_v4 }
 0x5c9   :  { %v2866_v54 = vld [vmem:[#allocation9 + $0xcb8] sm:$0xff]  ;;  %3722 = vmatpush.msra.mxu1 %v2802_v41 }
 0x5ca   :  { %v2930_v33 = vld [vmem:[#allocation9 + $0xeb8] sm:$0xff]  ;;  %3742 = vmatpush.msra.mxu2 %v2866_v54  ;;  %v3059_v54 = vld [vmem:[#allocation12 + $0x2c0] sm:$0xff] }
 0x5cb   :  { %v2734_v47 = vld [vmem:[#allocation9 + $0x898] sm:$0xff]  ;;  %3762 = vmatpush.msra.mxu3 %v2930_v33 }
 0x5cc   :  { %v2798_v12 = vld [vmem:[#allocation9 + $0xa98] sm:$0xff]  ;;  %3703 = vmatpush.msra.mxu0 %v2734_v47 }
 0x5cd   :  { %v2862_v6 = vld [vmem:[#allocation9 + $0xc98] sm:$0xff]  ;;  %3723 = vmatpush.msra.mxu1 %v2798_v12  ;;  %v2983_v12 = vld [vmem:[#allocation12 + $0x60] sm:$0xff] }
 0x5ce   :  { %v2926_v23 = vld [vmem:[#allocation9 + $0xe98] sm:$0xff]  ;;  %3743 = vmatpush.msra.mxu2 %v2862_v6  ;;  %v3015_v6 = vld [vmem:[#allocation12 + $0x160] sm:$0xff] }
 0x5cf   :  { %v2730_v1 = vld [vmem:[#allocation9 + $0x878] sm:$0xff]  ;;  %3763 = vmatpush.msra.mxu3 %v2926_v23 }
 0x5d0   :  { %v2794_v15 = vld [vmem:[#allocation9 + $0xa78] sm:$0xff]  ;;  %3704 = vmatpush.msra.mxu0 %v2730_v1 }
 0x5d1   :  { %v2858_v57 = vld [vmem:[#allocation9 + $0xc78] sm:$0xff]  ;;  %3724 = vmatpush.msra.mxu1 %v2794_v15 }
 0x5d2   :  { %v2922_v22 = vld [vmem:[#allocation9 + $0xe78] sm:$0xff]  ;;  %3744 = vmatpush.msra.mxu2 %v2858_v57  ;;  %v3409_v57 = vpop.f32.mrf.mxu1 }
 0x5d3   :  { %v2726_v14 = vld [vmem:[#allocation9 + $0x858] sm:$0xff]  ;;  %3764 = vmatpush.msra.mxu3 %v2922_v22  ;;  %v3429_v22 = vpop.f32.mrf.mxu2 }
 0x5d4   :  { %v2790_v51 = vld [vmem:[#allocation9 + $0xa58] sm:$0xff]  ;;  %3705 = vmatpush.msra.mxu0 %v2726_v14  ;;  %v3055_v14 = vld [vmem:[#allocation12 + $0x2a0] sm:$0xff] }
 0x5d5   :  { %v2854_v26 = vld [vmem:[#allocation9 + $0xc58] sm:$0xff]  ;;  %3725 = vmatpush.msra.mxu1 %v2790_v51 }
 0x5d6   :  { %v2918_v20 = vld [vmem:[#allocation9 + $0xe58] sm:$0xff]  ;;  %3745 = vmatpush.msra.mxu2 %v2854_v26  ;;  %v2979_v26 = vld [vmem:[#allocation12 + $0x40] sm:$0xff] }
 0x5d7   :  { %v2722_v46 = vld [vmem:[#allocation9 + $0x838] sm:$0xff]  ;;  %3765 = vmatpush.msra.mxu3 %v2918_v20  ;;  %v3011_v20 = vld [vmem:[#allocation12 + $0x140] sm:$0xff] }
 0x5d8   :  { %v2786_v63 = vld [vmem:[#allocation9 + $0xa38] sm:$0xff]  ;;  %3706 = vmatpush.msra.mxu0 %v2722_v46 }
 0x5d9   :  { %v2850_v3 = vld [vmem:[#allocation9 + $0xc38] sm:$0xff]  ;;  %3726 = vmatpush.msra.mxu1 %v2786_v63 }
 0x5da   :  { %v2914_v37 = vld [vmem:[#allocation9 + $0xe38] sm:$0xff]  ;;  %3746 = vmatpush.msra.mxu2 %v2850_v3 }
 0x5db   :  { %v2718_v35 = vld [vmem:[#allocation9 + $0x818] sm:$0xff]  ;;  %3766 = vmatpush.msra.mxu3 %v2914_v37 }
 0x5dc   :  { %v2782_v13 = vld [vmem:[#allocation9 + $0xa18] sm:$0xff]  ;;  %3707 = vmatpush.msra.mxu0 %v2718_v35  ;;  %v3051_v35 = vld [vmem:[#allocation12 + $0x280] sm:$0xff] }
 0x5dd   :  { %v2846_v43 = vld [vmem:[#allocation9 + $0xc18] sm:$0xff]  ;;  %3727 = vmatpush.msra.mxu1 %v2782_v13  ;;  %3708 = vmatmul.f32.vlgmr.msra.gmra.mxu0 %v6021_v42  ;;  %v3150_v42 = vadd.f32 %v6033_v36, %v3103_v62  ;;  %v2975_v13 = vld [vmem:[#allocation12 + $0x20] sm:$0xff] }
 0x5de   :  { %v2910_v24 = vld [vmem:[#allocation9 + $0xe18] sm:$0xff]  ;;  %3747 = vmatpush.msra.mxu2 %v2846_v43  ;;  %3728 = vmatmul.f32.vlgmr.msra.gmra.mxu1 %v6024_v11  ;;  %v3310_v11 = vadd.f32 %v3309_v10, %v3104_v53  ;;  %v3007_v43 = vld [vmem:[#allocation12 + $0x120] sm:$0xff] }
 0x5df   :  { %3767 = vmatpush.msra.mxu3 %v2910_v24  ;;  %v3001_v52 = vld [vmem:[#allocation12 + $0xf0] sm:$0xff]  ;;  %3748 = vmatmul.f32.vlgmr.msra.gmra.mxu2 %v6027_v45  ;;  %v3170_v16 = vadd.f32 %v6035_v55, %v3150_v42  ;;  %v3389_v55 = vpop.f32.mrf.mxu0  ;;  %v3449_v24 = vpop.f32.mrf.mxu3  ;;  %v3047_v53 = vld [vmem:[#allocation12 + $0x260] sm:$0xff]  ;;  %v3002_v42 = vld [vmem:[#allocation12 + $0xf8] sm:$0xff] }
 0x5e0   :  { %v3033_v32 = vld [vmem:[#allocation12 + $0x1f0] sm:$0xff]  ;;  %3768 = vmatmul.f32.vlgmr.msra.gmra.mxu3 %v6030_v29  ;;  %3782 = vmatpush.msra.mxu0 %v3001_v52  ;;  %v3330_v17 = vadd.f32 %v3329_v2, %v3310_v11  ;;  %v3034_v11 = vld [vmem:[#allocation12 + $0x1f8] sm:$0xff] }
 0x5e1   :  { %3802 = vmatpush.msra.mxu1 %v3033_v32  ;;  %v2997_v27 = vld [vmem:[#allocation12 + $0xd0] sm:$0xff]  ;;  %v3190_v39 = vadd.f32 %v6037_v7, %v3170_v16  ;;  %v3030_v2 = vld [vmem:[#allocation12 + $0x1d8] sm:$0xff]  ;;  %v2996_v16 = vld [vmem:[#allocation12 + $0xc8] sm:$0xff] }
 0x5e2   :  { %v3029_v21 = vld [vmem:[#allocation12 + $0x1d0] sm:$0xff]  ;;  %3783 = vmatpush.msra.mxu0 %v2999_v44  ;;  %v3350_v48 = vadd.f32 %v3349_v34, %v3330_v17  ;;  %v2971_v44 = vld [vmem:[#allocation12] sm:$0xff]  ;;  %v3028_v17 = vld [vmem:[#allocation12 + $0x1c8] sm:$0xff] }
 0x5e3   :  { %3803 = vmatpush.msra.mxu1 %v3031_v18  ;;  %v2993_v45 = vld [vmem:[#allocation12 + $0xb0] sm:$0xff]  ;;  %v3210_v31 = vadd.f32 %v6039_v50, %v3190_v39  ;;  %v3003_v18 = vld [vmem:[#allocation12 + $0x100] sm:$0xff] }
 0x5e4   :  { %3784 = vmatpush.msra.mxu0 %v2997_v27  ;;  %v3025_v29 = vld [vmem:[#allocation12 + $0x1b0] sm:$0xff]  ;;  %v3370_v4 = vadd.f32 %v3369_v60, %v3350_v48  ;;  %v3039_v34 = vld [vmem:[#allocation12 + $0x220] sm:$0xff]  ;;  %v2992_v48 = vld [vmem:[#allocation12 + $0xa8] sm:$0xff] }
 0x5e5   :  { %3804 = vmatpush.msra.mxu1 %v3029_v21  ;;  %v3065_v36 = vld [vmem:[#allocation12 + $0x2f0] sm:$0xff]  ;;  %v3230_v33 = vadd.f32 %v6041_v30, %v3210_v31  ;;  %v3035_v39 = vld [vmem:[#allocation12 + $0x200] sm:$0xff]  ;;  %v2988_v60 = vld [vmem:[#allocation12 + $0x88] sm:$0xff] }
 0x5e6   :  { %3785 = vmatpush.msra.mxu0 %v2995_v25  ;;  %v2989_v0 = vld [vmem:[#allocation12 + $0x90] sm:$0xff]  ;;  %3822 = vmatpush.msra.mxu2 %v3065_v36  ;;  %v3390_v47 = vadd.f32 %v3389_v55, %v3370_v4  ;;  %v3043_v25 = vld [vmem:[#allocation12 + $0x240] sm:$0xff]  ;;  %v3026_v36 = vld [vmem:[#allocation12 + $0x1b8] sm:$0xff] }
 0x5e7   :  { %3805 = vmatpush.msra.mxu1 %v3027_v38  ;;  %v3021_v28 = vld [vmem:[#allocation12 + $0x190] sm:$0xff]  ;;  %v3250_v51 = vadd.f32 %v6045_v49, %v3230_v33  ;;  %v3000_v38 = vld [vmem:[#allocation12 + $0xe8] sm:$0xff]  ;;  %v2986_v31 = vld [vmem:[#allocation12 + $0x78] sm:$0xff]  ;;  %v3509_v33 = vpop.f32.mrf.mxu2 }
 0x5e8   :  { %3786 = vmatpush.msra.mxu0 %v2993_v45  ;;  %3823 = vmatpush.msra.mxu2 %v3063_v40  ;;  %v3061_v8 = vld [vmem:[#allocation12 + $0x2d0] sm:$0xff]  ;;  %v3410_v50 = vadd.f32 %v3409_v57, %v3390_v47  ;;  %v2990_v40 = vld [vmem:[#allocation12 + $0x98] sm:$0xff]  ;;  %v3020_v55 = vld [vmem:[#allocation12 + $0x188] sm:$0xff] }
 0x5e9   :  { %3806 = vmatpush.msra.mxu1 %v3025_v29  ;;  %v2985_v41 = vld [vmem:[#allocation12 + $0x70] sm:$0xff]  ;;  %v3270_v63 = vadd.f32 %v6047_v9, %v3250_v51  ;;  %v2998_v29 = vld [vmem:[#allocation12 + $0xd8] sm:$0xff] }
 0x5ea   :  { %3787 = vmatpush.msra.mxu0 %v2991_v59  ;;  %v3017_v7 = vld [vmem:[#allocation12 + $0x170] sm:$0xff]  ;;  %3824 = vmatpush.msra.mxu2 %v3061_v8  ;;  %v3430_v30 = vadd.f32 %v3429_v22, %v3410_v50  ;;  %v3018_v4 = vld [vmem:[#allocation12 + $0x178] sm:$0xff]  ;;  %v2976_v50 = vld [vmem:[#allocation12 + $0x28] sm:$0xff] }
 0x5eb   :  { %3807 = vmatpush.msra.mxu1 %v3023_v56  ;;  %v3057_v23 = vld [vmem:[#allocation12 + $0x2b0] sm:$0xff]  ;;  %v6065_v32 = vadd.f32 %v6056_v5, %v3270_v63  ;;  %v3032_v5 = vld [vmem:[#allocation12 + $0x1e8] sm:$0xff]  ;;  %v2994_v56 = vld [vmem:[#allocation12 + $0xb8] sm:$0xff] }
 0x5ec   :  { %3788 = vmatpush.msra.mxu0 %v2989_v0  ;;  %3825 = vmatpush.msra.mxu2 %v3059_v54  ;;  %v2981_v1 = vld [vmem:[#allocation12 + $0x50] sm:$0xff]  ;;  %v6067_v49 = vadd.f32 %v3449_v24, %v3430_v30  ;;  %v3024_v0 = vld [vmem:[#allocation12 + $0x1a8] sm:$0xff]  ;;  %v3489_v54 = vpop.f32.mrf.mxu1  ;;  %v2978_v57 = vld [vmem:[#allocation12 + $0x38] sm:$0xff] }
 0x5ed   :  { %3808 = vmatpush.msra.mxu1 %v3021_v28  ;;  %v3013_v15 = vld [vmem:[#allocation12 + $0x150] sm:$0xff]  ;;  %v3772_v27 = vmax.f32 %v6065_v32, 0.0  ;;  %v3105_v28 = vperm.slane %v6043_v58, 2  ;;  %v3010_v22 = vld [vmem:[#allocation12 + $0x138] sm:$0xff]  ;;  %v3060_v32 = vld [vmem:[#allocation12 + $0x2c8] sm:$0xff] }
 0x5ee   :  { %3789 = vmatpush.msra.mxu0 %v2987_v19  ;;  %3826 = vmatpush.msra.mxu2 %v3057_v23  ;;  %v3053_v46 = vld [vmem:[#allocation12 + $0x290] sm:$0xff]  ;;  %v3773_v21 = vmax.f32 %v6067_v49, 0.0  ;;  %v3022_v19 = vld [vmem:[#allocation12 + $0x198] sm:$0xff]  ;;  %v3091_v49 = vld [vmem:[#allocation12 + $0x3c0] sm:$0xff] }
 0x5ef   :  { %3809 = vmatpush.msra.mxu1 %v3019_v61  ;;  %v2977_v3 = vld [vmem:[#allocation12 + $0x30] sm:$0xff]  ;;  %v3469_v61 = vpop.f32.mrf.mxu0  ;;  %v2974_v63 = vld [vmem:[#allocation12 + $0x18] sm:$0xff] }
 0x5f0   :  { %3790 = vmatpush.msra.mxu0 %v2985_v41  ;;  %3827 = vmatpush.msra.mxu2 %v3055_v14  ;;  %v3009_v37 = vld [vmem:[#allocation12 + $0x130] sm:$0xff]  ;;  %v3470_v8 = vadd.f32 %v3469_v61, %v3105_v28  ;;  %v2984_v41 = vld [vmem:[#allocation12 + $0x68] sm:$0xff]  ;;  %v3529_v14 = vpop.f32.mrf.mxu3  ;;  %v3006_v30 = vld [vmem:[#allocation12 + $0x118] sm:$0xff] }
 0x5f1   :  { %3810 = vmatpush.msra.mxu1 %v3017_v7  ;;  %v3049_v52 = vld [vmem:[#allocation12 + $0x270] sm:$0xff]  ;;  %v3016_v7 = vld [vmem:[#allocation12 + $0x168] sm:$0xff]  ;;  %v3075_v28 = vld [vmem:[#allocation12 + $0x340] sm:$0xff] }
 0x5f2   :  { %3791 = vmatpush.msra.mxu0 %v2983_v12  ;;  %3828 = vmatpush.msra.mxu2 %v3053_v46  ;;  %v2973_v9 = vld [vmem:[#allocation12 + $0x10] sm:$0xff]  ;;  %v3490_v47 = vadd.f32 %v3489_v54, %v3470_v8  ;;  %v2982_v12 = vld [vmem:[#allocation12 + $0x58] sm:$0xff]  ;;  %v3036_v61 = vld [vmem:[#allocation12 + $0x208] sm:$0xff] }
 0x5f3   :  { %3811 = vmatpush.msra.mxu1 %v3015_v6  ;;  %v3005_v62 = vld [vmem:[#allocation12 + $0x110] sm:$0xff]  ;;  %v3014_v6 = vld [vmem:[#allocation12 + $0x158] sm:$0xff]  ;;  %v3067_v8 = vld [vmem:[#allocation12 + $0x300] sm:$0xff] }
 0x5f4   :  { %3792 = vmatpush.msra.mxu0 %v2981_v1  ;;  %3829 = vmatpush.msra.mxu2 %v3051_v35  ;;  %v3045_v10 = vld [vmem:[#allocation12 + $0x250] sm:$0xff]  ;;  %v3510_v23 = vadd.f32 %v3509_v33, %v3490_v47  ;;  %v2980_v1 = vld [vmem:[#allocation12 + $0x48] sm:$0xff] }
 0x5f5   :  { %3812 = vmatpush.msra.mxu1 %v3013_v15  ;;  %v3041_v45 = vld [vmem:[#allocation12 + $0x230] sm:$0xff]  ;;  %v3012_v15 = vld [vmem:[#allocation12 + $0x148] sm:$0xff] }
 0x5f6   :  { %3793 = vmatpush.msra.mxu0 %v2979_v26  ;;  %3830 = vmatpush.msra.mxu2 %v3049_v52  ;;  %v3037_v59 = vld [vmem:[#allocation12 + $0x210] sm:$0xff]  ;;  %v3530_v51 = vadd.f32 %v3529_v14, %v3510_v23  ;;  %v3008_v26 = vld [vmem:[#allocation12 + $0x128] sm:$0xff] }
 0x5f7   :  { %3813 = vmatpush.msra.mxu1 %v3011_v20 }
 0x5f8   :  { %3794 = vmatpush.msra.mxu0 %v2977_v3  ;;  %3831 = vmatpush.msra.mxu2 %v3047_v53  ;;  %v2972_v3 = vld [vmem:[#allocation12 + $0x8] sm:$0xff]  ;;  %v3066_v53 = vld [vmem:[#allocation12 + $0x2f8] sm:$0xff] }
 0x5f9   :  { %3814 = vmatpush.msra.mxu1 %v3009_v37  ;;  %v3004_v37 = vld [vmem:[#allocation12 + $0x108] sm:$0xff] }
 0x5fa   :  { %3795 = vmatpush.msra.mxu0 %v2975_v13  ;;  %3832 = vmatpush.msra.mxu2 %v3045_v10  ;;  %v3095_v10 = vld [vmem:[#allocation12 + $0x3e0] sm:$0xff] }
 0x5fb   :  { %3815 = vmatpush.msra.mxu1 %v3007_v43 }
 0x5fc   :  { %3796 = vmatpush.msra.mxu0 %v2973_v9  ;;  %3833 = vmatpush.msra.mxu2 %v3043_v25  ;;  %v3056_v25 = vld [vmem:[#allocation12 + $0x2a8] sm:$0xff] }
 0x5fd   :  { %3816 = vmatpush.msra.mxu1 %v3005_v62 }
 0x5fe   :  { %3797 = vmatpush.msra.mxu0 %v2971_v44  ;;  %3834 = vmatpush.msra.mxu2 %v3041_v45  ;;  %v3064_v44 = vld [vmem:[#allocation12 + $0x2e8] sm:$0xff]  ;;  %v3085_v45 = vld [vmem:[#allocation12 + $0x390] sm:$0xff] }
 0x5ff   :  { %3817 = vmatpush.msra.mxu1 %v3003_v18  ;;  %3798 = vmatmul.f32.vlgmr.msra.gmra.mxu0 %v3772_v27  ;;  %v3097_v18 = vld [vmem:[#allocation12 + $0x3f0] sm:$0xff] }
 0x600   :  { %3818 = vmatmul.f32.vlgmr.msra.gmra.mxu1 %v3773_v21  ;;  %3862 = vmatpush.msra.mxu0 %v3002_v42  ;;  %v3062_v42 = vld [vmem:[#allocation12 + $0x2d8] sm:$0xff] }
 0x601   :  { %3882 = vmatpush.msra.mxu1 %v3034_v11  ;;  %3835 = vmatpush.msra.mxu2 %v3039_v34  ;;  %v3093_v11 = vld [vmem:[#allocation12 + $0x3d0] sm:$0xff]  ;;  %v3050_v34 = vld [vmem:[#allocation12 + $0x278] sm:$0xff] }
 0x602   :  { %3863 = vmatpush.msra.mxu0 %v3000_v38  ;;  %3842 = vmatpush.msra.mxu3 %v3097_v18  ;;  %v3087_v38 = vld [vmem:[#allocation12 + $0x3a0] sm:$0xff] }
 0x603   :  { %3883 = vmatpush.msra.mxu1 %v3032_v5  ;;  %3836 = vmatpush.msra.mxu2 %v3037_v59  ;;  %v3549_v20 = vpop.f32.mrf.mxu0  ;;  %v3054_v5 = vld [vmem:[#allocation12 + $0x298] sm:$0xff]  ;;  %v3079_v59 = vld [vmem:[#allocation12 + $0x360] sm:$0xff] }
 0x604   :  { %3864 = vmatpush.msra.mxu0 %v2998_v29  ;;  %v3550_v46 = vadd.f32 %v3549_v20, %v3530_v51  ;;  %3843 = vmatpush.msra.mxu3 %v3095_v10  ;;  %v3052_v29 = vld [vmem:[#allocation12 + $0x288] sm:$0xff]  ;;  %v3098_v20 = vld [vmem:[#allocation12 + $0x3f8] sm:$0xff] }
 0x605   :  { %3884 = vmatpush.msra.mxu1 %v3030_v2  ;;  %3837 = vmatpush.msra.mxu2 %v3035_v39  ;;  %v3083_v2 = vld [vmem:[#allocation12 + $0x380] sm:$0xff]  ;;  %v3042_v39 = vld [vmem:[#allocation12 + $0x238] sm:$0xff] }
 0x606   :  { %3865 = vmatpush.msra.mxu0 %v2996_v16  ;;  %v3569_v35 = vpop.f32.mrf.mxu1  ;;  %3844 = vmatpush.msra.mxu3 %v3093_v11  ;;  %v3081_v16 = vld [vmem:[#allocation12 + $0x370] sm:$0xff]  ;;  %v3959_v18 = vld [vmem:[#allocation15 + $0x78] sm:$0xff]  ;;  %v3956_v11 = vld [vmem:[#allocation15 + $0x60] sm:$0xff] }
 0x607   :  { %3885 = vmatpush.msra.mxu1 %v3028_v17  ;;  %v3570_v13 = vadd.f32 %v3569_v35, %v3550_v46  ;;  %v3048_v17 = vld [vmem:[#allocation12 + $0x268] sm:$0xff]  ;;  %v3094_v46 = vld [vmem:[#allocation12 + $0x3d8] sm:$0xff] }
 0x608   :  { %3866 = vmatpush.msra.mxu0 %v2994_v56  ;;  %3845 = vmatpush.msra.mxu3 %v3091_v49  ;;  %v3046_v56 = vld [vmem:[#allocation12 + $0x258] sm:$0xff]  ;;  %v3084_v35 = vld [vmem:[#allocation12 + $0x388] sm:$0xff] }
 0x609   :  { %3886 = vmatpush.msra.mxu1 %v3026_v36  ;;  %v3044_v36 = vld [vmem:[#allocation12 + $0x248] sm:$0xff]  ;;  %v3958_v10 = vld [vmem:[#allocation15 + $0x70] sm:$0xff] }
 0x60a   :  { %3867 = vmatpush.msra.mxu0 %v2992_v48  ;;  %v3077_v48 = vld [vmem:[#allocation12 + $0x350] sm:$0xff] }
 0x60b   :  { %3887 = vmatpush.msra.mxu1 %v3024_v0  ;;  %v3589_v43 = vpop.f32.mrf.mxu2  ;;  %v3040_v0 = vld [vmem:[#allocation12 + $0x228] sm:$0xff]  ;;  %v3954_v49 = vld [vmem:[#allocation15 + $0x50] sm:$0xff] }
 0x60c   :  { %3868 = vmatpush.msra.mxu0 %v2990_v40  ;;  %v3590_v24 = vadd.f32 %v3589_v43, %v3570_v13  ;;  %v3609_v52 = vpop.f32.mrf.mxu3  ;;  %v3073_v40 = vld [vmem:[#allocation12 + $0x330] sm:$0xff]  ;;  %v3082_v13 = vld [vmem:[#allocation12 + $0x378] sm:$0xff]  ;;  %v3080_v43 = vld [vmem:[#allocation12 + $0x368] sm:$0xff] }
 0x60d   :  { %3888 = vmatpush.msra.mxu1 %v3022_v19  ;;  %v3038_v19 = vld [vmem:[#allocation12 + $0x218] sm:$0xff] }
 0x60e   :  { %3869 = vmatpush.msra.mxu0 %v2988_v60  ;;  %v6080_v9 = vadd.f32 %v3609_v52, %v3590_v24  ;;  %v3071_v60 = vld [vmem:[#allocation12 + $0x320] sm:$0xff]  ;;  %v3078_v24 = vld [vmem:[#allocation12 + $0x358] sm:$0xff]  ;;  %v3076_v52 = vld [vmem:[#allocation12 + $0x348] sm:$0xff] }
 0x60f   :  { %3889 = vmatpush.msra.mxu1 %v3020_v55  ;;  %v3069_v55 = vld [vmem:[#allocation12 + $0x310] sm:$0xff] }
 0x610   :  { %3870 = vmatpush.msra.mxu0 %v2986_v31  ;;  %v3774_v62 = vmax.f32 %v6080_v9, 0.0  ;;  %v3106_v31 = vperm.slane %v6043_v58, 3  ;;  %v3096_v58 = vld [vmem:[#allocation12 + $0x3e8] sm:$0xff]  ;;  %v3074_v9 = vld [vmem:[#allocation12 + $0x338] sm:$0xff] }
 0x611   :  { %3890 = vmatpush.msra.mxu1 %v3018_v4 }
 0x612   :  { %3871 = vmatpush.msra.mxu0 %v2984_v41  ;;  %3838 = vmatmul.f32.vlgmr.msra.gmra.mxu2 %v3774_v62 }
 0x613   :  { %3891 = vmatpush.msra.mxu1 %v3016_v7  ;;  %3902 = vmatpush.msra.mxu2 %v3066_v53  ;;  %v3070_v53 = vld [vmem:[#allocation12 + $0x318] sm:$0xff] }
 0x614   :  { %3872 = vmatpush.msra.mxu0 %v2982_v12 }
 0x615   :  { %3892 = vmatpush.msra.mxu1 %v3014_v6  ;;  %3903 = vmatpush.msra.mxu2 %v3064_v44  ;;  %v3068_v44 = vld [vmem:[#allocation12 + $0x308] sm:$0xff] }
 0x616   :  { %3873 = vmatpush.msra.mxu0 %v2980_v1 }
 0x617   :  { %3893 = vmatpush.msra.mxu1 %v3012_v15  ;;  %3904 = vmatpush.msra.mxu2 %v3062_v42  ;;  %v3957_v42 = vld [vmem:[#allocation15 + $0x68] sm:$0xff] }
 0x618   :  { %3874 = vmatpush.msra.mxu0 %v2978_v57 }
 0x619   :  { %3894 = vmatpush.msra.mxu1 %v3010_v22  ;;  %3905 = vmatpush.msra.mxu2 %v3060_v32  ;;  %v3955_v32 = vld [vmem:[#allocation15 + $0x58] sm:$0xff] }
 0x61a   :  { %3875 = vmatpush.msra.mxu0 %v2976_v50 }
 0x61b   :  { %3895 = vmatpush.msra.mxu1 %v3008_v26 }
 0x61c   :  { %3876 = vmatpush.msra.mxu0 %v2974_v63  ;;  %v3092_v63 = vld [vmem:[#allocation12 + $0x3c8] sm:$0xff] }
 0x61d   :  { %3896 = vmatpush.msra.mxu1 %v3006_v30  ;;  %v3090_v30 = vld [vmem:[#allocation12 + $0x3b8] sm:$0xff] }
 0x61e   :  { %3877 = vmatpush.msra.mxu0 %v2972_v3  ;;  %v3088_v3 = vld [vmem:[#allocation12 + $0x3a8] sm:$0xff] }
 0x61f   :  { %3897 = vmatpush.msra.mxu1 %v3004_v37  ;;  %3878 = vmatmul.f32.vlgmr.msra.gmra.mxu0 %v3772_v27  ;;  %v3058_v27 = vld [vmem:[#allocation12 + $0x2b8] sm:$0xff] }
 0x620   :  { %3898 = vmatmul.f32.vlgmr.msra.gmra.mxu1 %v3773_v21  ;;  %v3089_v21 = vld [vmem:[#allocation12 + $0x3b0] sm:$0xff]  ;;  %3906 = vmatpush.msra.mxu2 %v3058_v27  ;;  %v3086_v37 = vld [vmem:[#allocation12 + $0x398] sm:$0xff] }
 0x621   :  { %3846 = vmatpush.msra.mxu3 %v3089_v21  ;;  %3980 = vmatpush.msra.mxu0 %v3959_v18  ;;  %v3953_v27 = vld [vmem:[#allocation15 + $0x48] sm:$0xff]  ;;  %v3952_v21 = vld [vmem:[#allocation15 + $0x40] sm:$0xff] }
 0x622   :  { %3907 = vmatpush.msra.mxu2 %v3056_v25  ;;  %v3951_v25 = vld [vmem:[#allocation15 + $0x38] sm:$0xff] }
 0x623   :  { %3847 = vmatpush.msra.mxu3 %v3087_v38  ;;  %3981 = vmatpush.msra.mxu0 %v3958_v10  ;;  %v3950_v38 = vld [vmem:[#allocation15 + $0x30] sm:$0xff] }
 0x624   :  { %3908 = vmatpush.msra.mxu2 %v3054_v5  ;;  %v3949_v5 = vld [vmem:[#allocation15 + $0x28] sm:$0xff] }
 0x625   :  { %3848 = vmatpush.msra.mxu3 %v3085_v45  ;;  %3982 = vmatpush.msra.mxu0 %v3957_v42  ;;  %v3948_v45 = vld [vmem:[#allocation15 + $0x20] sm:$0xff] }
 0x626   :  { %3909 = vmatpush.msra.mxu2 %v3052_v29  ;;  %v3629_v4 = vpop.f32.mrf.mxu0  ;;  %v3947_v29 = vld [vmem:[#allocation15 + $0x18] sm:$0xff] }
 0x627   :  { %3849 = vmatpush.msra.mxu3 %v3083_v2  ;;  %v3630_v41 = vadd.f32 %v3629_v4, %v3106_v31  ;;  %v3649_v7 = vpop.f32.mrf.mxu1  ;;  %3983 = vmatpush.msra.mxu0 %v3956_v11  ;;  %v3946_v2 = vld [vmem:[#allocation15 + $0x10] sm:$0xff]  ;;  %v3964_v4 = vld [vmem:[#allocation15 + $0xa0] sm:$0xff] }
 0x628   :  { %3910 = vmatpush.msra.mxu2 %v3050_v34  ;;  %v3945_v34 = vld [vmem:[#allocation15 + $0x8] sm:$0xff] }
 0x629   :  { %3850 = vmatpush.msra.mxu3 %v3081_v16  ;;  %v3650_v33 = vadd.f32 %v3649_v7, %v3630_v41  ;;  %3984 = vmatpush.msra.mxu0 %v3955_v32  ;;  %v3944_v16 = vld [vmem:[#allocation15] sm:$0xff]  ;;  %v3963_v41 = vld [vmem:[#allocation15 + $0x98] sm:$0xff] }
 0x62a   :  { %3911 = vmatpush.msra.mxu2 %v3048_v17  ;;  %v3975_v17 = vld [vmem:[#allocation15 + $0xf8] sm:$0xff] }
 0x62b   :  { %3851 = vmatpush.msra.mxu3 %v3079_v59  ;;  %3985 = vmatpush.msra.mxu0 %v3954_v49  ;;  %v3974_v59 = vld [vmem:[#allocation15 + $0xf0] sm:$0xff] }
 0x62c   :  { %3912 = vmatpush.msra.mxu2 %v3046_v56  ;;  %4000 = vmatpush.msra.mxu1 %v3975_v17  ;;  %v3973_v56 = vld [vmem:[#allocation15 + $0xe8] sm:$0xff] }
 0x62d   :  { %3852 = vmatpush.msra.mxu3 %v3077_v48  ;;  %v3669_v54 = vpop.f32.mrf.mxu2  ;;  %3986 = vmatpush.msra.mxu0 %v3953_v27  ;;  %v3970_v48 = vld [vmem:[#allocation15 + $0xd0] sm:$0xff] }
 0x62e   :  { %3913 = vmatpush.msra.mxu2 %v3044_v36  ;;  %v3670_v47 = vadd.f32 %v3669_v54, %v3650_v33  ;;  %v3689_v12 = vpop.f32.mrf.mxu3  ;;  %4001 = vmatpush.msra.mxu1 %v3974_v59  ;;  %v3972_v36 = vld [vmem:[#allocation15 + $0xe0] sm:$0xff] }
 0x62f   :  { %3853 = vmatpush.msra.mxu3 %v3075_v28  ;;  %3987 = vmatpush.msra.mxu0 %v3952_v21  ;;  %v3968_v28 = vld [vmem:[#allocation15 + $0xc0] sm:$0xff] }
 0x630   :  { %3914 = vmatpush.msra.mxu2 %v3042_v39  ;;  %v3690_v6 = vadd.f32 %v3689_v12, %v3670_v47  ;;  %4002 = vmatpush.msra.mxu1 %v3973_v56  ;;  %v3971_v39 = vld [vmem:[#allocation15 + $0xd8] sm:$0xff]  ;;  %v3962_v12 = vld [vmem:[#allocation15 + $0x90] sm:$0xff] }
 0x631   :  { %3854 = vmatpush.msra.mxu3 %v3073_v40  ;;  %3988 = vmatpush.msra.mxu0 %v3951_v25  ;;  %v3776_v40 = vld [vmem:[#allocation14] sm:$0x3] }
 0x632   :  { %3915 = vmatpush.msra.mxu2 %v3040_v0  ;;  %4003 = vmatpush.msra.mxu1 %v3972_v36  ;;  %v3969_v0 = vld [vmem:[#allocation15 + $0xc8] sm:$0xff] }
 0x633   :  { %3855 = vmatpush.msra.mxu3 %v3071_v60  ;;  %3989 = vmatpush.msra.mxu0 %v3950_v38  ;;  %v3966_v60 = vld [vmem:[#allocation15 + $0xb0] sm:$0xff] }
 0x634   :  { %3916 = vmatpush.msra.mxu2 %v3038_v19  ;;  %4004 = vmatpush.msra.mxu1 %v3971_v39  ;;  %v3967_v19 = vld [vmem:[#allocation15 + $0xb8] sm:$0xff] }
 0x635   :  { %3856 = vmatpush.msra.mxu3 %v3069_v55  ;;  %3990 = vmatpush.msra.mxu0 %v3949_v5 }
 0x636   :  { %3917 = vmatpush.msra.mxu2 %v3036_v61  ;;  %4005 = vmatpush.msra.mxu1 %v3970_v48  ;;  %v3778_v61 = vperm.slane %v3776_v40, 0 }
 0x637   :  { %3918 = vmatmul.f32.vlgmr.msra.gmra.mxu2 %v3774_v62  ;;  %3857 = vmatpush.msra.mxu3 %v3067_v8  ;;  %v3072_v62 = vld [vmem:[#allocation12 + $0x328] sm:$0xff] }
 0x638   :  { %3991 = vmatpush.msra.mxu0 %v3948_v45  ;;  %4006 = vmatpush.msra.mxu1 %v3969_v0  ;;  %v3965_v8 = vld [vmem:[#allocation15 + $0xa8] sm:$0xff] }
 0x63a   :  { %3992 = vmatpush.msra.mxu0 %v3947_v29  ;;  %4007 = vmatpush.msra.mxu1 %v3968_v28 }
 0x63c   :  { %3993 = vmatpush.msra.mxu0 %v3946_v2  ;;  %4008 = vmatpush.msra.mxu1 %v3967_v19 }
 0x63e   :  { %3994 = vmatpush.msra.mxu0 %v3945_v34  ;;  %4009 = vmatpush.msra.mxu1 %v3966_v60 }
 0x640   :  { %3995 = vmatpush.msra.mxu0 %v3944_v16  ;;  %4010 = vmatpush.msra.mxu1 %v3965_v8 }
 0x642   :  { %4011 = vmatpush.msra.mxu1 %v3964_v4 }
 0x644   :  { %4012 = vmatpush.msra.mxu1 %v3963_v41 }
 0x646   :  { %4013 = vmatpush.msra.mxu1 %v3962_v12 }
 0x65a   :  { %v3709_v23 = vpop.f32.mrf.mxu0 }
 0x65b   :  { %v3710_v1 = vadd.f32 %v3709_v23, %v3690_v6  ;;  %v3729_v15 = vpop.f32.mrf.mxu1 }
 0x65d   :  { %v3730_v57 = vadd.f32 %v3729_v15, %v3710_v1  ;;  %v3961_v1 = vld [vmem:[#allocation15 + $0x88] sm:$0xff] }
 0x65e   :  { %4014 = vmatpush.msra.mxu1 %v3961_v1 }
 0x662   :  { %v3749_v22 = vpop.f32.mrf.mxu2 }
 0x663   :  { %v3750_v14 = vadd.f32 %v3749_v22, %v3730_v57  ;;  %v3769_v51 = vpop.f32.mrf.mxu3  ;;  %v3960_v57 = vld [vmem:[#allocation15 + $0x80] sm:$0xff]  ;;  %v3779_v22 = vperm.slane %v3776_v40, 1 }
 0x664   :  { %4015 = vmatpush.msra.mxu1 %v3960_v57 }
 0x665   :  { %v3770_v50 = vadd.f32 %v3769_v51, %v3750_v14 }
 0x667   :  { %v3775_v26 = vmax.f32 %v3770_v50, 0.0 }
 0x669   :  { %3858 = vmatmul.f32.vlgmr.msra.gmra.mxu3 %v3775_v26 }
 0x66a   :  { %3922 = vmatpush.msra.mxu3 %v3098_v20 }
 0x66c   :  { %3923 = vmatpush.msra.mxu3 %v3096_v58 }
 0x66e   :  { %3924 = vmatpush.msra.mxu3 %v3094_v46 }
 0x670   :  { %3925 = vmatpush.msra.mxu3 %v3092_v63 }
 0x672   :  { %3926 = vmatpush.msra.mxu3 %v3090_v30 }
 0x674   :  { %3927 = vmatpush.msra.mxu3 %v3088_v3  ;;  %v4337_v3 = vld [vmem:[#allocation17] ss:$0 sm:$0xff] }
 0x676   :  { %3928 = vmatpush.msra.mxu3 %v3086_v37 }
 0x678   :  { %3929 = vmatpush.msra.mxu3 %v3084_v35 }
 0x67a   :  { %3930 = vmatpush.msra.mxu3 %v3082_v13 }
 0x67c   :  { %3931 = vmatpush.msra.mxu3 %v3080_v43  ;;  %v3799_v55 = vpop.f32.mrf.mxu0 }
 0x67d   :  { %v3800_v31 = vadd.f32 %v3799_v55, %v3778_v61  ;;  %v3819_v7 = vpop.f32.mrf.mxu1 }
 0x67e   :  { %3932 = vmatpush.msra.mxu3 %v3078_v24 }
 0x67f   :  { %v3820_v33 = vadd.f32 %v3819_v7, %v3800_v31 }
 0x680   :  { %3933 = vmatpush.msra.mxu3 %v3076_v52 }
 0x682   :  { %3934 = vmatpush.msra.mxu3 %v3074_v9 }
 0x684   :  { %3935 = vmatpush.msra.mxu3 %v3072_v62 }
 0x686   :  { %3936 = vmatpush.msra.mxu3 %v3070_v53 }
 0x688   :  { %3937 = vmatpush.msra.mxu3 %v3068_v44 }
 0x689   :  { %3938 = vmatmul.f32.vlgmr.msra.gmra.mxu3 %v3775_v26 }
 0x695   :  { %v3839_v54 = vpop.f32.mrf.mxu2 }
 0x696   :  { %v3840_v47 = vadd.f32 %v3839_v54, %v3820_v33 }
 0x69c   :  { %v3879_v14 = vpop.f32.mrf.mxu0 }
 0x69d   :  { %v3880_v51 = vadd.f32 %v3879_v14, %v3779_v22  ;;  %v3899_v50 = vpop.f32.mrf.mxu1 }
 0x69f   :  { %v3900_v20 = vadd.f32 %v3899_v50, %v3880_v51 }
 0x6ba   :  { %v3919_v26 = vpop.f32.mrf.mxu2 }
 0x6bb   :  { %v3920_v58 = vadd.f32 %v3919_v26, %v3900_v20 }
 0x6ec   :  { %v3859_v6 = vpop.f32.mrf.mxu3 }
 0x6ed   :  { %v3860_v23 = vadd.f32 %v3859_v6, %v3840_v47 }
 0x6ef   :  { %v3942_v15 = vmax.f32 %v3860_v23, 0.0 }
 0x6f1   :  { %3996 = vmatmul.f32.vlgmr.msra.gmra.mxu0 %v3942_v15 }
 0x70c   :  { %v3939_v46 = vpop.f32.mrf.mxu3 }
 0x70d   :  { %v3940_v63 = vadd.f32 %v3939_v46, %v3920_v58 }
 0x70f   :  { %v3943_v30 = vmax.f32 %v3940_v63, 0.0 }
 0x711   :  { %4016 = vmatmul.f32.vlgmr.msra.gmra.mxu1 %v3943_v30 }
 0x76e   :  { %v3997_v37 = vpop.f32.mrf.mxu0 }
 0x76f   :  { %v3998_v35 = vadd.f32 %v4337_v3, %v3997_v37 }
 0x78e   :  { %v4017_v13 = vpop.f32.mrf.mxu1 }
 0x78f   :  { %v4018_v43 = vadd.f32 %v4017_v13, %v3998_v35 }
 0x791   :  { %4020 = vst [vmem:[#allocation18] sm:$0x3] %v4018_v43 }
 0x792   :  { %4031 = dma.vmem_to_hbm [thread:$0]  %s4027_s24, 32, %s4029_s0, [#allocation5]  }
 0x793   :  { %4601 = dma.done.wait [#allocation5], 32  }
 0x794   :  { %4602 = vsyncadd [#allocation5], 4294967264 }
 0x795   :  { %4036 = vsyncpa [#allocation4], 1 }
 0x796   :  { %4037 = vsyncpa [#allocation7], 1 }
 0x797   :  { %4038 = vsyncpa [#allocation10], 1 }
 0x798   :  { %4039 = vsyncpa [#allocation13], 1 }
 0x799   :  { %4040 = vsyncpa [#allocation16], 1 }
 0x79a   :  { %4041 = vsyncpa [#allocation5], 1 }

</bundles_post_ra>
